<compile_context>
chip_gen: v7x
topology: tpu7x:2x2x1
jax: 0.10.0
libtpu: 0.0.40
codegen_flags: <defaults>
</compile_context>

<pallas_src>
import functools
import math

import jax
import jax.numpy as jnp
from jax import lax
from jax.experimental import pallas as pl
from jax.experimental.pallas import tpu as pltpu


def _rope(t, cos, sin):
    """Interleaved rotary embedding along the last axis.

    cos/sin are pair-duplicated tables (cos[..., 2i] == cos[..., 2i+1]).
    The pair partner  partner[2i] = -t[2i+1], partner[2i+1] = t[2i]  is built
    with two XLU lane rotations + a select (no MXU matmul, no reshape).  Head
    slabs may be concatenated along the last axis: head_dim is even so pairs
    never straddle a head boundary, and wrap-around lanes are never selected.
    """
    n = t.shape[-1]
    axis = t.ndim - 1
    fwd = pltpu.roll(t, 1, axis)        # fwd[j] = t[j-1]
    bwd = pltpu.roll(t, n - 1, axis)    # bwd[j] = t[j+1]
    lane = lax.broadcasted_iota(jnp.int32, t.shape, axis)
    partner = jnp.where(lane % 2 == 0, -bwd, fwd)
    return t * cos + partner * sin


def _attention_kernel(xq_ref, xkv_ref, wq_ref, wkv_ref, wo_ref,
                      cosq_ref, sinq_ref, cosk_ref, sink_ref,
                      o_ref,
                      q_scr, acc_scr, m_scr, l_scr, oacc_scr,
                      *, n_rep, head_dim):
    f32 = jnp.float32
    bf16 = jnp.bfloat16

    qi = pl.program_id(1)
    g = pl.program_id(2)
    ki = pl.program_id(3)
    n_groups = pl.num_programs(2)
    n_kv = pl.num_programs(3)

    tq = xq_ref.shape[0]
    tk = xkv_ref.shape[0]
    q_start = qi * tq
    k_start = ki * tk

    # ---- new (batch, q-block, group): project Q for all heads of the group
    # in one matmul, apply RoPE (1/sqrt(hd) folded into cos/sin), reset the
    # online-softmax state.
    @pl.when(ki == 0)
    def _init():
        q = jnp.dot(xq_ref[...], wq_ref[...], preferred_element_type=f32)
        q = _rope(q, cosq_ref[...], sinq_ref[...])
        q_scr[...] = q.astype(bf16)
        acc_scr[...] = jnp.zeros_like(acc_scr)
        m_scr[...] = jnp.full_like(m_scr, -1e30)
        l_scr[...] = jnp.zeros_like(l_scr)

    # ---- online-softmax update; fully masked (future) kv tiles are skipped.
    @pl.when(k_start <= q_start + tq - 1)
    def _update():
        # fused K|V projection for this kv tile: one (TK, D) x (D, 2*hd) matmul
        kv = jnp.dot(xkv_ref[...], wkv_ref[...], preferred_element_type=f32)
        k = _rope(kv[:, :head_dim], cosk_ref[...], sink_ref[...]).astype(bf16)
        v = kv[:, head_dim:].astype(bf16)

        # in-kernel causal mask for this (q-block, kv-block) tile
        rows = q_start + lax.broadcasted_iota(jnp.int32, (tq, tk), 0)
        cols = k_start + lax.broadcasted_iota(jnp.int32, (tq, tk), 1)
        causal = cols <= rows
        neg = jnp.float32(-1e30)

        for r in range(n_rep):               # small static loop over group heads
            sl = slice(r * head_dim, (r + 1) * head_dim)
            s = jnp.einsum('qd,kd->qk', q_scr[:, sl], k,
                           preferred_element_type=f32)
            s = jnp.where(causal, s, neg)
            m_prev = m_scr[r]                                       # (TQ, 1)
            m_new = jnp.maximum(m_prev, jnp.max(s, axis=-1, keepdims=True))
            alpha = jnp.exp(m_prev - m_new)
            p = jnp.exp(s - m_new)
            l_scr[r] = alpha * l_scr[r] + jnp.sum(p, axis=-1, keepdims=True)
            acc_scr[:, sl] = alpha * acc_scr[:, sl] + jnp.dot(
                p.astype(bf16), v, preferred_element_type=f32)
            m_scr[r] = m_new

    # ---- last kv tile: normalize, apply the group's wo slice, accumulate
    # across groups into an f32 scratch; write the output block once.
    @pl.when(ki == n_kv - 1)
    def _finalize():
        inv_l = pl.reciprocal(l_scr[...], approx=True)              # (R, TQ, 1)
        for r in range(n_rep):
            sl = slice(r * head_dim, (r + 1) * head_dim)
            acc_scr[:, sl] = acc_scr[:, sl] * inv_l[r]
        attn = acc_scr[...].astype(bf16)                            # (TQ, R*hd)
        contrib = jnp.dot(attn, wo_ref[...], preferred_element_type=f32)

        @pl.when(g == 0)
        def _():
            oacc_scr[...] = contrib

        @pl.when(g > 0)
        def _():
            oacc_scr[...] = oacc_scr[...] + contrib

        @pl.when(g == n_groups - 1)
        def _():
            o_ref[...] = oacc_scr[...].astype(o_ref.dtype)


def attention_forward(x, wq_g, wkv_g, wo_g, cos_q, sin_q, cos_k, sin_k,
                      *, block_q=None, block_k=None):
    """Causal (start_pos = 0) llama attention forward.

    x:      (B, S, D)
    wq_g:   (G, D, R*hd)   per-kv-group query projection (pre-transposed W^T)
    wkv_g:  (G, D, 2*hd)   per-group fused [wk | wv] projection
    wo_g:   (G, R*hd, D)   per-group slice of the output projection
    cos_q/sin_q: (S, R*hd) pair-duplicated rotary tables tiled per head with
                           the 1/sqrt(hd) score scale folded in
    cos_k/sin_k: (S, hd)   pair-duplicated rotary tables
    """
    B, S, D = x.shape
    G, _, two_hd = wkv_g.shape
    hd = two_hd // 2
    r_hd = wq_g.shape[-1]
    n_rep = r_hd // hd

    tq = block_q or min(S, 128)
    tk = block_k or min(S, 128)
    assert S % tq == 0 and S % tk == 0 and tq % 8 == 0 and tk % 8 == 0

    out_dtype = x.dtype
    bf16 = jnp.bfloat16
    x_b = x.astype(bf16)                       # bf16 MXU inputs, half the DMA bytes
    wq_b, wkv_b, wo_b = (w.astype(bf16) for w in (wq_g, wkv_g, wo_g))

    grid = (B, S // tq, G, S // tk)
    kernel = functools.partial(_attention_kernel, n_rep=n_rep, head_dim=hd)

    # TODO(synk): for production shapes re-derive tq/tk per generation
    # (v7x has 64 MiB VMEM vs 128 MiB on v5e/v6e) and set vmem_limit_bytes.
    return pl.pallas_call(
        kernel,
        out_shape=jax.ShapeDtypeStruct((B, S, D), out_dtype),
        grid=grid,
        in_specs=[
            pl.BlockSpec((None, tq, D), lambda b, q, g, k: (b, q, 0)),     # x (Q side)
            pl.BlockSpec((None, tk, D), lambda b, q, g, k: (b, k, 0)),     # x (K/V side)
            pl.BlockSpec((None, D, r_hd), lambda b, q, g, k: (g, 0, 0)),   # wq group
            pl.BlockSpec((None, D, two_hd), lambda b, q, g, k: (g, 0, 0)), # wk|wv group
            pl.BlockSpec((None, r_hd, D), lambda b, q, g, k: (g, 0, 0)),   # wo group
            pl.BlockSpec((tq, r_hd), lambda b, q, g, k: (q, 0)),           # cos_q
            pl.BlockSpec((tq, r_hd), lambda b, q, g, k: (q, 0)),           # sin_q
            pl.BlockSpec((tk, hd), lambda b, q, g, k: (k, 0)),             # cos_k
            pl.BlockSpec((tk, hd), lambda b, q, g, k: (k, 0)),             # sin_k
        ],
        out_specs=pl.BlockSpec((None, tq, D), lambda b, q, g, k: (b, q, 0)),
        scratch_shapes=[
            pltpu.VMEM((tq, r_hd), jnp.bfloat16),      # rotated + scaled Q
            pltpu.VMEM((tq, r_hd), jnp.float32),       # per-head attention accumulators
            pltpu.VMEM((n_rep, tq, 1), jnp.float32),   # running max per head
            pltpu.VMEM((n_rep, tq, 1), jnp.float32),   # running denominator per head
            pltpu.VMEM((tq, D), jnp.float32),          # output accumulator over groups
        ],
        compiler_params=pltpu.CompilerParams(
            dimension_semantics=("parallel", "parallel", "arbitrary", "arbitrary")),
    )(x_b, x_b, wq_b, wkv_b, wo_b, cos_q, sin_q, cos_k, sin_k)


if __name__ == "__main__":
    # Small shapes consistent with the module: dim = n_heads * head_dim,
    # llama-style head_dim = 128, grouped-query attention (2 kv heads).
    B, S, D = 2, 128, 512
    H, KVH = 4, 2
    hd = D // H                 # 128
    n_rep = H // KVH            # 2
    theta = 500000.0

    key = jax.random.PRNGKey(0)
    kx, kq, kk, kv, ko = jax.random.split(key, 5)
    x = jax.random.normal(kx, (B, S, D), jnp.float32)
    # torch Linear(in, out, bias=False).weight is (out, in); store W^T = (in, out)
    wq = jax.random.normal(kq, (D, H * hd), jnp.float32) * 0.02
    wk = jax.random.normal(kk, (D, KVH * hd), jnp.float32) * 0.02
    wv = jax.random.normal(kv, (D, KVH * hd), jnp.float32) * 0.02
    wo = jax.random.normal(ko, (H * hd, D), jnp.float32) * 0.02

    # grouped / fused layouts (query head h belongs to kv group h // n_rep)
    wq_g = wq.reshape(D, KVH, n_rep * hd).transpose(1, 0, 2)    # (G, D, R*hd)
    wk_g = wk.reshape(D, KVH, hd).transpose(1, 0, 2)            # (G, D, hd)
    wv_g = wv.reshape(D, KVH, hd).transpose(1, 0, 2)            # (G, D, hd)
    wkv_g = jnp.concatenate([wk_g, wv_g], axis=-1)              # (G, D, 2*hd)
    wo_g = wo.reshape(KVH, n_rep * hd, D)                       # (G, R*hd, D)

    # rotary tables (interleaved-pair convention == torch.view_as_complex path)
    inv_freq = 1.0 / (theta ** (jnp.arange(0, hd, 2, dtype=jnp.float32) / hd))
    pos = jnp.arange(S, dtype=jnp.float32)
    ang = jnp.outer(pos, inv_freq)                              # (S, hd//2)
    cos_d = jnp.repeat(jnp.cos(ang), 2, axis=-1)                # (S, hd)
    sin_d = jnp.repeat(jnp.sin(ang), 2, axis=-1)                # (S, hd)
    scale = 1.0 / math.sqrt(hd)
    cos_q = jnp.tile(cos_d, (1, n_rep)) * scale                 # 1/sqrt(hd) folded in
    sin_q = jnp.tile(sin_d, (1, n_rep)) * scale
    cos_k, sin_k = cos_d, sin_d

    out = jax.block_until_ready(
        attention_forward(x, wq_g, wkv_g, wo_g, cos_q, sin_q, cos_k, sin_k,
                          block_q=64, block_k=64))

    # plain-JAX f32 reference mirroring the PyTorch module exactly
    def ref(x):
        xq = (x @ wq).reshape(B, S, H, hd)
        xk = (x @ wk).reshape(B, S, KVH, hd)
        xv = (x @ wv).reshape(B, S, KVH, hd)

        def rope_ref(u):
            sh = u.shape
            ur = u.reshape(*sh[:-1], hd // 2, 2)
            x0, x1 = ur[..., 0], ur[..., 1]
            c = jnp.cos(ang)[None, :, None, :]
            s = jnp.sin(ang)[None, :, None, :]
            return jnp.stack([x0 * c - x1 * s, x0 * s + x1 * c], axis=-1).reshape(sh)

        xq, xk = rope_ref(xq), rope_ref(xk)
        keys = jnp.repeat(xk, n_rep, axis=2).transpose(0, 2, 1, 3)   # repeat_kv
        vals = jnp.repeat(xv, n_rep, axis=2).transpose(0, 2, 1, 3)
        q = xq.transpose(0, 2, 1, 3)
        sc = q @ keys.transpose(0, 1, 3, 2) / math.sqrt(hd)
        mask = jnp.triu(jnp.full((S, S), -1e30, dtype=jnp.float32), k=1)
        p = jax.nn.softmax(sc + mask[None, None], axis=-1)
        o = (p @ vals).transpose(0, 2, 1, 3).reshape(B, S, H * hd)
        return o @ wo

    expected = ref(x)
    if not jnp.allclose(out, expected, atol=2e-2, rtol=2e-2):
        err = float(jnp.max(jnp.abs(out - expected)))
        raise AssertionError(f"Pallas attention mismatch vs reference (max abs err {err})")
    print("KERNEL_OK")
</pallas_src>

<mosaic_0001>
module attributes {stable_mosaic.version = 11 : i64} {
  func.func @_attention_kernel(%arg0: i32, %arg1: i32, %arg2: i32, %arg3: i32, %arg4: memref<1x64x512xbf16, #tpu.memory_space<vmem>>, %arg5: memref<1x64x512xbf16, #tpu.memory_space<vmem>>, %arg6: memref<1x512x256xbf16, #tpu.memory_space<vmem>>, %arg7: memref<1x512x256xbf16, #tpu.memory_space<vmem>>, %arg8: memref<1x256x512xbf16, #tpu.memory_space<vmem>>, %arg9: memref<64x256xf32, #tpu.memory_space<vmem>>, %arg10: memref<64x256xf32, #tpu.memory_space<vmem>>, %arg11: memref<64x128xf32, #tpu.memory_space<vmem>>, %arg12: memref<64x128xf32, #tpu.memory_space<vmem>>, %arg13: memref<1x64x512xf32, #tpu.memory_space<vmem>>, %arg14: memref<64x256xbf16, #tpu.memory_space<vmem>>, %arg15: memref<64x256xf32, #tpu.memory_space<vmem>>, %arg16: memref<2x64x1xf32, #tpu.memory_space<vmem>>, %arg17: memref<2x64x1xf32, #tpu.memory_space<vmem>>, %arg18: memref<64x512xf32, #tpu.memory_space<vmem>>) attributes {dimension_semantics = [#tpu.dimension_semantics<parallel>, #tpu.dimension_semantics<parallel>, #tpu.dimension_semantics<arbitrary>, #tpu.dimension_semantics<arbitrary>], iteration_bounds = array<i64: 2, 2, 2, 2>, scalar_prefetch = 0 : i64, scratch_operands = 5 : i64, tpu.core_type = #tpu.core_type<tc>, window_params = [{transform_indices = @transform_0, window_bounds = array<i64: 1, 64, 512>}, {transform_indices = @transform_1, window_bounds = array<i64: 1, 64, 512>}, {transform_indices = @transform_2, window_bounds = array<i64: 1, 512, 256>}, {transform_indices = @transform_3, window_bounds = array<i64: 1, 512, 256>}, {transform_indices = @transform_4, window_bounds = array<i64: 1, 256, 512>}, {transform_indices = @transform_5, window_bounds = array<i64: 64, 256>}, {transform_indices = @transform_6, window_bounds = array<i64: 64, 256>}, {transform_indices = @transform_7, window_bounds = array<i64: 64, 128>}, {transform_indices = @transform_8, window_bounds = array<i64: 64, 128>}, {transform_indices = @transform_9, window_bounds = array<i64: 1, 64, 512>}]} {
    %c64_i32 = arith.constant 64 : i32
    %0 = arith.muli %arg1, %c64_i32 : i32
    %c64_i32_0 = arith.constant 64 : i32
    %1 = arith.muli %arg3, %c64_i32_0 : i32
    %c0_i32 = arith.constant 0 : i32
    %2 = arith.cmpi eq, %arg3, %c0_i32 : i32
    %3 = arith.extui %2 : i1 to i32
    %c0_i32_1 = arith.constant 0 : i32
    %4 = arith.cmpi ne, %3, %c0_i32_1 : i32
    scf.if %4 {
      %c0 = arith.constant 0 : index
      %c0_6 = arith.constant 0 : index
      %c0_7 = arith.constant 0 : index
      %13 = vector.load %arg4[%c0, %c0_6, %c0_7] : memref<1x64x512xbf16, #tpu.memory_space<vmem>>, vector<1x64x512xbf16>
      %14 = vector.shape_cast %13 : vector<1x64x512xbf16> to vector<64x512xbf16>
      %c0_8 = arith.constant 0 : index
      %c0_9 = arith.constant 0 : index
      %c0_10 = arith.constant 0 : index
      %15 = vector.load %arg6[%c0_8, %c0_9, %c0_10] : memref<1x512x256xbf16, #tpu.memory_space<vmem>>, vector<1x512x256xbf16>
      %16 = vector.shape_cast %15 : vector<1x512x256xbf16> to vector<512x256xbf16>
      %cst = arith.constant dense<0.000000e+00> : vector<64x256xf32>
      %17 = tpu.matmul %14, %16, %cst {dimension_numbers = #tpu.dot_dimension_numbers<[1], [0], [0], [1], [0, 0, 1, 1], [], []>} : vector<64x512xbf16>, vector<512x256xbf16>, vector<64x256xf32> -> vector<64x256xf32>
      %c0_11 = arith.constant 0 : index
      %c0_12 = arith.constant 0 : index
      %18 = vector.load %arg9[%c0_11, %c0_12] : memref<64x256xf32, #tpu.memory_space<vmem>>, vector<64x256xf32>
      %c0_13 = arith.constant 0 : index
      %c0_14 = arith.constant 0 : index
      %19 = vector.load %arg10[%c0_13, %c0_14] : memref<64x256xf32, #tpu.memory_space<vmem>>, vector<64x256xf32>
      %c1_i32_15 = arith.constant 1 : i32
      %20 = tpu.dynamic_rotate %17 by %c1_i32_15 dim 1 : vector<64x256xf32>, i32 -> vector<64x256xf32>
      %c255_i32 = arith.constant 255 : i32
      %21 = tpu.dynamic_rotate %17 by %c255_i32 dim 1 : vector<64x256xf32>, i32 -> vector<64x256xf32>
      %22 = tpu.iota {dimensions = array<i32: 1>} : vector<64x256xi32>
      %c2_i32 = arith.constant 2 : i32
      %c0_i32_16 = arith.constant 0 : i32
      %23 = arith.cmpi eq, %c2_i32, %c0_i32_16 : i32
      %c1_i32_17 = arith.constant 1 : i32
      %24 = arith.select %23, %c1_i32_17, %c2_i32 : i32
      %25 = vector.broadcast %24 : i32 to vector<64x256xi32>
      %26 = arith.remsi %22, %25 : vector<64x256xi32>
      %c0_i32_18 = arith.constant 0 : i32
      %27 = vector.broadcast %c0_i32_18 : i32 to vector<64x256xi32>
      %28 = arith.cmpi ne, %26, %27 : vector<64x256xi32>
      %c0_i32_19 = arith.constant 0 : i32
      %29 = vector.broadcast %c0_i32_19 : i32 to vector<64x256xi32>
      %30 = arith.cmpi slt, %26, %29 : vector<64x256xi32>
      %c0_i32_20 = arith.constant 0 : i32
      %31 = arith.cmpi slt, %24, %c0_i32_20 : i32
      %32 = vector.broadcast %31 : i1 to vector<64x256xi1>
      %33 = vector.broadcast %32 : vector<64x256xi1> to vector<64x256xi1>
      %34 = arith.xori %30, %33 : vector<64x256xi1>
      %35 = arith.andi %34, %28 : vector<64x256xi1>
      %36 = vector.broadcast %24 : i32 to vector<64x256xi32>
      %37 = arith.addi %26, %36 : vector<64x256xi32>
      %38 = arith.select %35, %37, %26 : vector<64x256xi1>, vector<64x256xi32>
      %c0_i32_21 = arith.constant 0 : i32
      %39 = vector.broadcast %c0_i32_21 : i32 to vector<64x256xi32>
      %40 = arith.cmpi eq, %38, %39 : vector<64x256xi32>
      %cst_22 = arith.constant 0.000000e+00 : f32
      %41 = vector.broadcast %cst_22 : f32 to vector<64x256xf32>
      %42 = arith.subf %41, %21 : vector<64x256xf32>
      %43 = arith.select %40, %42, %20 : vector<64x256xi1>, vector<64x256xf32>
      %44 = arith.mulf %17, %18 : vector<64x256xf32>
      %45 = arith.mulf %43, %19 : vector<64x256xf32>
      %46 = arith.addf %44, %45 : vector<64x256xf32>
      %47 = arith.truncf %46 : vector<64x256xf32> to vector<64x256xbf16>
      %c0_23 = arith.constant 0 : index
      %c0_24 = arith.constant 0 : index
      %48 = vector.load %arg14[%c0_23, %c0_24] : memref<64x256xbf16, #tpu.memory_space<vmem>>, vector<64x256xbf16>
      tpu.vector_store %arg14[%c0_23, %c0_24], %47 {strides = array<i32>} : memref<64x256xbf16, #tpu.memory_space<vmem>>, vector<64x256xbf16>,
      %cst_25 = arith.constant 0.000000e+00 : f32
      %49 = vector.broadcast %cst_25 : f32 to vector<64x256xf32>
      %c0_26 = arith.constant 0 : index
      %c0_27 = arith.constant 0 : index
      %50 = vector.load %arg15[%c0_26, %c0_27] : memref<64x256xf32, #tpu.memory_space<vmem>>, vector<64x256xf32>
      tpu.vector_store %arg15[%c0_26, %c0_27], %49 {strides = array<i32>} : memref<64x256xf32, #tpu.memory_space<vmem>>, vector<64x256xf32>,
      %cst_28 = arith.constant -1.000000e+30 : f32
      %51 = vector.broadcast %cst_28 : f32 to vector<2x64x1xf32>
      %c0_29 = arith.constant 0 : index
      %c0_30 = arith.constant 0 : index
      %c0_31 = arith.constant 0 : index
      %52 = vector.load %arg16[%c0_29, %c0_30, %c0_31] : memref<2x64x1xf32, #tpu.memory_space<vmem>>, vector<2x64x1xf32>
      tpu.vector_store %arg16[%c0_29, %c0_30, %c0_31], %51 {strides = array<i32>} : memref<2x64x1xf32, #tpu.memory_space<vmem>>, vector<2x64x1xf32>,
      %cst_32 = arith.constant 0.000000e+00 : f32
      %53 = vector.broadcast %cst_32 : f32 to vector<2x64x1xf32>
      %c0_33 = arith.constant 0 : index
      %c0_34 = arith.constant 0 : index
      %c0_35 = arith.constant 0 : index
      %54 = vector.load %arg17[%c0_33, %c0_34, %c0_35] : memref<2x64x1xf32, #tpu.memory_space<vmem>>, vector<2x64x1xf32>
      tpu.vector_store %arg17[%c0_33, %c0_34, %c0_35], %53 {strides = array<i32>} : memref<2x64x1xf32, #tpu.memory_space<vmem>>, vector<2x64x1xf32>,
    } else {
    }
    %c64_i32_2 = arith.constant 64 : i32
    %5 = arith.addi %0, %c64_i32_2 : i32
    %c1_i32 = arith.constant 1 : i32
    %6 = arith.subi %5, %c1_i32 : i32
    %7 = arith.cmpi sle, %1, %6 : i32
    %8 = arith.extui %7 : i1 to i32
    %c0_i32_3 = arith.constant 0 : i32
    %9 = arith.cmpi ne, %8, %c0_i32_3 : i32
    scf.if %9 {
      %c0 = arith.constant 0 : index
      %c0_6 = arith.constant 0 : index
      %c0_7 = arith.constant 0 : index
      %13 = vector.load %arg5[%c0, %c0_6, %c0_7] : memref<1x64x512xbf16, #tpu.memory_space<vmem>>, vector<1x64x512xbf16>
      %14 = vector.shape_cast %13 : vector<1x64x512xbf16> to vector<64x512xbf16>
      %c0_8 = arith.constant 0 : index
      %c0_9 = arith.constant 0 : index
      %c0_10 = arith.constant 0 : index
      %15 = vector.load %arg7[%c0_8, %c0_9, %c0_10] : memref<1x512x256xbf16, #tpu.memory_space<vmem>>, vector<1x512x256xbf16>
      %16 = vector.shape_cast %15 : vector<1x512x256xbf16> to vector<512x256xbf16>
      %cst = arith.constant dense<0.000000e+00> : vector<64x256xf32>
      %17 = tpu.matmul %14, %16, %cst {dimension_numbers = #tpu.dot_dimension_numbers<[1], [0], [0], [1], [0, 0, 1, 1], [], []>} : vector<64x512xbf16>, vector<512x256xbf16>, vector<64x256xf32> -> vector<64x256xf32>
      %18 = vector.extract_strided_slice %17 {offsets = [0, 0], sizes = [64, 128], strides = [1, 1]} : vector<64x256xf32> to vector<64x128xf32>
      %c0_11 = arith.constant 0 : index
      %c0_12 = arith.constant 0 : index
      %19 = vector.load %arg11[%c0_11, %c0_12] : memref<64x128xf32, #tpu.memory_space<vmem>>, vector<64x128xf32>
      %c0_13 = arith.constant 0 : index
      %c0_14 = arith.constant 0 : index
      %20 = vector.load %arg12[%c0_13, %c0_14] : memref<64x128xf32, #tpu.memory_space<vmem>>, vector<64x128xf32>
      %c1_i32_15 = arith.constant 1 : i32
      %21 = tpu.dynamic_rotate %18 by %c1_i32_15 dim 1 : vector<64x128xf32>, i32 -> vector<64x128xf32>
      %c127_i32 = arith.constant 127 : i32
      %22 = tpu.dynamic_rotate %18 by %c127_i32 dim 1 : vector<64x128xf32>, i32 -> vector<64x128xf32>
      %23 = tpu.iota {dimensions = array<i32: 1>} : vector<64x128xi32>
      %c2_i32 = arith.constant 2 : i32
      %c0_i32_16 = arith.constant 0 : i32
      %24 = arith.cmpi eq, %c2_i32, %c0_i32_16 : i32
      %c1_i32_17 = arith.constant 1 : i32
      %25 = arith.select %24, %c1_i32_17, %c2_i32 : i32
      %26 = vector.broadcast %25 : i32 to vector<64x128xi32>
      %27 = arith.remsi %23, %26 : vector<64x128xi32>
      %c0_i32_18 = arith.constant 0 : i32
      %28 = vector.broadcast %c0_i32_18 : i32 to vector<64x128xi32>
      %29 = arith.cmpi ne, %27, %28 : vector<64x128xi32>
      %c0_i32_19 = arith.constant 0 : i32
      %30 = vector.broadcast %c0_i32_19 : i32 to vector<64x128xi32>
      %31 = arith.cmpi slt, %27, %30 : vector<64x128xi32>
      %c0_i32_20 = arith.constant 0 : i32
      %32 = arith.cmpi slt, %25, %c0_i32_20 : i32
      %33 = vector.broadcast %32 : i1 to vector<64x128xi1>
      %34 = vector.broadcast %33 : vector<64x128xi1> to vector<64x128xi1>
      %35 = arith.xori %31, %34 : vector<64x128xi1>
      %36 = arith.andi %35, %29 : vector<64x128xi1>
      %37 = vector.broadcast %25 : i32 to vector<64x128xi32>
      %38 = arith.addi %27, %37 : vector<64x128xi32>
      %39 = arith.select %36, %38, %27 : vector<64x128xi1>, vector<64x128xi32>
      %c0_i32_21 = arith.constant 0 : i32
      %40 = vector.broadcast %c0_i32_21 : i32 to vector<64x128xi32>
      %41 = arith.cmpi eq, %39, %40 : vector<64x128xi32>
      %cst_22 = arith.constant 0.000000e+00 : f32
      %42 = vector.broadcast %cst_22 : f32 to vector<64x128xf32>
      %43 = arith.subf %42, %22 : vector<64x128xf32>
      %44 = arith.select %41, %43, %21 : vector<64x128xi1>, vector<64x128xf32>
      %45 = arith.mulf %18, %19 : vector<64x128xf32>
      %46 = arith.mulf %44, %20 : vector<64x128xf32>
      %47 = arith.addf %45, %46 : vector<64x128xf32>
      %48 = arith.truncf %47 : vector<64x128xf32> to vector<64x128xbf16>
      %49 = vector.extract_strided_slice %17 {offsets = [0, 128], sizes = [64, 128], strides = [1, 1]} : vector<64x256xf32> to vector<64x128xf32>
      %50 = arith.truncf %49 : vector<64x128xf32> to vector<64x128xbf16>
      %51 = tpu.iota {dimensions = array<i32: 0>} : vector<64x64xi32>
      %52 = vector.broadcast %0 : i32 to vector<64x64xi32>
      %53 = arith.addi %52, %51 : vector<64x64xi32>
      %54 = tpu.iota {dimensions = array<i32: 1>} : vector<64x64xi32>
      %55 = vector.broadcast %1 : i32 to vector<64x64xi32>
      %56 = arith.addi %55, %54 : vector<64x64xi32>
      %57 = arith.cmpi sle, %56, %53 : vector<64x64xi32>
      %c0_23 = arith.constant 0 : index
      %c0_24 = arith.constant 0 : index
      %58 = vector.load %arg14[%c0_23, %c0_24] : memref<64x256xbf16, #tpu.memory_space<vmem>>, vector<64x128xbf16>
      "tpu.trace_start"() <{level = 10 : i32, message = "qd,kd->qk"}> : () -> ()
      %cst_25 = arith.constant dense<0.000000e+00> : vector<64x64xf32>
      %59 = tpu.matmul %58, %48, %cst_25 {dimension_numbers = #tpu.dot_dimension_numbers<[1], [1], [0], [0], [0, 0, 1, 0], [], []>} : vector<64x128xbf16>, vector<64x128xbf16>, vector<64x64xf32> -> vector<64x64xf32>
      %cst_26 = arith.constant -1.000000e+30 : f32
      "tpu.trace_stop"() : () -> ()
      %60 = vector.broadcast %cst_26 : f32 to vector<64x64xf32>
      %61 = arith.select %57, %59, %60 : vector<64x64xi1>, vector<64x64xf32>
      %c0_27 = arith.constant 0 : index
      %c0_28 = arith.constant 0 : index
      %c0_29 = arith.constant 0 : index
      %62 = vector.load %arg16[%c0_27, %c0_28, %c0_29] : memref<2x64x1xf32, #tpu.memory_space<vmem>>, vector<1x64x1xf32>
      %63 = vector.shape_cast %62 : vector<1x64x1xf32> to vector<64x1xf32>
      %cst_30 = arith.constant dense<0xFF800000> : vector<64xf32>
      %64 = vector.multi_reduction <maximumf>, %61, %cst_30 [1] : vector<64x64xf32> to vector<64xf32>
      %65 = vector.shape_cast %64 : vector<64xf32> to vector<64x1xf32>
      %66 = arith.maximumf %63, %65 : vector<64x1xf32>
      %67 = arith.subf %63, %66 : vector<64x1xf32>
      %68 = math.exp %67 : vector<64x1xf32>
      %69 = vector.broadcast %66 : vector<64x1xf32> to vector<64x64xf32>
      %70 = arith.subf %61, %69 : vector<64x64xf32>
      %71 = math.exp %70 : vector<64x64xf32>
      %c0_31 = arith.constant 0 : index
      %c0_32 = arith.constant 0 : index
      %c0_33 = arith.constant 0 : index
      %72 = vector.load %arg17[%c0_31, %c0_32, %c0_33] : memref<2x64x1xf32, #tpu.memory_space<vmem>>, vector<1x64x1xf32>
      %73 = vector.shape_cast %72 : vector<1x64x1xf32> to vector<64x1xf32>
      %74 = arith.mulf %68, %73 : vector<64x1xf32>
      %cst_34 = arith.constant dense<0.000000e+00> : vector<64xf32>
      %75 = vector.multi_reduction <add>, %71, %cst_34 [1] : vector<64x64xf32> to vector<64xf32>
      %76 = vector.shape_cast %75 : vector<64xf32> to vector<64x1xf32>
      %77 = arith.addf %74, %76 : vector<64x1xf32>
      %c0_35 = arith.constant 0 : index
      %c0_36 = arith.constant 0 : index
      %c0_37 = arith.constant 0 : index
      %78 = vector.load %arg17[%c0_35, %c0_36, %c0_37] : memref<2x64x1xf32, #tpu.memory_space<vmem>>, vector<1x64x1xf32>
      %79 = vector.shape_cast %78 : vector<1x64x1xf32> to vector<64x1xf32>
      %80 = vector.shape_cast %77 : vector<64x1xf32> to vector<1x64x1xf32>
      tpu.vector_store %arg17[%c0_35, %c0_36, %c0_37], %80 {strides = array<i32>} : memref<2x64x1xf32, #tpu.memory_space<vmem>>, vector<1x64x1xf32>,
      %c0_38 = arith.constant 0 : index
      %c0_39 = arith.constant 0 : index
      %81 = vector.load %arg15[%c0_38, %c0_39] : memref<64x256xf32, #tpu.memory_space<vmem>>, vector<64x128xf32>
      %82 = vector.broadcast %68 : vector<64x1xf32> to vector<64x128xf32>
      %83 = arith.mulf %82, %81 : vector<64x128xf32>
      %84 = arith.truncf %71 : vector<64x64xf32> to vector<64x64xbf16>
      %cst_40 = arith.constant dense<0.000000e+00> : vector<64x128xf32>
      %85 = tpu.matmul %84, %50, %cst_40 {dimension_numbers = #tpu.dot_dimension_numbers<[1], [0], [0], [1], [0, 0, 1, 1], [], []>} : vector<64x64xbf16>, vector<64x128xbf16>, vector<64x128xf32> -> vector<64x128xf32>
      %86 = arith.addf %83, %85 : vector<64x128xf32>
      %c0_41 = arith.constant 0 : index
      %c0_42 = arith.constant 0 : index
      %87 = vector.load %arg15[%c0_41, %c0_42] : memref<64x256xf32, #tpu.memory_space<vmem>>, vector<64x128xf32>
      tpu.vector_store %arg15[%c0_41, %c0_42], %86 {strides = array<i32>} : memref<64x256xf32, #tpu.memory_space<vmem>>, vector<64x128xf32>,
      %c0_43 = arith.constant 0 : index
      %c0_44 = arith.constant 0 : index
      %c0_45 = arith.constant 0 : index
      %88 = vector.load %arg16[%c0_43, %c0_44, %c0_45] : memref<2x64x1xf32, #tpu.memory_space<vmem>>, vector<1x64x1xf32>
      %89 = vector.shape_cast %88 : vector<1x64x1xf32> to vector<64x1xf32>
      %90 = vector.shape_cast %66 : vector<64x1xf32> to vector<1x64x1xf32>
      tpu.vector_store %arg16[%c0_43, %c0_44, %c0_45], %90 {strides = array<i32>} : memref<2x64x1xf32, #tpu.memory_space<vmem>>, vector<1x64x1xf32>,
      %c0_46 = arith.constant 0 : index
      %c128 = arith.constant 128 : index
      %91 = vector.load %arg14[%c0_46, %c128] : memref<64x256xbf16, #tpu.memory_space<vmem>>, vector<64x128xbf16>
      "tpu.trace_start"() <{level = 10 : i32, message = "qd,kd->qk"}> : () -> ()
      %cst_47 = arith.constant dense<0.000000e+00> : vector<64x64xf32>
      %92 = tpu.matmul %91, %48, %cst_47 {dimension_numbers = #tpu.dot_dimension_numbers<[1], [1], [0], [0], [0, 0, 1, 0], [], []>} : vector<64x128xbf16>, vector<64x128xbf16>, vector<64x64xf32> -> vector<64x64xf32>
      %cst_48 = arith.constant -1.000000e+30 : f32
      "tpu.trace_stop"() : () -> ()
      %93 = vector.broadcast %cst_48 : f32 to vector<64x64xf32>
      %94 = arith.select %57, %92, %93 : vector<64x64xi1>, vector<64x64xf32>
      %c1 = arith.constant 1 : index
      %c0_49 = arith.constant 0 : index
      %c0_50 = arith.constant 0 : index
      %95 = vector.load %arg16[%c1, %c0_49, %c0_50] : memref<2x64x1xf32, #tpu.memory_space<vmem>>, vector<1x64x1xf32>
      %96 = vector.shape_cast %95 : vector<1x64x1xf32> to vector<64x1xf32>
      %cst_51 = arith.constant dense<0xFF800000> : vector<64xf32>
      %97 = vector.multi_reduction <maximumf>, %94, %cst_51 [1] : vector<64x64xf32> to vector<64xf32>
      %98 = vector.shape_cast %97 : vector<64xf32> to vector<64x1xf32>
      %99 = arith.maximumf %96, %98 : vector<64x1xf32>
      %100 = arith.subf %96, %99 : vector<64x1xf32>
      %101 = math.exp %100 : vector<64x1xf32>
      %102 = vector.broadcast %99 : vector<64x1xf32> to vector<64x64xf32>
      %103 = arith.subf %94, %102 : vector<64x64xf32>
      %104 = math.exp %103 : vector<64x64xf32>
      %c1_52 = arith.constant 1 : index
      %c0_53 = arith.constant 0 : index
      %c0_54 = arith.constant 0 : index
      %105 = vector.load %arg17[%c1_52, %c0_53, %c0_54] : memref<2x64x1xf32, #tpu.memory_space<vmem>>, vector<1x64x1xf32>
      %106 = vector.shape_cast %105 : vector<1x64x1xf32> to vector<64x1xf32>
      %107 = arith.mulf %101, %106 : vector<64x1xf32>
      %cst_55 = arith.constant dense<0.000000e+00> : vector<64xf32>
      %108 = vector.multi_reduction <add>, %104, %cst_55 [1] : vector<64x64xf32> to vector<64xf32>
      %109 = vector.shape_cast %108 : vector<64xf32> to vector<64x1xf32>
      %110 = arith.addf %107, %109 : vector<64x1xf32>
      %c1_56 = arith.constant 1 : index
      %c0_57 = arith.constant 0 : index
      %c0_58 = arith.constant 0 : index
      %111 = vector.load %arg17[%c1_56, %c0_57, %c0_58] : memref<2x64x1xf32, #tpu.memory_space<vmem>>, vector<1x64x1xf32>
      %112 = vector.shape_cast %111 : vector<1x64x1xf32> to vector<64x1xf32>
      %113 = vector.shape_cast %110 : vector<64x1xf32> to vector<1x64x1xf32>
      tpu.vector_store %arg17[%c1_56, %c0_57, %c0_58], %113 {strides = array<i32>} : memref<2x64x1xf32, #tpu.memory_space<vmem>>, vector<1x64x1xf32>,
      %c0_59 = arith.constant 0 : index
      %c128_60 = arith.constant 128 : index
      %114 = vector.load %arg15[%c0_59, %c128_60] : memref<64x256xf32, #tpu.memory_space<vmem>>, vector<64x128xf32>
      %115 = vector.broadcast %101 : vector<64x1xf32> to vector<64x128xf32>
      %116 = arith.mulf %115, %114 : vector<64x128xf32>
      %117 = arith.truncf %104 : vector<64x64xf32> to vector<64x64xbf16>
      %cst_61 = arith.constant dense<0.000000e+00> : vector<64x128xf32>
      %118 = tpu.matmul %117, %50, %cst_61 {dimension_numbers = #tpu.dot_dimension_numbers<[1], [0], [0], [1], [0, 0, 1, 1], [], []>} : vector<64x64xbf16>, vector<64x128xbf16>, vector<64x128xf32> -> vector<64x128xf32>
      %119 = arith.addf %116, %118 : vector<64x128xf32>
      %c0_62 = arith.constant 0 : index
      %c128_63 = arith.constant 128 : index
      %120 = vector.load %arg15[%c0_62, %c128_63] : memref<64x256xf32, #tpu.memory_space<vmem>>, vector<64x128xf32>
      tpu.vector_store %arg15[%c0_62, %c128_63], %119 {strides = array<i32>} : memref<64x256xf32, #tpu.memory_space<vmem>>, vector<64x128xf32>,
      %c1_64 = arith.constant 1 : index
      %c0_65 = arith.constant 0 : index
      %c0_66 = arith.constant 0 : index
      %121 = vector.load %arg16[%c1_64, %c0_65, %c0_66] : memref<2x64x1xf32, #tpu.memory_space<vmem>>, vector<1x64x1xf32>
      %122 = vector.shape_cast %121 : vector<1x64x1xf32> to vector<64x1xf32>
      %123 = vector.shape_cast %99 : vector<64x1xf32> to vector<1x64x1xf32>
      tpu.vector_store %arg16[%c1_64, %c0_65, %c0_66], %123 {strides = array<i32>} : memref<2x64x1xf32, #tpu.memory_space<vmem>>, vector<1x64x1xf32>,
    } else {
    }
    %c1_i32_4 = arith.constant 1 : i32
    %10 = arith.cmpi eq, %arg3, %c1_i32_4 : i32
    %11 = arith.extui %10 : i1 to i32
    %c0_i32_5 = arith.constant 0 : i32
    %12 = arith.cmpi ne, %11, %c0_i32_5 : i32
    scf.if %12 {
      %c0 = arith.constant 0 : index
      %c0_6 = arith.constant 0 : index
      %c0_7 = arith.constant 0 : index
      %13 = vector.load %arg17[%c0, %c0_6, %c0_7] : memref<2x64x1xf32, #tpu.memory_space<vmem>>, vector<2x64x1xf32>
      %14 = tpu.reciprocal %13 {approx = true} : vector<2x64x1xf32> -> vector<2x64x1xf32>
      %c0_8 = arith.constant 0 : index
      %c0_9 = arith.constant 0 : index
      %15 = vector.load %arg15[%c0_8, %c0_9] : memref<64x256xf32, #tpu.memory_space<vmem>>, vector<64x128xf32>
      %16 = vector.extract_strided_slice %14 {offsets = [0, 0, 0], sizes = [1, 64, 1], strides = [1, 1, 1]} : vector<2x64x1xf32> to vector<1x64x1xf32>
      %17 = vector.shape_cast %16 : vector<1x64x1xf32> to vector<64x1xf32>
      %18 = vector.broadcast %17 : vector<64x1xf32> to vector<64x128xf32>
      %19 = arith.mulf %15, %18 : vector<64x128xf32>
      %c0_10 = arith.constant 0 : index
      %c0_11 = arith.constant 0 : index
      %20 = vector.load %arg15[%c0_10, %c0_11] : memref<64x256xf32, #tpu.memory_space<vmem>>, vector<64x128xf32>
      tpu.vector_store %arg15[%c0_10, %c0_11], %19 {strides = array<i32>} : memref<64x256xf32, #tpu.memory_space<vmem>>, vector<64x128xf32>,
      %c0_12 = arith.constant 0 : index
      %c128 = arith.constant 128 : index
      %21 = vector.load %arg15[%c0_12, %c128] : memref<64x256xf32, #tpu.memory_space<vmem>>, vector<64x128xf32>
      %22 = vector.extract_strided_slice %14 {offsets = [1, 0, 0], sizes = [1, 64, 1], strides = [1, 1, 1]} : vector<2x64x1xf32> to vector<1x64x1xf32>
      %23 = vector.shape_cast %22 : vector<1x64x1xf32> to vector<64x1xf32>
      %24 = vector.broadcast %23 : vector<64x1xf32> to vector<64x128xf32>
      %25 = arith.mulf %21, %24 : vector<64x128xf32>
      %c0_13 = arith.constant 0 : index
      %c128_14 = arith.constant 128 : index
      %26 = vector.load %arg15[%c0_13, %c128_14] : memref<64x256xf32, #tpu.memory_space<vmem>>, vector<64x128xf32>
      tpu.vector_store %arg15[%c0_13, %c128_14], %25 {strides = array<i32>} : memref<64x256xf32, #tpu.memory_space<vmem>>, vector<64x128xf32>,
      %c0_15 = arith.constant 0 : index
      %c0_16 = arith.constant 0 : index
      %27 = vector.load %arg15[%c0_15, %c0_16] : memref<64x256xf32, #tpu.memory_space<vmem>>, vector<64x256xf32>
      %28 = arith.truncf %27 : vector<64x256xf32> to vector<64x256xbf16>
      %c0_17 = arith.constant 0 : index
      %c0_18 = arith.constant 0 : index
      %c0_19 = arith.constant 0 : index
      %29 = vector.load %arg8[%c0_17, %c0_18, %c0_19] : memref<1x256x512xbf16, #tpu.memory_space<vmem>>, vector<1x256x512xbf16>
      %30 = vector.shape_cast %29 : vector<1x256x512xbf16> to vector<256x512xbf16>
      %cst = arith.constant dense<0.000000e+00> : vector<64x512xf32>
      %31 = tpu.matmul %28, %30, %cst {dimension_numbers = #tpu.dot_dimension_numbers<[1], [0], [0], [1], [0, 0, 1, 1], [], []>} : vector<64x256xbf16>, vector<256x512xbf16>, vector<64x512xf32> -> vector<64x512xf32>
      %c0_i32_20 = arith.constant 0 : i32
      %32 = arith.cmpi eq, %arg2, %c0_i32_20 : i32
      %33 = arith.extui %32 : i1 to i32
      %c0_i32_21 = arith.constant 0 : i32
      %34 = arith.cmpi ne, %33, %c0_i32_21 : i32
      scf.if %34 {
        %c0_26 = arith.constant 0 : index
        %c0_27 = arith.constant 0 : index
        %41 = vector.load %arg18[%c0_26, %c0_27] : memref<64x512xf32, #tpu.memory_space<vmem>>, vector<64x512xf32>
        tpu.vector_store %arg18[%c0_26, %c0_27], %31 {strides = array<i32>} : memref<64x512xf32, #tpu.memory_space<vmem>>, vector<64x512xf32>,
      } else {
      }
      %c0_i32_22 = arith.constant 0 : i32
      %35 = arith.cmpi sgt, %arg2, %c0_i32_22 : i32
      %36 = arith.extui %35 : i1 to i32
      %c0_i32_23 = arith.constant 0 : i32
      %37 = arith.cmpi ne, %36, %c0_i32_23 : i32
      scf.if %37 {
        %c0_26 = arith.constant 0 : index
        %c0_27 = arith.constant 0 : index
        %41 = vector.load %arg18[%c0_26, %c0_27] : memref<64x512xf32, #tpu.memory_space<vmem>>, vector<64x512xf32>
        %42 = arith.addf %41, %31 : vector<64x512xf32>
        %c0_28 = arith.constant 0 : index
        %c0_29 = arith.constant 0 : index
        %43 = vector.load %arg18[%c0_28, %c0_29] : memref<64x512xf32, #tpu.memory_space<vmem>>, vector<64x512xf32>
        tpu.vector_store %arg18[%c0_28, %c0_29], %42 {strides = array<i32>} : memref<64x512xf32, #tpu.memory_space<vmem>>, vector<64x512xf32>,
      } else {
      }
      %c1_i32_24 = arith.constant 1 : i32
      %38 = arith.cmpi eq, %arg2, %c1_i32_24 : i32
      %39 = arith.extui %38 : i1 to i32
      %c0_i32_25 = arith.constant 0 : i32
      %40 = arith.cmpi ne, %39, %c0_i32_25 : i32
      scf.if %40 {
        %c0_26 = arith.constant 0 : index
        %c0_27 = arith.constant 0 : index
        %41 = vector.load %arg18[%c0_26, %c0_27] : memref<64x512xf32, #tpu.memory_space<vmem>>, vector<64x512xf32>
        %c0_28 = arith.constant 0 : index
        %c0_29 = arith.constant 0 : index
        %c0_30 = arith.constant 0 : index
        %42 = vector.load %arg13[%c0_28, %c0_29, %c0_30] : memref<1x64x512xf32, #tpu.memory_space<vmem>>, vector<1x64x512xf32>
        %43 = vector.shape_cast %42 : vector<1x64x512xf32> to vector<64x512xf32>
        %44 = vector.shape_cast %41 : vector<64x512xf32> to vector<1x64x512xf32>
        tpu.vector_store %arg13[%c0_28, %c0_29, %c0_30], %44 {strides = array<i32>} : memref<1x64x512xf32, #tpu.memory_space<vmem>>, vector<1x64x512xf32>,
      } else {
      }
    } else {
    }
    return
  }
  func.func @transform_0(%arg0: i32, %arg1: i32, %arg2: i32, %arg3: i32) -> (i32, i32, i32) {
    %c0_i32 = arith.constant 0 : i32
    %c0_i32_0 = arith.constant 0 : i32
    return %arg0, %arg1, %c0_i32 : i32, i32, i32
  }
  func.func @transform_1(%arg0: i32, %arg1: i32, %arg2: i32, %arg3: i32) -> (i32, i32, i32) {
    %c0_i32 = arith.constant 0 : i32
    %c0_i32_0 = arith.constant 0 : i32
    return %arg0, %arg3, %c0_i32 : i32, i32, i32
  }
  func.func @transform_2(%arg0: i32, %arg1: i32, %arg2: i32, %arg3: i32) -> (i32, i32, i32) {
    %c0_i32 = arith.constant 0 : i32
    %c0_i32_0 = arith.constant 0 : i32
    %c0_i32_1 = arith.constant 0 : i32
    return %arg2, %c0_i32, %c0_i32_0 : i32, i32, i32
  }
  func.func @transform_3(%arg0: i32, %arg1: i32, %arg2: i32, %arg3: i32) -> (i32, i32, i32) {
    %c0_i32 = arith.constant 0 : i32
    %c0_i32_0 = arith.constant 0 : i32
    %c0_i32_1 = arith.constant 0 : i32
    return %arg2, %c0_i32, %c0_i32_0 : i32, i32, i32
  }
  func.func @transform_4(%arg0: i32, %arg1: i32, %arg2: i32, %arg3: i32) -> (i32, i32, i32) {
    %c0_i32 = arith.constant 0 : i32
    %c0_i32_0 = arith.constant 0 : i32
    %c0_i32_1 = arith.constant 0 : i32
    return %arg2, %c0_i32, %c0_i32_0 : i32, i32, i32
  }
  func.func @transform_5(%arg0: i32, %arg1: i32, %arg2: i32, %arg3: i32) -> (i32, i32) {
    %c0_i32 = arith.constant 0 : i32
    %c0_i32_0 = arith.constant 0 : i32
    return %arg1, %c0_i32 : i32, i32
  }
  func.func @transform_6(%arg0: i32, %arg1: i32, %arg2: i32, %arg3: i32) -> (i32, i32) {
    %c0_i32 = arith.constant 0 : i32
    %c0_i32_0 = arith.constant 0 : i32
    return %arg1, %c0_i32 : i32, i32
  }
  func.func @transform_7(%arg0: i32, %arg1: i32, %arg2: i32, %arg3: i32) -> (i32, i32) {
    %c0_i32 = arith.constant 0 : i32
    %c0_i32_0 = arith.constant 0 : i32
    return %arg3, %c0_i32 : i32, i32
  }
  func.func @transform_8(%arg0: i32, %arg1: i32, %arg2: i32, %arg3: i32) -> (i32, i32) {
    %c0_i32 = arith.constant 0 : i32
    %c0_i32_0 = arith.constant 0 : i32
    return %arg3, %c0_i32 : i32, i32
  }
  func.func @transform_9(%arg0: i32, %arg1: i32, %arg2: i32, %arg3: i32) -> (i32, i32, i32) {
    %c0_i32 = arith.constant 0 : i32
    %c0_i32_0 = arith.constant 0 : i32
    return %arg0, %arg1, %c0_i32 : i32, i32, i32
  }
}

</mosaic_0001>

<bundles_post_ra>
// kernel: tpu_custom_call.1
= control target key start
LH: loop header
LB: loop body
LE: loop exit
PB: predicated region body
PF: predicated region fallthrough
CT: control target
= control target key end

     0   :  { %s8444_s0 = inlined_call_operand.hbm [shape: bf16[2,128,512], index: 0, kind: input, shape index: {}]   ;;  %s8445_s1 = inlined_call_operand.hbm [shape: bf16[2,128,512], index: 1, kind: input, shape index: {}]   ;;  %s8446_s2 = inlined_call_operand.hbm [shape: bf16[2,512,256], index: 2, kind: input, shape index: {}]   ;;  %s8447_s3 = inlined_call_operand.hbm [shape: bf16[2,512,256], index: 3, kind: input, shape index: {}]   ;;  %s8448_s4 = inlined_call_operand.hbm [shape: bf16[2,256,512], index: 4, kind: input, shape index: {}]   ;;  %s8449_s5 = inlined_call_operand.hbm [shape: f32[128,256], index: 5, kind: input, shape index: {}]   ;;  %s8450_s6 = inlined_call_operand.hbm [shape: f32[128,256], index: 6, kind: input, shape index: {}]   ;;  %s8451_s7 = inlined_call_operand.hbm [shape: f32[128,128], index: 7, kind: input, shape index: {}]   ;;  %s8452_s8 = inlined_call_operand.hbm [shape: f32[128,128], index: 8, kind: input, shape index: {}]   ;;  %s8453_s9 = inlined_call_operand.hbm [shape: f32[2,128,512], index: 9, kind: output, shape index: {}]  }
   0x1   :  { %8533 = sst [smem:[#allocation68_spill]] %s8444_s0 }
   0x2   :  { %8534 = sst [smem:[#allocation69_spill]] %s8445_s1 }
   0x3   :  { %8535 = sst [smem:[#allocation70_spill]] %s8446_s2 }
   0x4   :  { %8536 = sst [smem:[#allocation71_spill]] %s8447_s3 }
   0x5   :  { %8537 = sst [smem:[#allocation72_spill]] %s8448_s4 }
   0x6   :  { %8538 = sst [smem:[#allocation73_spill]] %s8449_s5 }
   0x7   :  { %8539 = sst [smem:[#allocation74_spill]] %s8450_s6 }
   0x8   :  { %8540 = sst [smem:[#allocation75_spill]] %s8451_s7 }
   0x9   :  { %8541 = sst [smem:[#allocation76_spill]] %s8452_s8 }
   0xa   :  { %8542 = sst [smem:[#allocation77_spill]] %s8453_s9 }
   0xb   :  { %14 = vsyncpa [#allocation8], 0 }
   0xc   :  { %16 = vsyncpa [#allocation8 + $0x1], 0 }
   0xd   :  { %17 = vsyncpa [#allocation11], 0 }
   0xe   :  { %19 = vsyncpa [#allocation11 + $0x1], 0 }
   0xf   :  { %20 = vsyncpa [#allocation14], 0 }
  0x10   :  { %22 = vsyncpa [#allocation14 + $0x1], 0 }
  0x11   :  { %23 = vsyncpa [#allocation17], 0 }
  0x12   :  { %25 = vsyncpa [#allocation17 + $0x1], 0 }
  0x13   :  { %26 = vsyncpa [#allocation20], 0 }
  0x14   :  { %28 = vsyncpa [#allocation20 + $0x1], 0 }
  0x15   :  { %29 = vsyncpa [#allocation9], 0 }
  0x16   :  { %31 = vsyncpa [#allocation9 + $0x1], 0  ;;  %s6200_s30 = smov 0   ;;  %s6202_s10 = smov 0  }
  0x17   :  { %s6204_s11 = smov 0   ;;  %s6206_s12 = smov 0  }
  0x18   :  { %s6208_s13 = smov 0   ;;  %s6210_s14 = smov 0  }
  0x19   :  { %s6212_s15 = smov 0   ;;  %s6214_s16 = smov 0  }
  0x1a   :  { %s6216_s17 = smov 0   ;;  %s6218_s18 = smov 0  }
  0x1b   :  { %8543 = sst [smem:[#allocation30_spill]] %s6216_s17  ;;  %s6220_s19 = smov 0  }
  0x1c   :  { %s6222_s20 = smov 0   ;;  %s6224_s21 = smov 0  }
  0x1d   :  { %s6226_s22 = smov 0   ;;  %s6228_s23 = smov 0  }
  0x1e   :  { %s6230_s24 = smov 0   ;;  %s6232_s25 = smov 0  }
  0x1f   :  { %s6234_s26 = smov 0   ;;  %s6236_s27 = smov 0  }
  0x20   :  { %s6238_s28 = smov 0   ;;  %s6240_s29 = smov 0  }
  0x21   :  { %s6242_s9 = smov 0   ;;  %s6244_s4 = smov 0  }
  0x22   :  { %s6246_s2 = smov 0  }
  0x23 LB: > { %s8545_s17 = sld [smem:[#allocation30_spill]]  ;;  %8547 = sst [smem:[#allocation31_spill]] %s6036_s10  ;;  %s6124_s2 = sphi %s6246_s2, %s37_s2   ;;  %s6120_s4 = sphi %s6244_s4, %s8746_s4   ;;  %s6116_s9 = sphi %s6242_s9, %s8745_s9   ;;  %s6112_s29 = sphi %s6240_s29, %s8744_s29   ;;  %s6108_s28 = sphi %s6238_s28, %s8736_s28   ;;  %s6104_s27 = sphi %s6236_s27, %s8735_s27   ;;  %s6100_s26 = sphi %s6234_s26, %s8743_s26   ;;  %s6096_s25 = sphi %s6232_s25, %s8734_s25   ;;  %s6092_s24 = sphi %s6230_s24, %s8742_s24   ;;  %s6088_s23 = sphi %s6228_s23, %s8732_s23   ;;  %s6084_s22 = sphi %s6226_s22, %s8731_s22   ;;  %s6080_s21 = sphi %s6224_s21, %s8730_s21   ;;  %s6076_s20 = sphi %s6222_s20, %s8729_s20   ;;  %s6072_s19 = sphi %s6220_s19, %s8728_s19   ;;  %s6068_s18 = sphi %s6218_s18, %s8727_s18   ;;  %s6060_s16 = sphi %s6214_s16, %s8725_s16   ;;  %s6056_s15 = sphi %s6212_s15, %s8724_s15   ;;  %s6052_s14 = sphi %s6210_s14, %s8723_s14   ;;  %s6048_s13 = sphi %s6208_s13, %s8722_s13   ;;  %s6044_s12 = sphi %s6206_s12, %s8721_s12   ;;  %s6040_s11 = sphi %s6204_s11, %s8720_s11   ;;  %s6036_s10 = sphi %s6202_s10, %s8719_s10   ;;  %s6032_s30 = sphi %s6200_s30, %s8718_s30  }
  0x24   : > { %8546 = sst [smem:[#allocation30_spill]] %s6032_s30  ;;  %p8471_p1 = scmp.eq.s32.totalorder %s6124_s2, 0 }
  0x25   : > { %8548 = sst [smem:[#allocation32_spill]] %s6040_s11  ;;  %p107_p3 = scmp.ne.s32.totalorder %s6076_s20, %s6072_s19 }
  0x26   : > { %8549 = sst [smem:[#allocation33_spill]] %s6048_s13  ;;  %p113_p4 = scmp.ne.s32.totalorder %s6072_s19, %s6068_s18 }
  0x27   : > { %8550 = sst [smem:[#allocation34_spill]] %s6052_s14  ;;  %p6343_p5 = por %p107_p3, %p8471_p1 }
  0x28   : > { %8551 = sst [smem:[#allocation35_spill]] %s6060_s16  ;;  %p8469_p7 = scmp.lt.s32.totalorder %s6124_s2, 16 }
  0x29   : > { %8552 = sst [smem:[#allocation36_spill]] %s8545_s17  ;;  %s6356_s0 = sand.u32 1, %s6124_s2  }
  0x2a   : > { %8553 = sst [smem:[#allocation37_spill]] %s6072_s19  ;;  %s373_s18 = sand.u32 1, %s6076_s20  }
  0x2b   : > { %8554 = sst [smem:[#allocation38_spill]] %s6076_s20  ;;  %s4773_s19 = sshll.u32 %s6108_s28, 5 }
  0x2c   : > { %8555 = sst [smem:[#allocation39_spill]] %s6080_s21  ;;  %s8571_s1 = sld [smem:[#allocation69_spill]] }
  0x2d   : > { %8556 = sst [smem:[#allocation40_spill]] %s6084_s22  ;;  %p6373_p8 = pnand %p8469_p7, %p6343_p5 }
  0x2e   : > { %8557 = sst [smem:[#allocation41_spill]] %s6088_s23 }
  0x2f   : > { %8558 = sst [smem:[#allocation42_spill]] %s6092_s24  ;;  %p5610_p12 = pneg %p6373_p8 }
  0x30   : > { %8559 = sst [smem:[#allocation43_spill]] %s6096_s25  ;;  %s52_s25 = sadd.s32 1, %s6108_s28 }
  0x31   : > { %8560 = sst [smem:[#allocation44_spill]] %s6100_s26  ;;  %p6322_p0 = scmp.ge.s32.totalorder %s52_s25, 2 }
  0x32   : > { %8561 = sst [smem:[#allocation45_spill]] %s6104_s27  ;;  %s6319_s27 = sadd.s32 4294967295, %s6124_s2  }
  0x33   : > { %8562 = sst [smem:[#allocation46_spill]] %s6108_s28  ;;  %p8470_p2 = scmp.eq.s32.totalorder %s6319_s27, 0 }
  0x34   : > { %8563 = sst [smem:[#allocation47_spill]] %s6112_s29  ;;  %s8748_s25 = smov (%p6322_p0, %s52_s25), 0 }
  0x35   : > { %8564 = sst [smem:[#allocation48_spill]] %s6120_s4  ;;  %s6339_s21 = ssub.s32 %s6108_s28, %s8748_s25 }
  0x36   : > { %8565 = sst [smem:[#allocation49_spill]] %s6319_s27  ;;  %p6349_p6 = por %p113_p4, %p8470_p2 }
  0x37   : > { %8567 = sst [smem:[#allocation50_spill]] %s8748_s25  ;;  %s8474_s26 = sshll.u32 %s6120_s4, 6 }
  0x38   : > { %s8569_s23 = scalar_select %p6349_p6, 1, 0 }
  0x39   : > { %s4486_s25 = sshll.u32 %s373_s18, 7  ;;  %s382_s8 = sadd.s32 %s4773_s19, %s8474_s26 }
  0x3a   : > { %8570 = sst [smem:[#allocation51_spill]] %s8569_s23  ;;  %s375_s7 = scalar_lea.vmem [#allocation10], %s4486_s25 }
  0x3b   : > { %s385_s6 = sshll.u32 %s375_s7, 4  ;;  %s4490_s30 = sshll.u32 %s382_s8, 6  ;;  %s6362_s6 = int_to_ptr.vmem [resolvable:$true] %s385_s6 }
  0x3c   : > { %s6367_s5 = scalar_lea.hbm %s8571_s1, %s4490_s30  ;;  %s8473_s7 = scalar_lea.sflag [#allocation11], %s6356_s0 }
  0x3d   : > { %s5608_s8 = scalar_lea.hbm %s6367_s5, 2048  ;;  %s5613_s11 = scalar_lea.hbm %s8571_s1, 8192 }
  0x3e   : > { %p5609_p11 = scmp.ne.s32.totalorder %s6367_s5, %s5608_s8  ;;  %p5614_p4 = scmp.lt.u32.totalorder %s6367_s5, %s8571_s1 }
  0x3f   : > { %p5615_p5 = scmp.lt.u32.totalorder %s5613_s11, %s5608_s8  ;;  %p5617_p2 = scmp.lt.u32.totalorder %s5608_s8, %s6367_s5 }
  0x40   : > { %p5611_p13 = pnand %p5610_p12, %p5609_p11 }
  0x41   : > { %p5616_p7 = por %p5615_p5, %p5614_p4 }
  0x42   : > { %p5612_p3 = pneg %p5611_p13 }
  0x43   : > { %p5618_p1 = por %p5617_p2, %p5616_p7 }
  0x45   : > { %p5619_p9 = pnand %p5618_p1, %p5612_p3 }
  0x47   : > { %5622 = shalt.err (!%p5619_p9)
}
  0x48   : > { %s5623_s25 = scalar_lea.vmem %s6362_s6, 2048  ;;  %s6126_s30 = smov [#allocation10]  }
  0x49   : > { %p5624_p11 = scmp.ne.s32.totalorder %s6362_s6, %s5623_s25  ;;  %s5628_s10 = sshll.u32 %s6126_s30, 4  ;;  %s5629_s10 = int_to_ptr.vmem [resolvable:$false] %s5628_s10 }
  0x4a   : > { %s5630_s19 = scalar_lea.vmem %s5629_s10, 4096  ;;  %p5631_p6 = scmp.lt.s32.totalorder %s6362_s6, %s5629_s10 }
  0x4b   : > { %p5626_p13 = pnand %p5624_p11, %p5610_p12  ;;  %p5632_p4 = scmp.lt.s32.totalorder %s5630_s19, %s5623_s25 }
  0x4d   : > { %p5627_p10 = pneg %p5626_p13  ;;  %p5633_p5 = por %p5632_p4, %p5631_p6 }
  0x4f   : > { %p5634_p2 = pnand %p5633_p5, %p5627_p10 }
  0x51   : > { %5637 = shalt.err (!%p5634_p2)
}
  0x52   : > { %s8475_s8 = smov 256   ;;  %s8477_s11 = smov 16  }
  0x53   : > { %4938 = dma.hbm_to_vmem [thread:$0]  (!%p6373_p8), %s6367_s5, 2048, %s6362_s6, %s8473_s7, %s8475_s8, %s8475_s8, %s8477_s11  }
  0x54   : > { %p8573_p1 = scmp.lt.s32.totalorder %s6124_s2, 17  ;;  %p8574_p6 = scmp.ge.s32.totalorder %s6124_s2, 1 }
  0x55   : > { %s55_s25 = sadd.s32 1, %s6112_s29  ;;  %s126_s30 = sadd.s32 1, %s8545_s17 }
  0x56   : > { %p6414_p7 = pnand %p8574_p6, %p8573_p1  ;;  %s8750_s25 = smov (!%p6322_p0, %s55_s25), %s6112_s29 }
  0x57   : > { %p133_p9 = scmp.ne.s32.totalorder %s8545_s17, %s6060_s16  ;;  %p139_p10 = scmp.ne.s32.totalorder %s6060_s16, %s6056_s15 }
  0x58   : > { %s8575_s22 = scalar_select %p6414_p7, 1, 0 }
  0x59   : > { %p8481_p12 = scmp.ge.s32.totalorder %s8750_s25, 2  ;;  %s397_s5 = sand.u32 1, %s8545_s17  }
  0x5a   : > { %8576 = sst [smem:[#allocation52_spill]] %s8575_s22  ;;  %p8577_p8 = scmp.eq.s32.totalorder %s6124_s2, 0 }
  0x5b   : > { %p8578_p11 = scmp.eq.s32.totalorder %s6319_s27, 0  ;;  %s6444_s24 = sshll.u32 %s397_s5, 9 }
  0x5c   : > { %p135_p3 = por %p133_p9, %p8577_p8  ;;  %s6447_s10 = sshll.u32 %s6112_s29, 13 }
  0x5d   : > { %p6435_p13 = por %p139_p10, %p8578_p11  ;;  %p8582_p0 = scmp.lt.s32.totalorder %s6124_s2, 16 }
  0x5e   : > { %s6442_s18 = scalar_select %p8481_p12, 0, %s8750_s25  }
  0x5f   : > { %s8579_s6 = scalar_select %p6435_p13, 1, 0 }
  0x60   : > { %8581 = sst [smem:[#allocation54_spill]] %s6442_s18  ;;  %s123_s15 = ssub.s32 %s6112_s29, %s6442_s18 }
  0x61   : > { %8580 = sst [smem:[#allocation53_spill]] %s8579_s6  ;;  %p6453_p4 = pnand %p8582_p0, %p135_p3 }
  0x62   : > { %p124_p5 = scmp.eq.s32.totalorder %s123_s15, 0  ;;  %s8586_s3 = sld [smem:[#allocation71_spill]] }
  0x63   : > { %s8583_s19 = scalar_select %p6453_p4, 1, 0 }
  0x64   : > { %s6458_s7 = scalar_select %p124_p5, %s8545_s17, %s126_s30  }
  0x65   : > { %8584 = sst [smem:[#allocation55_spill]] %s8583_s19  ;;  %s420_s5 = scalar_lea.vmem [#allocation13], %s6444_s24 }
  0x66   : > { %8585 = sst [smem:[#allocation56_spill]] %s6458_s7  ;;  %s427_s1 = sshll.u32 %s420_s5, 4  ;;  %s6467_s1 = int_to_ptr.vmem [resolvable:$true] %s427_s1 }
  0x67   : > { %p6474_p1 = pneg %p6453_p4 }
  0x68   : > { %s6464_s11 = scalar_lea.hbm %s8586_s3, %s6447_s10  ;;  %s5643_s15 = scalar_lea.hbm %s8586_s3, 16384 }
  0x69   : > { %s5638_s29 = scalar_lea.hbm %s6464_s11, 8192  ;;  %p5644_p10 = scmp.lt.u32.totalorder %s6464_s11, %s8586_s3 }
  0x6a   : > { %p5639_p2 = scmp.ne.s32.totalorder %s6464_s11, %s5638_s29  ;;  %p5645_p8 = scmp.lt.u32.totalorder %s5643_s15, %s5638_s29 }
  0x6b   : > { %p5647_p11 = scmp.lt.u32.totalorder %s5638_s29, %s6464_s11 }
  0x6c   : > { %p5641_p6 = pnand %p6474_p1, %p5639_p2  ;;  %p5646_p3 = por %p5645_p8, %p5644_p10 }
  0x6e   : > { %p5642_p9 = pneg %p5641_p6  ;;  %p5648_p0 = por %p5647_p11, %p5646_p3 }
  0x70   : > { %p5649_p5 = pnand %p5648_p0, %p5642_p9 }
  0x72   : > { %5652 = shalt.err (!%p5649_p5)
}
  0x73   : > { %s5653_s18 = scalar_lea.vmem %s6467_s1, 8192  ;;  %s6129_s26 = smov [#allocation13]  }
  0x74   : > { %p5654_p2 = scmp.ne.s32.totalorder %s6467_s1, %s5653_s18  ;;  %s5658_s8 = sshll.u32 %s6129_s26, 4  ;;  %s5659_s8 = int_to_ptr.vmem [resolvable:$false] %s5658_s8 }
  0x75   : > { %s5660_s7 = scalar_lea.vmem %s5659_s8, 16384  ;;  %p5661_p13 = scmp.lt.s32.totalorder %s6467_s1, %s5659_s8 }
  0x76   : > { %p5656_p6 = pnand %p5654_p2, %p6474_p1  ;;  %p5662_p7 = scmp.lt.s32.totalorder %s5660_s7, %s5653_s18 }
  0x78   : > { %p5657_p12 = pneg %p5656_p6  ;;  %p5663_p10 = por %p5662_p7, %p5661_p13 }
  0x7a   : > { %p5664_p8 = pnand %p5663_p10, %p5657_p12 }
  0x7c   : > { %5667 = shalt.err (!%p5664_p8)
}
  0x7d   : > { %s8483_s29 = smov 128   ;;  %s8485_s18 = smov 8  }
  0x7e   : > { %s8588_s15 = scalar_lea.sflag [#allocation14], %s6356_s0  ;;  %s59_s5 = sadd.s32 1, %s6116_s9 }
  0x7f   : > { %4944 = dma.hbm_to_vmem [thread:$0]  (!%p6453_p4), %s6464_s11, 8192, %s6467_s1, %s8588_s15, %s8483_s29, %s8483_s29, %s8485_s18  }
  0x80   : > { %p8589_p7 = scmp.ge.s32.totalorder %s8750_s25, 2  ;;  %s204_s26 = sadd.s32 1, %s6052_s14 }
  0x81   : > { %p211_p12 = scmp.ne.s32.totalorder %s6052_s14, %s6048_s13  ;;  %p217_p9 = scmp.ne.s32.totalorder %s6048_s13, %s6044_s12 }
  0x82   : > { %s8752_s5 = smov (!%p8589_p7, %s59_s5), %s6116_s9  ;;  %p8590_p3 = scmp.eq.s32.totalorder %s6124_s2, 0 }
  0x83   : > { %p61_p13 = scmp.ge.s32.totalorder %s8752_s5, 2  ;;  %s8593_s7 = sadd.s32 1, %s6120_s4 }
  0x84   : > { %p6513_p11 = por %p211_p12, %p8590_p3  ;;  %p8594_p0 = scmp.eq.s32.totalorder %s6319_s27, 0 }
  0x85   : > { %s8754_s5 = smov (%p61_p13, %s8752_s5), 0  ;;  %s8756_s7 = smov (!%p61_p13, %s8593_s7), %s6120_s4 }
  0x86   : > { %8592 = sst [smem:[#allocation57_spill]] %s8754_s5  ;;  %s6524_s1 = ssub.s32 %s6116_s9, %s8754_s5 }
  0x87   : > { %p6528_p5 = por %p217_p9, %p8594_p0  ;;  %p65_p2 = scmp.ge.s32.totalorder %s8756_s7, 2 }
  0x88   : > { %p202_p6 = scmp.eq.s32.totalorder %s6524_s1, 0  ;;  %s460_s11 = sand.u32 1, %s6052_s14  }
  0x89   : > { %s8595_s12 = scalar_select %p6528_p5, 1, 0 }
  0x8a   : > { %s8495_s25 = sshll.u32 %s6116_s9, 11  ;;  %s8758_s7 = smov (%p65_p2, %s8756_s7), 0 }
  0x8b   : > { %8596 = sst [smem:[#allocation58_spill]] %s8595_s12  ;;  %s6542_s29 = ssub.s32 %s6120_s4, %s8758_s7 }
  0x8c   : > { %8597 = sst [smem:[#allocation59_spill]] %s8758_s7  ;;  %s6544_s18 = sshll.u32 %s460_s11, 7 }
  0x8d   : > { %s6538_s15 = scalar_select %p202_p6, %s6052_s14, %s204_s26  }
  0x8e   : > { %s97_s3 = sor.u32 %s6339_s21, %s6542_s29  ;;  %s8599_s12 = sld [smem:[#allocation73_spill]] }
  0x8f   : > { %8598 = sst [smem:[#allocation60_spill]] %s6538_s15  ;;  %p98_p10 = scmp.eq.s32.totalorder %s97_s3, 0 }
  0x90   : > { %s462_s26 = scalar_lea.vmem [#allocation16], %s6544_s18  ;;  %p8601_p8 = scmp.lt.s32.totalorder %s6124_s2, 16 }
  0x91   : > { %s470_s15 = sshll.u32 %s462_s26, 4  ;;  %s8604_s7 = sadd.s32 1, %s6076_s20  ;;  %s6569_s15 = int_to_ptr.vmem [resolvable:$true] %s470_s15 }
  0x92   : > { %p6560_p7 = pnand %p8601_p8, %p6513_p11  ;;  %s8510_s17 = scalar_lea.sflag [#allocation17], %s6356_s0 }
  0x93   : > { %s6567_s3 = scalar_select %p98_p10, %s6076_s20, %s8604_s7  }
  0x94   : > { %s8600_s6 = smov %s8599_s12  ;;  %s6553_s13 = scalar_lea.hbm %s8599_s12, %s8495_s25 }
  0x95   : > { %s8602_s11 = scalar_select %p6560_p7, 1, 0 }
  0x96   : > { %8605 = sst [smem:[#allocation62_spill]] %s6567_s3  ;;  %s5668_s5 = scalar_lea.hbm %s6553_s13, 2048 }
  0x97   : > { %8603 = sst [smem:[#allocation61_spill]] %s8602_s11  ;;  %p5669_p12 = scmp.ne.s32.totalorder %s6553_s13, %s5668_s5 }
  0x98   : > { %p8515_p13 = pneg %p6560_p7  ;;  %s5673_s26 = scalar_lea.hbm %s8600_s6, 4096 }
  0x99   : > { %p5674_p11 = scmp.lt.u32.totalorder %s6553_s13, %s8600_s6  ;;  %p5675_p0 = scmp.lt.u32.totalorder %s5673_s26, %s5668_s5 }
  0x9a   : > { %p5671_p9 = pnand %p8515_p13, %p5669_p12  ;;  %p5677_p6 = scmp.lt.u32.totalorder %s5668_s5, %s6553_s13 }
  0x9b   : > { %p5676_p2 = por %p5675_p0, %p5674_p11 }
  0x9c   : > { %p5672_p3 = pneg %p5671_p9 }
  0x9d   : > { %p5678_p10 = por %p5677_p6, %p5676_p2 }
  0x9f   : > { %p5679_p8 = pnand %p5678_p10, %p5672_p3 }
  0xa1   : > { %5682 = shalt.err (!%p5679_p8)
}
  0xa2   : > { %s5683_s7 = scalar_lea.vmem %s6569_s15, 2048  ;;  %s6132_s8 = smov [#allocation16]  }
  0xa3   : > { %p5684_p12 = scmp.ne.s32.totalorder %s6569_s15, %s5683_s7  ;;  %s5688_s12 = sshll.u32 %s6132_s8, 4  ;;  %s5689_s12 = int_to_ptr.vmem [resolvable:$false] %s5688_s12 }
  0xa4   : > { %s5690_s14 = scalar_lea.vmem %s5689_s12, 4096  ;;  %p5691_p4 = scmp.lt.s32.totalorder %s6569_s15, %s5689_s12 }
  0xa5   : > { %p5686_p9 = pnand %p5684_p12, %p8515_p13  ;;  %p5692_p11 = scmp.lt.s32.totalorder %s5690_s14, %s5683_s7 }
  0xa7   : > { %p5687_p5 = pneg %p5686_p9  ;;  %p5693_p0 = por %p5692_p11, %p5691_p4 }
  0xa9   : > { %p5694_p2 = pnand %p5693_p0, %p5687_p5 }
  0xab   : > { %5697 = shalt.err (!%p5694_p2)
}
  0xac   : > { %s8606_s25 = smov 16   ;;  %s8607_s5 = smov 256  }
  0xad   : > { %s8608_s26 = sld [smem:[#allocation32_spill]]  ;;  %s8609_s8 = sld [smem:[#allocation31_spill]] }
  0xae   : > { %s8610_s7 = sld [smem:[#allocation30_spill]]  ;;  %p254_p4 = scmp.eq.s32.totalorder %s6339_s21, 0 }
  0xaf   : > { %4950 = dma.hbm_to_vmem [thread:$0]  (!%p6560_p7), %s6553_s13, 2048, %s6569_s15, %s8510_s17, %s8607_s5, %s8607_s5, %s8606_s25  }
  0xb0   : > { %s8611_s12 = sshll.u32 %s6116_s9, 11  ;;  %s8612_s3 = sld [smem:[#allocation74_spill]] }
  0xb1   : > { %s484_s16 = scalar_lea.vmem [#allocation18], %s6544_s18  ;;  %p8614_p3 = scmp.eq.s32.totalorder %s6124_s2, 0 }
  0xb2   : > { %s492_s23 = sshll.u32 %s484_s16, 4  ;;  %p8615_p8 = scmp.eq.s32.totalorder %s6319_s27, 0  ;;  %s6645_s23 = int_to_ptr.vmem [resolvable:$true] %s492_s23 }
  0xb3   : > { %s256_s22 = sadd.s32 1, %s8608_s26  ;;  %p263_p5 = scmp.ne.s32.totalorder %s8608_s26, %s8609_s8 }
  0xb4   : > { %s6615_s11 = scalar_select %p254_p4, %s8608_s26, %s256_s22  }
  0xb5   : > { %p265_p6 = por %p263_p5, %p8614_p3  ;;  %p269_p10 = scmp.ne.s32.totalorder %s8609_s8, %s8610_s7 }
  0xb6   : > { %s6608_s20 = scalar_lea.hbm %s8612_s3, %s8611_s12  ;;  %8613 = sst [smem:[#allocation30_spill]] %s6615_s11 }
  0xb7   : > { %s504_s19 = sand.u32 1, %s8608_s26   ;;  %p6624_p12 = por %p269_p10, %p8615_p8 }
  0xb8   : > { %s6628_s21 = sshll.u32 %s504_s19, 6  ;;  %s4781_s6 = sshll.u32 %s6108_s28, 10 }
  0xb9   : > { %s8616_s13 = scalar_select %p6624_p12, 1, 0 }
  0xba   : > { %s8618_s15 = sld [smem:[#allocation75_spill]]  ;;  %s506_s22 = scalar_lea.vmem [#allocation19], %s6628_s21 }
  0xbb   : > { %8617 = sst [smem:[#allocation63_spill]] %s8616_s13  ;;  %s513_s26 = sshll.u32 %s506_s22, 4  ;;  %s6637_s26 = int_to_ptr.vmem [resolvable:$true] %s513_s26 }
  0xbc   : > { %p8620_p9 = scmp.lt.s32.totalorder %s6124_s2, 16  ;;  %8623 = sst [smem:[#allocation65_spill]] %s6645_s23 }
  0xbd   : > { %s8624_s14 = sld [smem:[#allocation76_spill]]  ;;  %s8520_s16 = scalar_lea.sflag [#allocation20], %s6356_s0 }
  0xbe   : > { %p6641_p11 = pnand %p8620_p9, %p265_p6 }
  0xc0   : > { %s8619_s17 = smov %s8618_s15  ;;  %s6634_s12 = scalar_lea.hbm %s8618_s15, %s4781_s6 }
  0xc1   : > { %s8621_s8 = scalar_select %p6641_p11, 1, 0 }
  0xc2   : > { %s5698_s15 = scalar_lea.hbm %s6634_s12, 1024  ;;  %p8527_p2 = pneg %p6641_p11 }
  0xc3   : > { %8622 = sst [smem:[#allocation64_spill]] %s8621_s8  ;;  %s6650_s18 = scalar_lea.hbm %s8624_s14, %s4781_s6 }
  0xc4   : > { %p5699_p0 = scmp.ne.s32.totalorder %s6634_s12, %s5698_s15  ;;  %s5703_s11 = scalar_lea.hbm %s8619_s17, 2048 }
  0xc5   : > { %p5704_p3 = scmp.lt.u32.totalorder %s6634_s12, %s8619_s17  ;;  %p5705_p6 = scmp.lt.u32.totalorder %s5703_s11, %s5698_s15 }
  0xc6   : > { %p5701_p4 = pnand %p8527_p2, %p5699_p0  ;;  %p5707_p8 = scmp.lt.u32.totalorder %s5698_s15, %s6634_s12 }
  0xc7   : > { %p5706_p10 = por %p5705_p6, %p5704_p3 }
  0xc8   : > { %p5702_p5 = pneg %p5701_p4 }
  0xc9   : > { %p5708_p9 = por %p5707_p8, %p5706_p10 }
  0xcb   : > { %p5709_p13 = pnand %p5708_p9, %p5702_p5 }
  0xcd   : > { %5712 = shalt.err (!%p5709_p13)
}
  0xce   : > { %s5713_s6 = scalar_lea.vmem %s6637_s26, 1024  ;;  %s6133_s28 = smov [#allocation19]  }
  0xcf   : > { %p5714_p0 = scmp.ne.s32.totalorder %s6637_s26, %s5713_s6  ;;  %s5718_s19 = sshll.u32 %s6133_s28, 4  ;;  %s5719_s19 = int_to_ptr.vmem [resolvable:$false] %s5718_s19 }
  0xd0   : > { %s5720_s23 = scalar_lea.vmem %s5719_s19, 2048  ;;  %p5721_p7 = scmp.lt.s32.totalorder %s6637_s26, %s5719_s19 }
  0xd1   : > { %p5716_p4 = pnand %p5714_p0, %p8527_p2  ;;  %p5722_p3 = scmp.lt.s32.totalorder %s5720_s23, %s5713_s6 }
  0xd3   : > { %p5717_p12 = pneg %p5716_p4  ;;  %p5723_p6 = por %p5722_p3, %p5721_p7 }
  0xd5   : > { %p5724_p10 = pnand %p5723_p6, %p5717_p12 }
  0xd7   : > { %5727 = shalt.err (!%p5724_p10)
}
  0xd8   : > { %s8625_s11 = smov 8   ;;  %s8626_s13 = smov 128  }
  0xd9   : > { %s8627_s7 = sld [smem:[#allocation41_spill]]  ;;  %s8628_s14 = sld [smem:[#allocation40_spill]] }
  0xda   : > { %s8629_s15 = sld [smem:[#allocation39_spill]]  ;;  %s527_s22 = scalar_lea.vmem [#allocation21], %s6628_s21 }
  0xdb   : > { %4956 = dma.hbm_to_vmem [thread:$0]  (!%p6641_p11), %s6634_s12, 1024, %s6637_s26, %s8520_s16, %s8626_s13, %s8626_s13, %s8625_s11  }
  0xdc   : > { %s6684_s6 = sshll.u32 %s527_s22, 4  ;;  %s4478_s28 = sadd.s32 4294967294, %s6124_s2   ;;  %s6814_s6 = int_to_ptr.vmem [resolvable:$true] %s6684_s6 }
  0xdd   : > { %s69_s19 = sor.u32 %s6524_s1, %s6542_s29  ;;  %p321_p5 = scmp.eq.s32.totalorder %s6319_s27, 15 }
  0xde   : > { %p70_p7 = scmp.eq.s32.totalorder %s69_s19, 0  ;;  %p8631_p8 = scmp.eq.s32.totalorder %s6124_s2, 0 }
  0xdf   : > { %s72_s23 = sadd.s32 1, %s8627_s7  ;;  %p79_p13 = scmp.ne.s32.totalorder %s8627_s7, %s8628_s14 }
  0xe0   : > { %p85_p12 = scmp.ne.s32.totalorder %s8628_s14, %s8629_s15  ;;  %p8633_p0 = scmp.eq.s32.totalorder %s6319_s27, 0 }
  0xe1   : > { %s6696_s17 = scalar_select %p70_p7, %s8627_s7, %s72_s23  }
  0xe2   : > { %p6700_p9 = por %p8631_p8, %p79_p13  ;;  %p6706_p4 = por %p8633_p0, %p85_p12 }
  0xe3   : > { %8630 = sst [smem:[#allocation66_spill]] %s6696_s17  ;;  %p6710_p3 = por %p321_p5, %p79_p13 }
  0xe4   : > { %s8634_s21 = scalar_select %p6706_p4, 1, 0 }
  0xe5   : > { %s8635_s29 = scalar_select %p6710_p3, 1, 0 }
  0xe6   : > { %p327_p6 = scmp.eq.s32.totalorder %s4478_s28, 15  ;;  %s347_s1 = sand.u32 1, %s8627_s7  }
  0xe7   : > { %8636 = sst [smem:[#allocation67_spill]] %s8635_s29  ;;  %s4772_s12 = sshll.u32 %s6116_s9, 5 }
  0xe8   : > { %p6716_p10 = por %p327_p6, %p85_p12  ;;  %s4481_s14 = sshll.u32 %s347_s1, 7 }
  0xe9   : > { %s8638_s15 = sshll.u32 %s6120_s4, 6  ;;  %s8639_s17 = sld [smem:[#allocation68_spill]] }
  0xea   : > { %s8637_s26 = scalar_select %p6716_p10, 1, 0 }
  0xeb   : > { %s358_s22 = sadd.s32 %s4772_s12, %s8638_s15  ;;  %s351_s29 = scalar_lea.vmem [#allocation7], %s4481_s14 }
  0xec   : > { %s4485_s19 = sshll.u32 %s358_s22, 6  ;;  %s361_s28 = sshll.u32 %s351_s29, 4  ;;  %s6727_s28 = int_to_ptr.vmem [resolvable:$true] %s361_s28 }
  0xed   : > { %p8640_p7 = scmp.lt.s32.totalorder %s6124_s2, 16  ;;  %s8642_s22 = sld [smem:[#allocation70_spill]] }
  0xee   : > { %s6746_s29 = scalar_lea.sflag [#allocation8], %s347_s1 }
  0xef   : > { %s6725_s27 = scalar_lea.hbm %s8639_s17, %s4485_s19  ;;  %p6733_p13 = pnand %p8640_p7, %p6700_p9 }
  0xf0   : > { %s399_s19 = scalar_lea.vmem [#allocation12], %s6444_s24  ;;  %s5728_s14 = scalar_lea.hbm %s6725_s27, 2048 }
  0xf1   : > { %s6744_s23 = sshll.u32 %s399_s19, 4  ;;  %p5729_p12 = scmp.ne.s32.totalorder %s6725_s27, %s5728_s14  ;;  %s6778_s23 = int_to_ptr.vmem [resolvable:$true] %s6744_s23 }
  0xf2   : > { %p5730_p5 = pneg %p6733_p13  ;;  %s5733_s12 = scalar_lea.hbm %s8639_s17, 8192 }
  0xf3   : > { %s8643_s8 = smov %s8642_s22  ;;  %s6741_s16 = scalar_lea.hbm %s8642_s22, %s6447_s10 }
  0xf4   : > { %p5731_p8 = pnand %p5730_p5, %p5729_p12  ;;  %p5734_p0 = scmp.lt.u32.totalorder %s6725_s27, %s8639_s17 }
  0xf5   : > { %p5735_p6 = scmp.lt.u32.totalorder %s5733_s12, %s5728_s14  ;;  %p5737_p2 = scmp.lt.u32.totalorder %s5728_s14, %s6725_s27 }
  0xf6   : > { %p5732_p9 = pneg %p5731_p8 }
  0xf7   : > { %p5736_p7 = por %p5735_p6, %p5734_p0 }
  0xf9   : > { %p5738_p10 = por %p5737_p2, %p5736_p7 }
  0xfb   : > { %p5739_p3 = pnand %p5738_p10, %p5732_p9 }
  0xfd   : > { %5742 = shalt.err (!%p5739_p3)
}
  0xfe   : > { %s5743_s1 = scalar_lea.vmem %s6727_s28, 2048  ;;  %s6134_s4 = smov [#allocation7]  }
  0xff   : > { %p5744_p12 = scmp.ne.s32.totalorder %s6727_s28, %s5743_s1  ;;  %s5748_s19 = sshll.u32 %s6134_s4, 4  ;;  %s5749_s19 = int_to_ptr.vmem [resolvable:$false] %s5748_s19 }
 0x100   : > { %s5750_s3 = scalar_lea.vmem %s5749_s19, 4096  ;;  %p5751_p11 = scmp.lt.s32.totalorder %s6727_s28, %s5749_s19 }
 0x101   : > { %p5746_p8 = pnand %p5744_p12, %p5730_p5  ;;  %p5752_p0 = scmp.lt.s32.totalorder %s5750_s3, %s5743_s1 }
 0x103   : > { %p5747_p4 = pneg %p5746_p8  ;;  %p5753_p6 = por %p5752_p0, %p5751_p11 }
 0x105   : > { %p5754_p2 = pnand %p5753_p6, %p5747_p4 }
 0x107   : > { %5757 = shalt.err (!%p5754_p2)
}
 0x108   : > { %4935 = dma.hbm_to_vmem [thread:$0]  (!%p6733_p13), %s6725_s27, 2048, %s6727_s28, %s6746_s29, %s8607_s5, %s8607_s5, %s8606_s25  }
 0x109   : > { %s5758_s14 = scalar_lea.hbm %s6741_s16, 8192  ;;  %s5763_s15 = scalar_lea.hbm %s8643_s8, 16384 }
 0x10a   : > { %p5759_p11 = scmp.ne.s32.totalorder %s6741_s16, %s5758_s14  ;;  %p5764_p10 = scmp.lt.u32.totalorder %s6741_s16, %s8643_s8 }
 0x10b   : > { %p5765_p5 = scmp.lt.u32.totalorder %s5763_s15, %s5758_s14  ;;  %p5767_p7 = scmp.lt.u32.totalorder %s5758_s14, %s6741_s16 }
 0x10c   : > { %p5761_p4 = pnand %p5759_p11, %p6474_p1 }
 0x10d   : > { %p5766_p9 = por %p5765_p5, %p5764_p10 }
 0x10e   : > { %p5762_p3 = pneg %p5761_p4 }
 0x10f   : > { %p5768_p12 = por %p5767_p7, %p5766_p9 }
 0x111   : > { %p5769_p13 = pnand %p5768_p12, %p5762_p3 }
 0x113   : > { %5772 = shalt.err (!%p5769_p13)
}
 0x114   : > { %s5773_s27 = scalar_lea.vmem %s6778_s23, 8192  ;;  %s6135_s28 = smov [#allocation12]  }
 0x115   : > { %p5774_p8 = scmp.ne.s32.totalorder %s6778_s23, %s5773_s27  ;;  %s5778_s29 = sshll.u32 %s6135_s28, 4  ;;  %s5779_s29 = int_to_ptr.vmem [resolvable:$false] %s5778_s29 }
 0x116   : > { %s5780_s4 = scalar_lea.vmem %s5779_s29, 16384  ;;  %p5781_p2 = scmp.lt.s32.totalorder %s6778_s23, %s5779_s29 }
 0x117   : > { %p5776_p0 = pnand %p5774_p8, %p6474_p1  ;;  %p5782_p11 = scmp.lt.s32.totalorder %s5780_s4, %s5773_s27 }
 0x119   : > { %p5777_p6 = pneg %p5776_p0  ;;  %p5783_p4 = por %p5782_p11, %p5781_p2 }
 0x11b   : > { %p5784_p10 = pnand %p5783_p4, %p5777_p6 }
 0x11d   : > { %5787 = shalt.err (!%p5784_p10)
}
 0x11e   : > { %s8644_s19 = sld [smem:[#allocation55_spill]]  ;;  %s8646_s3 = scalar_lea.sflag [#allocation11], %s6356_s0 }
 0x11f   : > { %s8647_s12 = sld [smem:[#allocation72_spill]]  ;;  %s441_s22 = scalar_lea.vmem [#allocation15], %s6444_s24 }
 0x120   : > { %s448_s27 = sshll.u32 %s441_s22, 4  ;;  %s6816_s27 = int_to_ptr.vmem [resolvable:$true] %s448_s27 }
 0x124   : > { %p8645_p3 = scmp.ne.s32.totalorder %s8644_s19, 0 }
 0x125   : > { %s8648_s1 = smov %s8647_s12  ;;  %s6810_s15 = scalar_lea.hbm %s8647_s12, %s6447_s10 }
 0x126   : > { %4941 = dma.hbm_to_vmem [thread:$0]  (!%p8645_p3), %s6741_s16, 8192, %s6778_s23, %s8646_s3, %s8626_s13, %s8626_s13, %s8625_s11  }
 0x127   : > { %s5788_s28 = scalar_lea.hbm %s6810_s15, 8192  ;;  %s5793_s10 = scalar_lea.hbm %s8648_s1, 16384 }
 0x128   : > { %p5789_p5 = scmp.ne.s32.totalorder %s6810_s15, %s5788_s28  ;;  %p5794_p12 = scmp.lt.u32.totalorder %s6810_s15, %s8648_s1 }
 0x129   : > { %p5795_p13 = scmp.lt.u32.totalorder %s5793_s10, %s5788_s28  ;;  %p5797_p0 = scmp.lt.u32.totalorder %s5788_s28, %s6810_s15 }
 0x12a   : > { %p5791_p9 = pnand %p5789_p5, %p6474_p1 }
 0x12b   : > { %p5796_p8 = por %p5795_p13, %p5794_p12 }
 0x12c   : > { %p5792_p7 = pneg %p5791_p9 }
 0x12d   : > { %p5798_p6 = por %p5797_p0, %p5796_p8 }
 0x12f   : > { %p5799_p2 = pnand %p5798_p6, %p5792_p7 }
 0x131   : > { %5802 = shalt.err (!%p5799_p2)
}
 0x132   : > { %s5803_s24 = scalar_lea.vmem %s6816_s27, 8192  ;;  %s6136_s3 = smov [#allocation15]  }
 0x133   : > { %p5804_p11 = scmp.ne.s32.totalorder %s6816_s27, %s5803_s24  ;;  %s5808_s14 = sshll.u32 %s6136_s3, 4  ;;  %s5809_s14 = int_to_ptr.vmem [resolvable:$false] %s5808_s14 }
 0x134   : > { %s5810_s7 = scalar_lea.vmem %s5809_s14, 16384  ;;  %p5811_p5 = scmp.lt.s32.totalorder %s6816_s27, %s5809_s14 }
 0x135   : > { %p5806_p4 = pnand %p5804_p11, %p6474_p1  ;;  %p5812_p9 = scmp.lt.s32.totalorder %s5810_s7, %s5803_s24 }
 0x137   : > { %p5807_p10 = pneg %p5806_p4  ;;  %p5813_p12 = por %p5812_p9, %p5811_p5 }
 0x139   : > { %p5814_p13 = pnand %p5813_p12, %p5807_p10 }
 0x13b   : > { %5817 = shalt.err (!%p5814_p13)
}
 0x13c   : > { %s8649_s12 = scalar_lea.sflag [#allocation14], %s6356_s0  ;;  %s8650_s30 = sld [smem:[#allocation61_spill]] }
 0x13d   : > { %4947 = dma.hbm_to_vmem [thread:$0]  (!%p8645_p3), %s6810_s15, 8192, %s6816_s27, %s8649_s12, %s8607_s5, %s8607_s5, %s8606_s25  }
 0x13e   : > { %s5818_s22 = scalar_lea.hbm %s6608_s20, 2048  ;;  %s8653_s16 = sld [smem:[#allocation74_spill]] }
 0x13f   : > { %p5819_p1 = scmp.ne.s32.totalorder %s6608_s20, %s5818_s22  ;;  %p5827_p10 = scmp.lt.u32.totalorder %s5818_s22, %s6608_s20 }
 0x142   : > { %p8651_p7 = scmp.ne.s32.totalorder %s8650_s30, 0 }
 0x144   : > { %p8652_p8 = pneg %p8651_p7  ;;  %s8654_s3 = smov %s8653_s16 }
 0x145   : > { %s5823_s23 = scalar_lea.hbm %s8653_s16, 4096  ;;  %p5824_p2 = scmp.lt.u32.totalorder %s6608_s20, %s8654_s3 }
 0x146   : > { %p5821_p0 = pnand %p5819_p1, %p8652_p8  ;;  %p5825_p11 = scmp.lt.u32.totalorder %s5823_s23, %s5818_s22 }
 0x148   : > { %p5822_p6 = pneg %p5821_p0  ;;  %p5826_p4 = por %p5825_p11, %p5824_p2 }
 0x14a   : > { %p5828_p5 = por %p5827_p10, %p5826_p4 }
 0x14c   : > { %p5829_p9 = pnand %p5828_p5, %p5822_p6 }
 0x14e   : > { %5832 = shalt.err (!%p5829_p9)
}
 0x14f   : > { %s8655_s15 = sld [smem:[#allocation65_spill]]  ;;  %p8656_p12 = pmov %p8652_p8 }
 0x150   : > { %s6137_s4 = smov [#allocation18]  }
 0x151   : > { %s5838_s24 = sshll.u32 %s6137_s4, 4  ;;  %s5839_s24 = int_to_ptr.vmem [resolvable:$false] %s5838_s24 }
 0x152   : > { %s5840_s14 = scalar_lea.vmem %s5839_s24, 4096 }
 0x155   : > { %s5833_s27 = scalar_lea.vmem %s8655_s15, 2048  ;;  %p5841_p8 = scmp.lt.s32.totalorder %s8655_s15, %s5839_s24 }
 0x156   : > { %p5834_p3 = scmp.ne.s32.totalorder %s8655_s15, %s5833_s27  ;;  %p5842_p0 = scmp.lt.s32.totalorder %s5840_s14, %s5833_s27 }
 0x158   : > { %p5836_p13 = pnand %p5834_p3, %p8656_p12  ;;  %p5843_p2 = por %p5842_p0, %p5841_p8 }
 0x15a   : > { %p5837_p1 = pneg %p5836_p13 }
 0x15c   : > { %p5844_p11 = pnand %p5843_p2, %p5837_p1 }
 0x15e   : > { %5847 = shalt.err (!%p5844_p11)
}
 0x15f   : > { %s8657_s7 = scalar_lea.sflag [#allocation17], %s6356_s0  ;;  %s8658_s12 = sld [smem:[#allocation64_spill]] }
 0x160   : > { %4953 = dma.hbm_to_vmem [thread:$0]  (!%p8651_p7), %s6608_s20, 2048, %s8655_s15, %s8657_s7, %s8607_s5, %s8607_s5, %s8606_s25  }
 0x161   : > { %s5848_s22 = scalar_lea.hbm %s6650_s18, 1024  ;;  %s8661_s28 = sld [smem:[#allocation76_spill]] }
 0x162   : > { %p5849_p6 = scmp.ne.s32.totalorder %s6650_s18, %s5848_s22  ;;  %p5857_p1 = scmp.lt.u32.totalorder %s5848_s22, %s6650_s18 }
 0x165   : > { %p8659_p4 = scmp.ne.s32.totalorder %s8658_s12, 0 }
 0x167   : > { %p8660_p10 = pneg %p8659_p4  ;;  %s8662_s1 = smov %s8661_s28 }
 0x168   : > { %s5853_s16 = scalar_lea.hbm %s8661_s28, 2048  ;;  %p5854_p3 = scmp.lt.u32.totalorder %s6650_s18, %s8662_s1 }
 0x169   : > { %p5851_p5 = pnand %p5849_p6, %p8660_p10  ;;  %p5855_p12 = scmp.lt.u32.totalorder %s5853_s16, %s5848_s22 }
 0x16b   : > { %p5852_p9 = pneg %p5851_p5  ;;  %p5856_p13 = por %p5855_p12, %p5854_p3 }
 0x16d   : > { %p5858_p8 = por %p5857_p1, %p5856_p13 }
 0x16f   : > { %p5859_p0 = pnand %p5858_p8, %p5852_p9 }
 0x171   : > { %5862 = shalt.err (!%p5859_p0)
}
 0x172   : > { %s5863_s20 = scalar_lea.vmem %s6814_s6, 1024  ;;  %p8663_p2 = pmov %p8660_p10 }
 0x173   : > { %p5864_p7 = scmp.ne.s32.totalorder %s6814_s6, %s5863_s20  ;;  %s6138_s25 = smov [#allocation21]  }
 0x174   : > { %s5868_s5 = sshll.u32 %s6138_s25, 4  ;;  %s5869_s5 = int_to_ptr.vmem [resolvable:$false] %s5868_s5 }
 0x175   : > { %p5866_p11 = pnand %p5864_p7, %p8663_p2  ;;  %s5870_s29 = scalar_lea.vmem %s5869_s5, 2048 }
 0x176   : > { %p5871_p10 = scmp.lt.s32.totalorder %s6814_s6, %s5869_s5  ;;  %p5872_p5 = scmp.lt.s32.totalorder %s5870_s29, %s5863_s20 }
 0x177   : > { %p5867_p6 = pneg %p5866_p11 }
 0x178   : > { %p5873_p3 = por %p5872_p5, %p5871_p10 }
 0x17a   : > { %p5874_p12 = pnand %p5873_p3, %p5867_p6 }
 0x17c   : > { %5877 = shalt.err (!%p5874_p12)
}
 0x17d   : > { %s8664_s15 = scalar_lea.sflag [#allocation20], %s6356_s0  ;;  %s8665_s27 = sld [smem:[#allocation52_spill]] }
 0x17e   : > { %4959 = dma.hbm_to_vmem [thread:$0]  (!%p8659_p4), %s6650_s18, 1024, %s6814_s6, %s8664_s15, %s8626_s13, %s8626_s13, %s8625_s11  }
 0x183   : > { %p8666_p9 = scmp.ne.s32.totalorder %s8665_s27, 0 }
 0x184   : > { %s8667_s4 = sld [smem:[#allocation40_spill]] (!%p8666_p9)  ;;  %p8668_p13 = scmp.ne.s32.totalorder (!%p8666_p9), %s8634_s21, 0 }
 0x185   : > { %546 = sbr.rel (%p8666_p9) target bundleno = 3176 (0xc68), region = 56 }
 0x18a   : > { %s6903_s24 = sand.u32 (!%p8666_p9), 1, %s8667_s4  }
 0x18b   : > { %s4515_s14 = sshll.u32 (!%p8666_p9), %s6903_s24, 7  ;;  %s549_s7 = scalar_lea.sflag (!%p8666_p9), [#allocation8], %s6903_s24 }
 0x18c   : > { %s6907_s12 = scalar_lea.vmem [#allocation7], %s4515_s14 }
 0x18d   : > { %6003 = dma.done.wait (%p8668_p13), %s549_s7, 2048  }
 0x18e   : > { %6005 = vsyncadd (%p8668_p13), %s549_s7, 4294965248  ;;  %s8669_s0 = sld [smem:[#allocation49_spill]]  ;;  %s8670_s18 = sld [smem:[#allocation37_spill]] }
 0x18f   : > { %s8671_s11 = sld [smem:[#allocation51_spill]] }
 0x194   : > { %s6914_s13 = sand.u32 1, %s8669_s0   ;;  %s559_s6 = sand.u32 1, %s8670_s18  }
 0x195   : > { %s4516_s22 = sshll.u32 %s559_s6, 7  ;;  %s558_s30 = scalar_lea.sflag [#allocation11], %s6914_s13 }
 0x196   : > { %s6918_s19 = scalar_lea.vmem [#allocation10], %s4516_s22  ;;  %p8672_p4 = scmp.ne.s32.totalorder %s8671_s11, 0 }
 0x198   : > { %6007 = dma.done.wait (%p8672_p4), %s558_s30, 2048  }
 0x199   : > { %6009 = vsyncadd (%p8672_p4), %s558_s30, 4294965248  ;;  %s8673_s28 = sld [smem:[#allocation35_spill]]  ;;  %s8674_s16 = sld [smem:[#allocation53_spill]] }
 0x19f   : > { %s568_s21 = sand.u32 1, %s8673_s28   ;;  %p8675_p1 = scmp.ne.s32.totalorder %s8674_s16, 0 }
 0x1a0   : > { %s4517_s23 = sshll.u32 %s568_s21, 9 }
 0x1a1   : > { %s6925_s10 = scalar_lea.vmem [#allocation12], %s4517_s23 }
 0x1a2   : > { %6011 = dma.done.wait (%p8675_p1), %s558_s30, 8192  }
 0x1a3   : > { %6013 = vsyncadd (%p8675_p1), %s558_s30, 4294959104  ;;  %s576_s20 = scalar_lea.sflag [#allocation14], %s6914_s13  ;;  %s6932_s25 = scalar_lea.vmem [#allocation13], %s4517_s23 }
 0x1a4   : > { %6015 = dma.done.wait (%p8675_p1), %s576_s20, 16384  }
 0x1a5   : > { %6017 = vsyncadd (%p8675_p1), %s576_s20, 4294950912  ;;  %s8676_s5 = sld [smem:[#allocation33_spill]]  ;;  %s8677_s29 = sld [smem:[#allocation58_spill]] }
 0x1a6   : > { %s6939_s4 = scalar_lea.vmem [#allocation15], %s4517_s23  ;;  %s594_s14 = scalar_lea.sflag [#allocation17], %s6914_s13 }
 0x1ab   : > { %s595_s15 = sand.u32 1, %s8676_s5   ;;  %p8678_p8 = scmp.ne.s32.totalorder %s8677_s29, 0 }
 0x1ac   : > { %s4520_s27 = sshll.u32 %s595_s15, 7 }
 0x1ad   : > { %s6942_s7 = scalar_lea.vmem [#allocation16], %s4520_s27 }
 0x1ae   : > { %6019 = dma.done.wait (%p8678_p8), %s594_s14, 4096  }
 0x1af   : > { %6021 = vsyncadd (%p8678_p8), %s594_s14, 4294963200  ;;  %s8679_s0 = sld [smem:[#allocation31_spill]]  ;;  %s8680_s18 = sld [smem:[#allocation63_spill]] }
 0x1b0   : > { %s6949_s22 = scalar_lea.vmem [#allocation18], %s4520_s27  ;;  %s612_s30 = scalar_lea.sflag [#allocation20], %s6914_s13 }
 0x1b5   : > { %s613_s11 = sand.u32 1, %s8679_s0   ;;  %p8681_p0 = scmp.ne.s32.totalorder %s8680_s18, 0 }
 0x1b6   : > { %s4522_s6 = sshll.u32 %s613_s11, 6 }
 0x1b7   : > { %s6952_s28 = scalar_lea.vmem [#allocation19], %s4522_s6 }
 0x1b8   : > { %6023 = dma.done.wait (%p8681_p0), %s612_s30, 2048  }
 0x1b9   : > { %6025 = vsyncadd (%p8681_p0), %s612_s30, 4294965248  ;;  %s8682_s16 = sld [smem:[#allocation44_spill]]  ;;  %s8683_s21 = sld [smem:[#allocation42_spill]] }
 0x1ba   : > { %s4524_s23 = sshll.u32 %s6903_s24, 8  ;;  %s6961_s29 = scalar_lea.vmem [#allocation21], %s4522_s6 }
 0x1bb   : > { %s6963_s15 = scalar_lea.vmem [#allocation22], %s4524_s23 }
 0x1bf   : > { %s4525_s20 = sshll.u32 %s8682_s16, 6  ;;  %s4526_s5 = sshll.u32 %s8683_s21, 6 }
 0x1c0   : > { %p4527_p7 = scmp.ne.s32.totalorder %s8683_s21, 0 }
 0x1c1   : > { %v5172_v0 = vld [vmem:[%s6925_s10 + $0x4] ss:$8 sps:$4 sm:$0xff] (!%p4527_p7)   ;;  %v5176_v2 = vld [vmem:[%s6925_s10] ss:$8 sps:$4 sm:$0xff] (!%p4527_p7)   ;;  %v5178_v4 = vld [vmem:[%s6925_s10 + $0x14] ss:$8 sps:$4 sm:$0xff] (!%p4527_p7)  }
 0x1c2   : > { %712 = sbr.rel (%p4527_p7) target bundleno = 915 (0x393), region = 96  ;;  %v5174_v1 = vld [vmem:[%s6925_s10 + $0x104] ss:$8 sps:$4 sm:$0xff] (!%p4527_p7)   ;;  %1193 = vmatprep.subr.bf16.mxu1 (!%p4527_p7), %v5172_v0  ;;  %v5177_v3 = vld [vmem:[%s6925_s10 + $0x100] ss:$8 sps:$4 sm:$0xff] (!%p4527_p7)   ;;  %s6139_s13 = smov (!%p4527_p7), 127  }
 0x1c3   : > { %1266 = vmatprep.subr.bf16.mxu0 (!%p4527_p7), %v5174_v1  ;;  %1194 = vmatpush1.bf16.msra.mxu1 (!%p4527_p7), %v5176_v2  ;;  %v5180_v5 = vld [vmem:[%s6925_s10 + $0x114] ss:$8 sps:$4 sm:$0xff] (!%p4527_p7)   ;;  %v5182_v6 = vld [vmem:[%s6925_s10 + $0x10] ss:$8 sps:$4 sm:$0xff] (!%p4527_p7)   ;;  %v5184_v8 = vld [vmem:[%s6925_s10 + $0x24] ss:$8 sps:$4 sm:$0xff] (!%p4527_p7)  }
 0x1c4   : > { %1267 = vmatpush1.bf16.msra.mxu0 (!%p4527_p7), %v5177_v3  ;;  %1195 = vmatprep.subr.bf16.mxu1 (!%p4527_p7), %v5178_v4  ;;  %v5183_v7 = vld [vmem:[%s6925_s10 + $0x110] ss:$8 sps:$4 sm:$0xff] (!%p4527_p7)   ;;  %v5186_v9 = vld [vmem:[%s6925_s10 + $0x124] ss:$8 sps:$4 sm:$0xff] (!%p4527_p7)   ;;  %v5188_v10 = vld [vmem:[%s6925_s10 + $0x20] ss:$8 sps:$4 sm:$0xff] (!%p4527_p7)  }
 0x1c5   : > { %1268 = vmatprep.subr.bf16.mxu0 (!%p4527_p7), %v5180_v5  ;;  %v5189_v11 = vld [vmem:[%s6925_s10 + $0x120] ss:$8 sps:$4 sm:$0xff] (!%p4527_p7)   ;;  %v5190_v12 = vld [vmem:[%s6925_s10 + $0x34] ss:$8 sps:$4 sm:$0xff] (!%p4527_p7)   ;;  %v5194_v14 = vld [vmem:[%s6925_s10 + $0x30] ss:$8 sps:$4 sm:$0xff] (!%p4527_p7)  }
 0x1c6   : > { %v5192_v13 = vld [vmem:[%s6925_s10 + $0x134] ss:$8 sps:$4 sm:$0xff] (!%p4527_p7)   ;;  %v5195_v15 = vld [vmem:[%s6925_s10 + $0x130] ss:$8 sps:$4 sm:$0xff] (!%p4527_p7)   ;;  %v5196_v16 = vld [vmem:[%s6925_s10 + $0x44] ss:$8 sps:$4 sm:$0xff] (!%p4527_p7)  }
 0x1c7   : > { %1196 = vmatpush1.bf16.msra.mxu1 (!%p4527_p7), %v5182_v6  ;;  %v5198_v17 = vld [vmem:[%s6925_s10 + $0x144] ss:$8 sps:$4 sm:$0xff] (!%p4527_p7)   ;;  %v5200_v18 = vld [vmem:[%s6925_s10 + $0x40] ss:$8 sps:$4 sm:$0xff] (!%p4527_p7)   ;;  %v5202_v20 = vld [vmem:[%s6925_s10 + $0x54] ss:$8 sps:$4 sm:$0xff] (!%p4527_p7)  }
 0x1c8   : > { %1269 = vmatpush1.bf16.msra.mxu0 (!%p4527_p7), %v5183_v7  ;;  %1197 = vmatprep.subr.bf16.mxu1 (!%p4527_p7), %v5184_v8  ;;  %v5201_v19 = vld [vmem:[%s6925_s10 + $0x140] ss:$8 sps:$4 sm:$0xff] (!%p4527_p7)   ;;  %v5204_v21 = vld [vmem:[%s6925_s10 + $0x154] ss:$8 sps:$4 sm:$0xff] (!%p4527_p7)   ;;  %v5206_v22 = vld [vmem:[%s6925_s10 + $0x50] ss:$8 sps:$4 sm:$0xff] (!%p4527_p7)  }
 0x1c9   : > { %1270 = vmatprep.subr.bf16.mxu0 %v5186_v9  ;;  %v5207_v23 = vld [vmem:[%s6925_s10 + $0x150] ss:$8 sps:$4 sm:$0xff]   ;;  %v5208_v24 = vld [vmem:[%s6925_s10 + $0x64] ss:$8 sps:$4 sm:$0xff]   ;;  %v5212_v26 = vld [vmem:[%s6925_s10 + $0x60] ss:$8 sps:$4 sm:$0xff]  }
 0x1ca   : > { %v5210_v25 = vld [vmem:[%s6925_s10 + $0x164] ss:$8 sps:$4 sm:$0xff]   ;;  %v5213_v27 = vld [vmem:[%s6925_s10 + $0x160] ss:$8 sps:$4 sm:$0xff]   ;;  %v5214_v28 = vld [vmem:[%s6925_s10 + $0x74] ss:$8 sps:$4 sm:$0xff]  }
 0x1cb   : > { %1198 = vmatpush1.bf16.msra.mxu1 %v5188_v10  ;;  %v5216_v29 = vld [vmem:[%s6925_s10 + $0x174] ss:$8 sps:$4 sm:$0xff]   ;;  %v5218_v30 = vld [vmem:[%s6925_s10 + $0x70] ss:$8 sps:$4 sm:$0xff]   ;;  %v5220_v32 = vld [vmem:[%s6925_s10 + $0x84] ss:$8 sps:$4 sm:$0xff]  }
 0x1cc   : > { %1271 = vmatpush1.bf16.msra.mxu0 %v5189_v11  ;;  %1199 = vmatprep.subr.bf16.mxu1 %v5190_v12  ;;  %v5219_v31 = vld [vmem:[%s6925_s10 + $0x170] ss:$8 sps:$4 sm:$0xff]   ;;  %v5222_v33 = vld [vmem:[%s6925_s10 + $0x184] ss:$8 sps:$4 sm:$0xff]   ;;  %v5224_v34 = vld [vmem:[%s6925_s10 + $0x80] ss:$8 sps:$4 sm:$0xff]  }
 0x1cd   : > { %1272 = vmatprep.subr.bf16.mxu0 %v5192_v13  ;;  %v5225_v35 = vld [vmem:[%s6925_s10 + $0x180] ss:$8 sps:$4 sm:$0xff]   ;;  %v5226_v36 = vld [vmem:[%s6925_s10 + $0x94] ss:$8 sps:$4 sm:$0xff]   ;;  %v5230_v38 = vld [vmem:[%s6925_s10 + $0x90] ss:$8 sps:$4 sm:$0xff]  }
 0x1ce   : > { %v5228_v37 = vld [vmem:[%s6925_s10 + $0x194] ss:$8 sps:$4 sm:$0xff]   ;;  %v5231_v39 = vld [vmem:[%s6925_s10 + $0x190] ss:$8 sps:$4 sm:$0xff]   ;;  %v5232_v40 = vld [vmem:[%s6925_s10 + $0xa4] ss:$8 sps:$4 sm:$0xff]  }
 0x1cf   : > { %1200 = vmatpush1.bf16.msra.mxu1 %v5194_v14  ;;  %v5234_v41 = vld [vmem:[%s6925_s10 + $0x1a4] ss:$8 sps:$4 sm:$0xff]   ;;  %v5236_v42 = vld [vmem:[%s6925_s10 + $0xa0] ss:$8 sps:$4 sm:$0xff]   ;;  %v5238_v44 = vld [vmem:[%s6925_s10 + $0xb4] ss:$8 sps:$4 sm:$0xff]  }
 0x1d0   : > { %1273 = vmatpush1.bf16.msra.mxu0 %v5195_v15  ;;  %1201 = vmatprep.subr.bf16.mxu1 %v5196_v16  ;;  %v5237_v43 = vld [vmem:[%s6925_s10 + $0x1a0] ss:$8 sps:$4 sm:$0xff]   ;;  %v5240_v45 = vld [vmem:[%s6925_s10 + $0x1b4] ss:$8 sps:$4 sm:$0xff]   ;;  %v5242_v46 = vld [vmem:[%s6925_s10 + $0xb0] ss:$8 sps:$4 sm:$0xff]  }
 0x1d1   : > { %1274 = vmatprep.subr.bf16.mxu0 %v5198_v17  ;;  %v5243_v47 = vld [vmem:[%s6925_s10 + $0x1b0] ss:$8 sps:$4 sm:$0xff]   ;;  %v5244_v48 = vld [vmem:[%s6925_s10 + $0xc4] ss:$8 sps:$4 sm:$0xff]   ;;  %v5248_v52 = vld [vmem:[%s6925_s10 + $0xc0] ss:$8 sps:$4 sm:$0xff]  }
 0x1d2   : > { %v5270_v49 = vld [vmem:[%s6907_s12 + $0x4] ss:$16 sps:$4 sm:$0xff]   ;;  %v5273_v51 = vld [vmem:[%s6907_s12 + $0xc] ss:$16 sps:$4 sm:$0xff]   ;;  %v5249_v53 = vld [vmem:[%s6925_s10 + $0x1c0] ss:$8 sps:$4 sm:$0xff]  }
 0x1d3   : > { %1202 = vmatpush1.bf16.msra.mxu1 %v5200_v18  ;;  %v5246_v50 = vld [vmem:[%s6925_s10 + $0x1c4] ss:$8 sps:$4 sm:$0xff]   ;;  %1225 = vmatprep.mubr.bf16.mxu1 %v5270_v49  ;;  %v5250_v54 = vld [vmem:[%s6925_s10 + $0xd4] ss:$8 sps:$4 sm:$0xff]   ;;  %v5254_v56 = vld [vmem:[%s6925_s10 + $0xd0] ss:$8 sps:$4 sm:$0xff]  }
 0x1d4   : > { %1275 = vmatpush1.bf16.msra.mxu0 %v5201_v19  ;;  %1203 = vmatprep.subr.bf16.mxu1 %v5202_v20  ;;  %v5252_v55 = vld [vmem:[%s6925_s10 + $0x1d4] ss:$8 sps:$4 sm:$0xff]   ;;  %v5255_v57 = vld [vmem:[%s6925_s10 + $0x1d0] ss:$8 sps:$4 sm:$0xff]   ;;  %v5256_v58 = vld [vmem:[%s6925_s10 + $0xe4] ss:$8 sps:$4 sm:$0xff]  }
 0x1d5   : > { %1276 = vmatprep.subr.bf16.mxu0 %v5204_v21  ;;  %1298 = vmatprep.mubr.bf16.mxu0 %v5273_v51  ;;  %v5258_v59 = vld [vmem:[%s6925_s10 + $0x1e4] ss:$8 sps:$4 sm:$0xff]   ;;  %v5260_v60 = vld [vmem:[%s6925_s10 + $0xe0] ss:$8 sps:$4 sm:$0xff]   ;;  %v5262_v62 = vld [vmem:[%s6925_s10 + $0xf4] ss:$8 sps:$4 sm:$0xff]  }
 0x1d6   : > { %v5261_v61 = vld [vmem:[%s6925_s10 + $0x1e0] ss:$8 sps:$4 sm:$0xff]   ;;  %v5264_v63 = vld [vmem:[%s6925_s10 + $0x1f4] ss:$8 sps:$4 sm:$0xff]   ;;  %v5266_v0 = vld [vmem:[%s6925_s10 + $0xf0] ss:$8 sps:$4 sm:$0xff]  }
 0x1d7   : > { %1204 = vmatpush1.bf16.msra.mxu1 %v5206_v22  ;;  %v5267_v1 = vld [vmem:[%s6925_s10 + $0x1f0] ss:$8 sps:$4 sm:$0xff]   ;;  %v5274_v4 = vld [vmem:[%s6907_s12 + $0x24] ss:$16 sps:$4 sm:$0xff]   ;;  %v5276_v5 = vld [vmem:[%s6907_s12 + $0x2c] ss:$16 sps:$4 sm:$0xff]  }
 0x1d8   : > { %1277 = vmatpush1.bf16.msra.mxu0 %v5207_v23  ;;  %1205 = vmatprep.subr.bf16.mxu1 %v5208_v24  ;;  %v5268_v2 = vld [vmem:[%s6907_s12] ss:$16 sps:$4 sm:$0xff]   ;;  %v5271_v3 = vld [vmem:[%s6907_s12 + $0x8] ss:$16 sps:$4 sm:$0xff]   ;;  %v5280_v8 = vld [vmem:[%s6907_s12 + $0x44] ss:$16 sps:$4 sm:$0xff]  }
 0x1d9   : > { %1278 = vmatprep.subr.bf16.mxu0 %v5210_v25  ;;  %v5278_v6 = vld [vmem:[%s6907_s12 + $0x20] ss:$16 sps:$4 sm:$0xff]   ;;  %v5279_v7 = vld [vmem:[%s6907_s12 + $0x28] ss:$16 sps:$4 sm:$0xff]   ;;  %v5282_v9 = vld [vmem:[%s6907_s12 + $0x4c] ss:$16 sps:$4 sm:$0xff]  }
 0x1da   : > { %v5284_v10 = vld [vmem:[%s6907_s12 + $0x40] ss:$16 sps:$4 sm:$0xff]   ;;  %v5285_v11 = vld [vmem:[%s6907_s12 + $0x48] ss:$16 sps:$4 sm:$0xff]   ;;  %v5286_v12 = vld [vmem:[%s6907_s12 + $0x64] ss:$16 sps:$4 sm:$0xff]  }
 0x1db   : > { %1206 = vmatpush1.bf16.msra.mxu1 %v5212_v26  ;;  %v5288_v13 = vld [vmem:[%s6907_s12 + $0x6c] ss:$16 sps:$4 sm:$0xff]   ;;  %v5290_v14 = vld [vmem:[%s6907_s12 + $0x60] ss:$16 sps:$4 sm:$0xff]   ;;  %v5291_v15 = vld [vmem:[%s6907_s12 + $0x68] ss:$16 sps:$4 sm:$0xff]  }
 0x1dc   : > { %1279 = vmatpush1.bf16.msra.mxu0 %v5213_v27  ;;  %1207 = vmatprep.subr.bf16.mxu1 %v5214_v28  ;;  %s6140_s12 = smov 1   ;;  %vm1610_vm0 = vcmask 7168  }
 0x1dd   : > { %1280 = vmatprep.subr.bf16.mxu0 %v5216_v29 }
 0x1df   : > { %1208 = vmatpush1.bf16.msra.mxu1 %v5218_v30 }
 0x1e0   : > { %1281 = vmatpush1.bf16.msra.mxu0 %v5219_v31  ;;  %1209 = vmatprep.subr.bf16.mxu1 %v5220_v32 }
 0x1e1   : > { %1282 = vmatprep.subr.bf16.mxu0 %v5222_v33 }
 0x1e3   : > { %1210 = vmatpush1.bf16.msra.mxu1 %v5224_v34 }
 0x1e4   : > { %1283 = vmatpush1.bf16.msra.mxu0 %v5225_v35  ;;  %1211 = vmatprep.subr.bf16.mxu1 %v5226_v36 }
 0x1e5   : > { %1284 = vmatprep.subr.bf16.mxu0 %v5228_v37 }
 0x1e7   : > { %1212 = vmatpush1.bf16.msra.mxu1 %v5230_v38 }
 0x1e8   : > { %1285 = vmatpush1.bf16.msra.mxu0 %v5231_v39  ;;  %1213 = vmatprep.subr.bf16.mxu1 %v5232_v40 }
 0x1e9   : > { %1286 = vmatprep.subr.bf16.mxu0 %v5234_v41 }
 0x1eb   : > { %1214 = vmatpush1.bf16.msra.mxu1 %v5236_v42 }
 0x1ec   : > { %1287 = vmatpush1.bf16.msra.mxu0 %v5237_v43  ;;  %1215 = vmatprep.subr.bf16.mxu1 %v5238_v44 }
 0x1ed   : > { %1288 = vmatprep.subr.bf16.mxu0 %v5240_v45 }
 0x1ef   : > { %1216 = vmatpush1.bf16.msra.mxu1 %v5242_v46 }
 0x1f0   : > { %1289 = vmatpush1.bf16.msra.mxu0 %v5243_v47  ;;  %1217 = vmatprep.subr.bf16.mxu1 %v5244_v48 }
 0x1f1   : > { %1290 = vmatprep.subr.bf16.mxu0 %v5246_v50 }
 0x1f3   : > { %1218 = vmatpush1.bf16.msra.mxu1 %v5248_v52 }
 0x1f4   : > { %1291 = vmatpush1.bf16.msra.mxu0 %v5249_v53  ;;  %1219 = vmatprep.subr.bf16.mxu1 %v5250_v54 }
 0x1f5   : > { %1292 = vmatprep.subr.bf16.mxu0 %v5252_v55 }
 0x1f7   : > { %1220 = vmatpush1.bf16.msra.mxu1 %v5254_v56 }
 0x1f8   : > { %1293 = vmatpush1.bf16.msra.mxu0 %v5255_v57  ;;  %1221 = vmatprep.subr.bf16.mxu1 %v5256_v58 }
 0x1f9   : > { %1294 = vmatprep.subr.bf16.mxu0 %v5258_v59 }
 0x1fb   : > { %1222 = vmatpush1.bf16.msra.mxu1 %v5260_v60 }
 0x1fc   : > { %1295 = vmatpush1.bf16.msra.mxu0 %v5261_v61  ;;  %1223 = vmatprep.subr.bf16.mxu1 %v5262_v62 }
 0x1fd   : > { %1296 = vmatprep.subr.bf16.mxu0 %v5264_v63 }
 0x1ff   : > { %1224 = vmatpush1.bf16.msra.mxu1 %v5266_v0  ;;  %v6141_v0 = vmov 0.0  }
 0x200   : > { %1297 = vmatpush1.bf16.msra.mxu0 %v5267_v1  ;;  %1594 = vst [vmem:[#allocation3] sm:$0xff] %v6141_v0  ;;  %1595 = vst [vmem:[#allocation3 + $0x8] sm:$0xff] %v6141_v0  ;;  %v6142_v1 = vmov -1e+30  }
 0x201   : > { %1596 = vst [vmem:[#allocation3 + $0x10] sm:$0xff] %v6141_v0  ;;  %1597 = vst [vmem:[#allocation3 + $0x18] sm:$0xff] %v6141_v0 }
 0x202   : > { %1226 = vmatmul.mubr.bf16.vlgmr.msra.gmra.mrb[0].mxu1 %v5268_v2  ;;  %1598 = vst [vmem:[#allocation3 + $0x20] sm:$0xff] %v6141_v0  ;;  %1599 = vst [vmem:[#allocation3 + $0x28] sm:$0xff] %v6141_v0  ;;  %v1403_v2 = vlaneseq }
 0x203   : > { %1299 = vmatmul.mubr.bf16.vlgmr.msra.gmra.mrb[0].mxu0 %v5271_v3  ;;  %1235 = vmatprep.mubr.bf16.mxu1 %v5274_v4  ;;  %1600 = vst [vmem:[#allocation3 + $0x30] sm:$0xff] %v6141_v0  ;;  %1601 = vst [vmem:[#allocation3 + $0x38] sm:$0xff] %v6141_v0 }
 0x204   : > { %1308 = vmatprep.mubr.bf16.mxu0 %v5276_v5  ;;  %1602 = vst [vmem:[#allocation3 + $0x40] sm:$0xff] %v6141_v0  ;;  %1603 = vst [vmem:[#allocation3 + $0x48] sm:$0xff] %v6141_v0  ;;  %v7174_v4 = vand.u32 127, %v1403_v2 }
 0x205   : > { %1604 = vst [vmem:[#allocation3 + $0x50] sm:$0xff] %v6141_v0  ;;  %1605 = vst [vmem:[#allocation3 + $0x58] sm:$0xff] %v6141_v0 }
 0x206   : > { %1606 = vst [vmem:[#allocation3 + $0x60] sm:$0xff] %v6141_v0  ;;  %1607 = vst [vmem:[#allocation3 + $0x68] sm:$0xff] %v6141_v0  ;;  %vm1454_vm1 = vcmp.lt.s32.totalorder %v7174_v4, 127  ;;  %vm1405_vm2 = vcmp.lt.s32.totalorder %v7174_v4, 1 }
 0x207   : > { %1608 = vst [vmem:[#allocation3 + $0x70] sm:$0xff] %v6141_v0  ;;  %1609 = vst [vmem:[#allocation3 + $0x78] sm:$0xff] %v6141_v0 }
 0x208   : > { %1611 = vst.msk [vmem:[#allocation4] sm:$0xff] %vm1610_vm0, %v6142_v1  ;;  %1612 = vst.msk [vmem:[#allocation4 + $0x8] sm:$0xff] %vm1610_vm0, %v6142_v1 }
 0x209   : > { %1613 = vst.msk [vmem:[#allocation4 + $0x10] sm:$0xff] %vm1610_vm0, %v6142_v1  ;;  %1614 = vst.msk [vmem:[#allocation4 + $0x18] sm:$0xff] %vm1610_vm0, %v6142_v1 }
 0x20a   : > { %1236 = vmatmul.mubr.bf16.gmra.mrb[4].mxu1 %v5278_v6  ;;  %1615 = vst.msk [vmem:[#allocation4 + $0x20] sm:$0xff] %vm1610_vm0, %v6142_v1  ;;  %1616 = vst.msk [vmem:[#allocation4 + $0x28] sm:$0xff] %vm1610_vm0, %v6142_v1 }
 0x20b   : > { %1309 = vmatmul.mubr.bf16.gmra.mrb[4].mxu0 %v5279_v7  ;;  %1245 = vmatprep.mubr.bf16.mxu1 %v5280_v8  ;;  %1617 = vst.msk [vmem:[#allocation4 + $0x30] sm:$0xff] %vm1610_vm0, %v6142_v1  ;;  %1618 = vst.msk [vmem:[#allocation4 + $0x38] sm:$0xff] %vm1610_vm0, %v6142_v1  ;;  %v1471_v7 = vadd.s32 128, %v7174_v4 }
 0x20c   : > { %1318 = vmatprep.mubr.bf16.mxu0 %v5282_v9  ;;  %1619 = vst.msk [vmem:[#allocation4 + $0x40] sm:$0xff] %vm1610_vm0, %v6142_v1  ;;  %1620 = vst.msk [vmem:[#allocation4 + $0x48] sm:$0xff] %vm1610_vm0, %v6142_v1 }
 0x20d   : > { %1621 = vst.msk [vmem:[#allocation4 + $0x50] sm:$0xff] %vm1610_vm0, %v6142_v1  ;;  %1622 = vst.msk [vmem:[#allocation4 + $0x58] sm:$0xff] %vm1610_vm0, %v6142_v1 }
 0x20e   : > { %1623 = vst.msk [vmem:[#allocation4 + $0x60] sm:$0xff] %vm1610_vm0, %v6142_v1  ;;  %1624 = vst.msk [vmem:[#allocation4 + $0x68] sm:$0xff] %vm1610_vm0, %v6142_v1 }
 0x20f   : > { %1625 = vst.msk [vmem:[#allocation4 + $0x70] sm:$0xff] %vm1610_vm0, %v6142_v1  ;;  %1626 = vst.msk [vmem:[#allocation4 + $0x78] sm:$0xff] %vm1610_vm0, %v6142_v1 }
 0x210   : > { %1627 = vst.msk [vmem:[#allocation5] sm:$0xff] %vm1610_vm0, %v6141_v0  ;;  %1628 = vst.msk [vmem:[#allocation5 + $0x8] sm:$0xff] %vm1610_vm0, %v6141_v0 }
 0x211   : > { %1629 = vst.msk [vmem:[#allocation5 + $0x10] sm:$0xff] %vm1610_vm0, %v6141_v0  ;;  %1630 = vst.msk [vmem:[#allocation5 + $0x18] sm:$0xff] %vm1610_vm0, %v6141_v0 }
 0x212   : > { %1246 = vmatmul.mubr.bf16.gmra.mrb[8].mxu1 %v5284_v10  ;;  %1631 = vst.msk [vmem:[#allocation5 + $0x20] sm:$0xff] %vm1610_vm0, %v6141_v0  ;;  %1632 = vst.msk [vmem:[#allocation5 + $0x28] sm:$0xff] %vm1610_vm0, %v6141_v0  ;;  %v1476_v10 = vand.u32 1, %v7174_v4 }
 0x213   : > { %1319 = vmatmul.mubr.bf16.gmra.mrb[8].mxu0 %v5285_v11  ;;  %1255 = vmatprep.mubr.bf16.mxu1 %v5286_v12  ;;  %1633 = vst.msk [vmem:[#allocation5 + $0x30] sm:$0xff] %vm1610_vm0, %v6141_v0  ;;  %1634 = vst.msk [vmem:[#allocation5 + $0x38] sm:$0xff] %vm1610_vm0, %v6141_v0  ;;  %v1483_v11 = vand.u32 1, %v1471_v7 }
 0x214   : > { %1328 = vmatprep.mubr.bf16.mxu0 %v5288_v13  ;;  %1635 = vst.msk [vmem:[#allocation5 + $0x40] sm:$0xff] %vm1610_vm0, %v6141_v0  ;;  %1636 = vst.msk [vmem:[#allocation5 + $0x48] sm:$0xff] %vm1610_vm0, %v6141_v0  ;;  %vm7184_vm3 = vcmp.eq.s32.totalorder %v1476_v10, 0 }
 0x215   : > { %1637 = vst.msk [vmem:[#allocation5 + $0x50] sm:$0xff] %vm1610_vm0, %v6141_v0  ;;  %1638 = vst.msk [vmem:[#allocation5 + $0x58] sm:$0xff] %vm1610_vm0, %v6141_v0  ;;  %vm7188_vm4 = vcmp.eq.s32.totalorder %v1483_v11, 0 }
 0x216   : > { %1639 = vst.msk [vmem:[#allocation5 + $0x60] sm:$0xff] %vm1610_vm0, %v6141_v0  ;;  %1640 = vst.msk [vmem:[#allocation5 + $0x68] sm:$0xff] %vm1610_vm0, %v6141_v0 }
 0x217   : > { %1641 = vst.msk [vmem:[#allocation5 + $0x70] sm:$0xff] %vm1610_vm0, %v6141_v0  ;;  %1642 = vst.msk [vmem:[#allocation5 + $0x78] sm:$0xff] %vm1610_vm0, %v6141_v0 }
 0x21a   : > { %1256 = vmatmul.mubr.bf16.gmra.mrb[12].mxu1 %v5290_v14 }
 0x21b   : > { %1329 = vmatmul.mubr.bf16.gmra.mrb[12].mxu0 %v5291_v15 }
 0x2d5   : > { %v1227_v16 = vpop.f32.mrb[0].mxu1 }
 0x2d6   : > { %v1300_v17 = vpop.f32.mrb[0].mxu0  ;;  %v1229_v19 = vpop.f32.mrb[1].mxu1 }
 0x2d7   : > { %v7046_v18 = vadd.f32 %v1300_v17, %v1227_v16  ;;  %v1302_v20 = vpop.f32.mrb[1].mxu0  ;;  %v1231_v22 = vpop.f32.mrb[2].mxu1 }
 0x2d8   : > { %v7048_v21 = vadd.f32 %v1302_v20, %v1229_v19  ;;  %v1304_v23 = vpop.f32.mrb[2].mxu0  ;;  %v1233_v26 = vpop.f32.mrb[3].mxu1 }
 0x2d9   : > { %v7050_v24 = vadd.f32 %v1304_v23, %v1231_v22  ;;  %v1306_v25 = vpop.f32.mrb[3].mxu0  ;;  %1422 = vrot.lane.b32.xlu0 %v7046_v18, %s6139_s13 }
 0x2da   : > { %v7054_v27 = vadd.f32 %v1306_v25, %v1233_v26  ;;  %v1355_v26 = vld [vmem:[%s6949_s22] sm:$0xff] }
 0x2db   : > { %1373 = vrot.lane.b32.xlu1 %v7050_v24, %s6140_s12 }
 0x2dd   : > { %1371 = vrot.lane.b32.xlu0 %v7046_v18, %s6140_s12  ;;  %v1237_v29 = vpop.f32.mrb[4].mxu1 }
 0x2de   : > { %v1310_v28 = vpop.f32.mrb[4].mxu0  ;;  %v1239_v31 = vpop.f32.mrb[5].mxu1 }
 0x2df   : > { %1440 = vrot.lane.b32.xlu1 %v7054_v27, %s6139_s13  ;;  %v7062_v30 = vadd.f32 %v1310_v28, %v1237_v29  ;;  %v1312_v32 = vpop.f32.mrb[5].mxu0  ;;  %v1241_v35 = vpop.f32.mrb[6].mxu1  ;;  %v1356_v28 = vld [vmem:[%s6949_s22 + $0x8] sm:$0xff] }
 0x2e0   : > { %v7064_v33 = vadd.f32 %v1312_v32, %v1239_v31  ;;  %v1314_v34 = vpop.f32.mrb[6].mxu0  ;;  %v1243_v37 = vpop.f32.mrb[7].mxu1 }
 0x2e1   : > { %1438 = vrot.lane.b32.xlu0 %v7048_v21, %s6139_s13  ;;  %v7068_v36 = vadd.f32 %v1314_v34, %v1241_v35  ;;  %v1316_v38 = vpop.f32.mrb[7].mxu0  ;;  %v1339_v34 = vld [vmem:[%s6942_s7] sm:$0xff]  ;;  %v1340_v35 = vld [vmem:[%s6942_s7 + $0x8] sm:$0xff] }
 0x2e2   : > { %v7070_v39 = vadd.f32 %v1316_v38, %v1243_v37  ;;  %v1341_v37 = vld [vmem:[%s6942_s7 + $0x10] sm:$0xff] }
 0x2e3   : > { %1389 = vrot.lane.b32.xlu1 %v7054_v27, %s6140_s12  ;;  %v1532_v0 = vmul.f32 %v1341_v37, %v7050_v24 }
 0x2e5   : > { %1387 = vrot.lane.b32.xlu0 %v7048_v21, %s6140_s12  ;;  %v1247_v41 = vpop.f32.mrb[8].mxu1 }
 0x2e6   : > { %v1320_v40 = vpop.f32.mrb[8].mxu0  ;;  %v1249_v43 = vpop.f32.mrb[9].mxu1 }
 0x2e7   : > { %1426 = vrot.lane.b32.xlu1 %v7062_v30, %s6139_s13  ;;  %v7078_v42 = vadd.f32 %v1320_v40, %v1247_v41  ;;  %v1322_v44 = vpop.f32.mrb[9].mxu0  ;;  %v1251_v47 = vpop.f32.mrb[10].mxu1  ;;  %v1342_v41 = vld [vmem:[%s6942_s7 + $0x18] sm:$0xff] }
 0x2e8   : > { %v7080_v45 = vadd.f32 %v1322_v44, %v1249_v43  ;;  %v1324_v46 = vpop.f32.mrb[10].mxu0  ;;  %v1253_v49 = vpop.f32.mrb[11].mxu1  ;;  %v1357_v43 = vld [vmem:[%s6949_s22 + $0x10] sm:$0xff]  ;;  %v1358_v44 = vld [vmem:[%s6949_s22 + $0x18] sm:$0xff]  ;;  %v1533_v1 = vmul.f32 %v1342_v41, %v7054_v27 }
 0x2e9   : > { %1424 = vrot.lane.b32.xlu0 %v7050_v24, %s6139_s13  ;;  %v7084_v48 = vadd.f32 %v1324_v46, %v1251_v47  ;;  %v1326_v50 = vpop.f32.mrb[11].mxu0 }
 0x2ea   : > { %v7086_v51 = vadd.f32 %v1326_v50, %v1253_v49 }
 0x2eb   : > { %1428 = vrot.lane.b32.xlu1 %v7068_v36, %s6139_s13 }
 0x2ed   : > { %1375 = vrot.lane.b32.xlu0 %v7062_v30, %s6140_s12  ;;  %v1257_v53 = vpop.f32.mrb[12].mxu1 }
 0x2ee   : > { %v1330_v52 = vpop.f32.mrb[12].mxu0  ;;  %v1259_v55 = vpop.f32.mrb[13].mxu1 }
 0x2ef   : > { %1377 = vrot.lane.b32.xlu1 %v7068_v36, %s6140_s12  ;;  %v7094_v54 = vadd.f32 %v1330_v52, %v1257_v53  ;;  %v1332_v56 = vpop.f32.mrb[13].mxu0  ;;  %v1261_v59 = vpop.f32.mrb[14].mxu1 }
 0x2f0   : > { %v7096_v57 = vadd.f32 %v1332_v56, %v1259_v55  ;;  %v1334_v58 = vpop.f32.mrb[14].mxu0  ;;  %v1263_v61 = vpop.f32.mrb[15].mxu1  ;;  %v1530_v56 = vmul.f32 %v1339_v34, %v7046_v18 }
 0x2f1   : > { %1442 = vrot.lane.b32.xlu0 %v7064_v33, %s6139_s13  ;;  %v7100_v60 = vadd.f32 %v1334_v58, %v1261_v59  ;;  %v1336_v62 = vpop.f32.mrb[15].mxu0  ;;  %v1531_v58 = vmul.f32 %v1340_v35, %v7048_v21 }
 0x2f2   : > { %v7102_v63 = vadd.f32 %v1336_v62, %v1263_v61 }
 0x2f3   : > { %1444 = vrot.lane.b32.xlu1 %v7070_v39, %s6139_s13 }
 0x2f5   : > { %1391 = vrot.lane.b32.xlu0 %v7064_v33, %s6140_s12 }
 0x2f7   : > { %1393 = vrot.lane.b32.xlu1 %v7070_v39, %s6140_s12 }
 0x2f9   : > { %1430 = vrot.lane.b32.xlu0 %v7078_v42, %s6139_s13 }
 0x2fb   : > { %1432 = vrot.lane.b32.xlu1 %v7084_v48, %s6139_s13 }
 0x2fd   : > { %1379 = vrot.lane.b32.xlu0 %v7078_v42, %s6140_s12 }
 0x2ff   : > { %1381 = vrot.lane.b32.xlu1 %v7084_v48, %s6140_s12 }
 0x301   : > { %1446 = vrot.lane.b32.xlu0 %v7080_v45, %s6139_s13 }
 0x303   : > { %1448 = vrot.lane.b32.xlu1 %v7086_v51, %s6139_s13 }
 0x305   : > { %1395 = vrot.lane.b32.xlu0 %v7080_v45, %s6140_s12 }
 0x307   : > { %1397 = vrot.lane.b32.xlu1 %v7086_v51, %s6140_s12 }
 0x309   : > { %1434 = vrot.lane.b32.xlu0 %v7094_v54, %s6139_s13 }
 0x30b   : > { %1436 = vrot.lane.b32.xlu1 %v7100_v60, %s6139_s13 }
 0x30d   : > { %1383 = vrot.lane.b32.xlu0 %v7094_v54, %s6140_s12 }
 0x30f   : > { %1385 = vrot.lane.b32.xlu1 %v7100_v60, %s6140_s12 }
 0x311   : > { %1450 = vrot.lane.b32.xlu0 %v7096_v57, %s6139_s13 }
 0x313   : > { %1452 = vrot.lane.b32.xlu1 %v7102_v63, %s6139_s13 }
 0x315   : > { %1399 = vrot.lane.b32.xlu0 %v7096_v57, %s6140_s12 }
 0x317   : > { %1401 = vrot.lane.b32.xlu1 %v7102_v63, %s6140_s12 }
 0x34b   : > { %v1423_v3 = vpop.permute.xlu0 %1422 }
 0x34d   : > { %v1374_v5 = vpop.permute.xlu1 %1373 }
 0x34f   : > { %v1372_v6 = vpop.permute.xlu0 %1371 }
 0x351   : > { %v1441_v8 = vpop.permute.xlu1 %1440 }
 0x353   : > { %v1439_v9 = vpop.permute.xlu0 %1438 }
 0x354   : > { %v1455_v13 = vsel %vm1454_vm1, %v1423_v3, %v1439_v9  ;;  %v1463_v14 = vsel %vm1454_vm1, %v1439_v9, %v1423_v3 }
 0x355   : > { %v1390_v12 = vpop.permute.xlu1 %1389  ;;  %v1498_v22 = vsub.f32 0.0, %v1455_v13  ;;  %v1499_v23 = vsub.f32 0.0, %v1463_v14 }
 0x356   : > { %v1407_v50 = vsel %vm1405_vm2, %v1374_v5, %v1390_v12  ;;  %v1415_v52 = vsel %vm1405_vm2, %v1390_v12, %v1374_v5 }
 0x357   : > { %v1388_v15 = vpop.permute.xlu0 %1387 }
 0x358   : > { %v1406_v19 = vsel %vm1405_vm2, %v1372_v6, %v1388_v15  ;;  %v1414_v20 = vsel %vm1405_vm2, %v1388_v15, %v1372_v6 }
 0x359   : > { %v1427_v25 = vpop.permute.xlu1 %1426  ;;  %v1514_v29 = vsel %vm7184_vm3, %v1498_v22, %v1414_v20  ;;  %v1515_v31 = vsel %vm7188_vm4, %v1499_v23, %v1406_v19  ;;  %v1359_v19 = vld [vmem:[%s6949_s22 + $0x20] sm:$0xff]  ;;  %v1360_v20 = vld [vmem:[%s6949_s22 + $0x28] sm:$0xff] }
 0x35a   : > { %v1546_v53 = vmul.f32 %v1514_v29, %v1355_v26  ;;  %v1547_v55 = vmul.f32 %v1515_v31, %v1356_v28  ;;  %v1343_v23 = vld [vmem:[%s6942_s7 + $0x20] sm:$0xff]  ;;  %v1344_v26 = vld [vmem:[%s6942_s7 + $0x28] sm:$0xff]  ;;  %v1346_v31 = vld [vmem:[%s6942_s7 + $0x38] sm:$0xff] }
 0x35b   : > { %v1425_v32 = vpop.permute.xlu0 %1424 }
 0x35c   : > { %v1456_v38 = vsel %vm1454_vm1, %v1425_v32, %v1441_v8  ;;  %v1464_v40 = vsel %vm1454_vm1, %v1441_v8, %v1425_v32  ;;  %v1562_v6 = vadd.f32 %v1546_v53, %v1530_v56  ;;  %v1563_v7 = vadd.f32 %v1547_v55, %v1531_v58 }
 0x35d   : > { %v1500_v46 = vsub.f32 0.0, %v1456_v38  ;;  %v1501_v47 = vsub.f32 0.0, %v1464_v40  ;;  %v1429_v49 = vpop.permute.xlu1 %1428  ;;  %v1361_v38 = vld [vmem:[%s6949_s22 + $0x30] sm:$0xff]  ;;  %v1362_v40 = vld [vmem:[%s6949_s22 + $0x38] sm:$0xff]  ;;  %v1537_v58 = vmul.f32 %v1346_v31, %v7070_v39 }
 0x35f   : > { %v1516_v59 = vsel %vm7184_vm3, %v1500_v46, %v1415_v52  ;;  %v1517_v61 = vsel %vm7188_vm4, %v1501_v47, %v1407_v50  ;;  %v1376_v62 = vpop.permute.xlu0 %1375  ;;  %v1535_v50 = vmul.f32 %v1344_v26, %v7064_v33 }
 0x360   : > { %v1548_v2 = vmul.f32 %v1516_v59, %v1357_v43  ;;  %v1549_v3 = vmul.f32 %v1517_v61, %v1358_v44 }
 0x361   : > { %v1378_v5 = vpop.permute.xlu1 %1377 }
 0x362   : > { %v1564_v18 = vadd.f32 %v1548_v2, %v1532_v0  ;;  %v1565_v21 = vadd.f32 %v1549_v3, %v1533_v1 }
 0x363   : > { %v1443_v8 = vpop.permute.xlu0 %1442 }
 0x364   : > { %v1578_v9 = vpack.c.bf16 %v1564_v18, %v1562_v6  ;;  %v1579_v10 = vpack.c.bf16 %v1565_v21, %v1563_v7  ;;  %v1457_v24 = vsel %vm1454_vm1, %v1427_v25, %v1443_v8  ;;  %v1465_v27 = vsel %vm1454_vm1, %v1443_v8, %v1427_v25  ;;  %v1345_v25 = vld [vmem:[%s6942_s7 + $0x30] sm:$0xff] }
 0x365   : > { %v1445_v11 = vpop.permute.xlu1 %1444  ;;  %v1502_v14 = vsub.f32 0.0, %v1457_v24  ;;  %v1503_v15 = vsub.f32 0.0, %v1465_v27  ;;  %v1536_v56 = vmul.f32 %v1345_v25, %v7068_v36  ;;  %v1363_v24 = vld [vmem:[%s6949_s22 + $0x40] sm:$0xff]  ;;  %v1364_v27 = vld [vmem:[%s6949_s22 + $0x48] sm:$0xff] }
 0x366   : > { %1586 = vst [vmem:[#allocation2] sm:$0xff] %v1578_v9  ;;  %1587 = vst [vmem:[#allocation2 + $0x8] sm:$0xff] %v1579_v10  ;;  %v1458_v12 = vsel %vm1454_vm1, %v1429_v49, %v1445_v11  ;;  %v1466_v13 = vsel %vm1454_vm1, %v1445_v11, %v1429_v49  ;;  %v1534_v49 = vmul.f32 %v1343_v23, %v7062_v30 }
 0x367   : > { %v1392_v22 = vpop.permute.xlu0 %1391  ;;  %v1504_v32 = vsub.f32 0.0, %v1458_v12  ;;  %v1505_v34 = vsub.f32 0.0, %v1466_v13  ;;  %v1347_v12 = vld [vmem:[%s6942_s7 + $0x40] sm:$0xff]  ;;  %v1348_v13 = vld [vmem:[%s6942_s7 + $0x48] sm:$0xff] }
 0x368   : > { %v1408_v28 = vsel %vm1405_vm2, %v1376_v62, %v1392_v22  ;;  %v1416_v29 = vsel %vm1405_vm2, %v1392_v22, %v1376_v62 }
 0x369   : > { %v1518_v35 = vsel %vm7184_vm3, %v1502_v14, %v1416_v29  ;;  %v1519_v37 = vsel %vm7188_vm4, %v1503_v15, %v1408_v28  ;;  %v1394_v41 = vpop.permute.xlu1 %1393  ;;  %v1349_v14 = vld [vmem:[%s6942_s7 + $0x50] sm:$0xff]  ;;  %v1366_v29 = vld [vmem:[%s6949_s22 + $0x58] sm:$0xff] }
 0x36a   : > { %v1550_v43 = vmul.f32 %v1518_v35, %v1359_v19  ;;  %v1551_v44 = vmul.f32 %v1519_v37, %v1360_v20  ;;  %v1409_v46 = vsel %vm1405_vm2, %v1378_v5, %v1394_v41  ;;  %v1417_v47 = vsel %vm1405_vm2, %v1394_v41, %v1378_v5  ;;  %v1350_v20 = vld [vmem:[%s6942_s7 + $0x58] sm:$0xff]  ;;  %v1365_v28 = vld [vmem:[%s6949_s22 + $0x50] sm:$0xff] }
 0x36b   : > { %v1520_v52 = vsel %vm7184_vm3, %v1504_v32, %v1417_v47  ;;  %v1521_v53 = vsel %vm7188_vm4, %v1505_v34, %v1409_v46  ;;  %v1431_v55 = vpop.permute.xlu0 %1430  ;;  %v1540_v46 = vmul.f32 %v1349_v14, %v7084_v48  ;;  %v1541_v47 = vmul.f32 %v1350_v20, %v7086_v51 }
 0x36c   : > { %v1552_v59 = vmul.f32 %v1520_v52, %v1361_v38  ;;  %v1553_v61 = vmul.f32 %v1521_v53, %v1362_v40  ;;  %v1566_v0 = vadd.f32 %v1550_v43, %v1534_v49  ;;  %v1567_v1 = vadd.f32 %v1551_v44, %v1535_v50 }
 0x36d   : > { %v1433_v62 = vpop.permute.xlu1 %1432  ;;  %v1538_v38 = vmul.f32 %v1347_v12, %v7078_v42  ;;  %v1539_v40 = vmul.f32 %v1348_v13, %v7080_v45  ;;  %v1370_v12 = vld [vmem:[%s6949_s22 + $0x78] sm:$0xff] }
 0x36e   : > { %v1568_v2 = vadd.f32 %v1552_v59, %v1536_v56  ;;  %v1569_v30 = vadd.f32 %v1553_v61, %v1537_v58 }
 0x36f   : > { %v1380_v33 = vpop.permute.xlu0 %1379 }
 0x370   : > { %v1580_v3 = vpack.c.bf16 %v1568_v2, %v1566_v0  ;;  %v1581_v5 = vpack.c.bf16 %v1569_v30, %v1567_v1 }
 0x371   : > { %v1382_v6 = vpop.permute.xlu1 %1381 }
 0x372   : > { %1588 = vst [vmem:[#allocation2 + $0x10] sm:$0xff] %v1580_v3  ;;  %1589 = vst [vmem:[#allocation2 + $0x18] sm:$0xff] %v1581_v5  ;;  %v1367_v3 = vld [vmem:[%s6949_s22 + $0x60] sm:$0xff]  ;;  %v1368_v5 = vld [vmem:[%s6949_s22 + $0x68] sm:$0xff] }
 0x373   : > { %v1447_v36 = vpop.permute.xlu0 %1446 }
 0x374   : > { %v1459_v39 = vsel %vm1454_vm1, %v1431_v55, %v1447_v36  ;;  %v1467_v7 = vsel %vm1454_vm1, %v1447_v36, %v1431_v55  ;;  %v1351_v36 = vld [vmem:[%s6942_s7 + $0x60] sm:$0xff] }
 0x375   : > { %v1449_v18 = vpop.permute.xlu1 %1448  ;;  %v1506_v9 = vsub.f32 0.0, %v1459_v39  ;;  %v1507_v10 = vsub.f32 0.0, %v1467_v7  ;;  %v1352_v39 = vld [vmem:[%s6942_s7 + $0x68] sm:$0xff]  ;;  %v1353_v7 = vld [vmem:[%s6942_s7 + $0x70] sm:$0xff] }
 0x376   : > { %v1460_v21 = vsel %vm1454_vm1, %v1433_v62, %v1449_v18  ;;  %v1468_v8 = vsel %vm1454_vm1, %v1449_v18, %v1433_v62 }
 0x377   : > { %v1396_v11 = vpop.permute.xlu0 %1395  ;;  %v1508_v22 = vsub.f32 0.0, %v1460_v21  ;;  %v1509_v23 = vsub.f32 0.0, %v1468_v8  ;;  %v1354_v8 = vld [vmem:[%s6942_s7 + $0x78] sm:$0xff] }
 0x378   : > { %v1410_v15 = vsel %vm1405_vm2, %v1380_v33, %v1396_v11  ;;  %v1418_v19 = vsel %vm1405_vm2, %v1396_v11, %v1380_v33  ;;  %v1369_v11 = vld [vmem:[%s6949_s22 + $0x70] sm:$0xff] }
 0x379   : > { %v1522_v26 = vsel %vm7184_vm3, %v1506_v9, %v1418_v19  ;;  %v1523_v25 = vsel %vm7188_vm4, %v1507_v10, %v1410_v15  ;;  %v1398_v31 = vpop.permute.xlu1 %1397 }
 0x37a   : > { %v1554_v32 = vmul.f32 %v1522_v26, %v1363_v24  ;;  %v1555_v34 = vmul.f32 %v1523_v25, %v1364_v27  ;;  %v1411_v35 = vsel %vm1405_vm2, %v1382_v6, %v1398_v31  ;;  %v1419_v37 = vsel %vm1405_vm2, %v1398_v31, %v1382_v6 }
 0x37b   : > { %v1524_v41 = vsel %vm7184_vm3, %v1508_v22, %v1419_v37  ;;  %v1525_v43 = vsel %vm7188_vm4, %v1509_v23, %v1411_v35  ;;  %v1435_v44 = vpop.permute.xlu0 %1434  ;;  %v1542_v22 = vmul.f32 %v1351_v36, %v7094_v54  ;;  %v1543_v23 = vmul.f32 %v1352_v39, %v7096_v57 }
 0x37c   : > { %v1556_v49 = vmul.f32 %v1524_v41, %v1365_v28  ;;  %v1557_v50 = vmul.f32 %v1525_v43, %v1366_v29  ;;  %v1570_v53 = vadd.f32 %v1554_v32, %v1538_v38  ;;  %v1571_v55 = vadd.f32 %v1555_v34, %v1539_v40 }
 0x37d   : > { %v1437_v52 = vpop.permute.xlu1 %1436  ;;  %v1544_v28 = vmul.f32 %v1353_v7, %v7100_v60  ;;  %v1545_v29 = vmul.f32 %v1354_v8, %v7102_v63 }
 0x37e   : > { %v1572_v56 = vadd.f32 %v1556_v49, %v1540_v46  ;;  %v1573_v42 = vadd.f32 %v1557_v50, %v1541_v47 }
 0x37f   : > { %v1384_v45 = vpop.permute.xlu0 %1383 }
 0x380   : > { %v1582_v58 = vpack.c.bf16 %v1572_v56, %v1570_v53  ;;  %v1583_v59 = vpack.c.bf16 %v1573_v42, %v1571_v55 }
 0x381   : > { %v1386_v61 = vpop.permute.xlu1 %1385 }
 0x382   : > { %1590 = vst [vmem:[#allocation2 + $0x20] sm:$0xff] %v1582_v58  ;;  %1591 = vst [vmem:[#allocation2 + $0x28] sm:$0xff] %v1583_v59 }
 0x383   : > { %v1451_v48 = vpop.permute.xlu0 %1450 }
 0x384   : > { %v1461_v51 = vsel %vm1454_vm1, %v1435_v44, %v1451_v48  ;;  %v1469_v62 = vsel %vm1454_vm1, %v1451_v48, %v1435_v44 }
 0x385   : > { %v1453_v0 = vpop.permute.xlu1 %1452  ;;  %v1510_v30 = vsub.f32 0.0, %v1461_v51  ;;  %v1511_v33 = vsub.f32 0.0, %v1469_v62 }
 0x386   : > { %v1462_v1 = vsel %vm1454_vm1, %v1437_v52, %v1453_v0  ;;  %v1470_v2 = vsel %vm1454_vm1, %v1453_v0, %v1437_v52 }
 0x387   : > { %v1400_v6 = vpop.permute.xlu0 %1399  ;;  %v1512_v9 = vsub.f32 0.0, %v1462_v1  ;;  %v1513_v10 = vsub.f32 0.0, %v1470_v2 }
 0x388   : > { %v1412_v18 = vsel %vm1405_vm2, %v1384_v45, %v1400_v6  ;;  %v1420_v21 = vsel %vm1405_vm2, %v1400_v6, %v1384_v45 }
 0x389   : > { %v1526_v24 = vsel %vm7184_vm3, %v1510_v30, %v1420_v21  ;;  %v1527_v27 = vsel %vm7188_vm4, %v1511_v33, %v1412_v18  ;;  %v1402_v13 = vpop.permute.xlu1 %1401 }
 0x38a   : > { %v1558_v14 = vmul.f32 %v1526_v24, %v1367_v3  ;;  %v1559_v15 = vmul.f32 %v1527_v27, %v1368_v5  ;;  %v1413_v19 = vsel %vm1405_vm2, %v1386_v61, %v1402_v13  ;;  %v1421_v20 = vsel %vm1405_vm2, %v1402_v13, %v1386_v61 }
 0x38b   : > { %v1528_v26 = vsel %vm7184_vm3, %v1512_v9, %v1421_v20  ;;  %v1529_v25 = vsel %vm7188_vm4, %v1513_v10, %v1413_v19 }
 0x38c   : > { %v1560_v31 = vmul.f32 %v1528_v26, %v1369_v11  ;;  %v1561_v32 = vmul.f32 %v1529_v25, %v1370_v12  ;;  %v1574_v34 = vadd.f32 %v1558_v14, %v1542_v22  ;;  %v1575_v35 = vadd.f32 %v1559_v15, %v1543_v23 }
 0x38e   : > { %v1576_v4 = vadd.f32 %v1560_v31, %v1544_v28  ;;  %v1577_v37 = vadd.f32 %v1561_v32, %v1545_v29 }
 0x390   : > { %v1584_v38 = vpack.c.bf16 %v1576_v4, %v1574_v34  ;;  %v1585_v54 = vpack.c.bf16 %v1577_v37, %v1575_v35 }
 0x392   : > { %1592 = vst [vmem:[#allocation2 + $0x30] sm:$0xff] %v1584_v38  ;;  %1593 = vst [vmem:[#allocation2 + $0x38] sm:$0xff] %v1585_v54 }
 0x393 PF: > { %s1643_s27 = sadd.s32 63, %s4525_s20 }
 0x394   : > { %p4608_p2 = scmp.gt.s32.totalorder %s4526_s5, %s1643_s27 }
 0x395   : > { %v5294_v57 = vld [vmem:[%s6932_s25 + $0x4] ss:$8 sps:$4 sm:$0xff] (!%p4608_p2)   ;;  %v5296_v60 = vld [vmem:[%s6932_s25] ss:$8 sps:$4 sm:$0xff] (!%p4608_p2)   ;;  %v5297_v63 = vld [vmem:[%s6932_s25 + $0x14] ss:$8 sps:$4 sm:$0xff] (!%p4608_p2)  }
 0x396   : > { %1647 = sbr.rel (%p4608_p2) target bundleno = 2700 (0xa8c), region = 100  ;;  %2128 = vmatprep.subr.bf16.mxu0 (!%p4608_p2), %v5294_v57  ;;  %v5299_v16 = vld [vmem:[%s6932_s25 + $0x10] ss:$8 sps:$4 sm:$0xff] (!%p4608_p2)   ;;  %v5300_v17 = vld [vmem:[%s6932_s25 + $0x24] ss:$8 sps:$4 sm:$0xff] (!%p4608_p2)   ;;  %s6143_s7 = smov (!%p4608_p2), 1  }
 0x397   : > { %2129 = vmatpush1.bf16.msra.mxu0 (!%p4608_p2), %v5296_v60  ;;  %v5302_v40 = vld [vmem:[%s6932_s25 + $0x20] ss:$8 sps:$4 sm:$0xff] (!%p4608_p2)   ;;  %v5303_v41 = vld [vmem:[%s6932_s25 + $0x34] ss:$8 sps:$4 sm:$0xff] (!%p4608_p2)   ;;  %v5305_v43 = vld [vmem:[%s6932_s25 + $0x30] ss:$8 sps:$4 sm:$0xff] (!%p4608_p2)  }
 0x398   : > { %2130 = vmatprep.subr.bf16.mxu0 (!%p4608_p2), %v5297_v63  ;;  %v5306_v44 = vld [vmem:[%s6932_s25 + $0x44] ss:$8 sps:$4 sm:$0xff] (!%p4608_p2)   ;;  %v5308_v46 = vld [vmem:[%s6932_s25 + $0x40] ss:$8 sps:$4 sm:$0xff] (!%p4608_p2)   ;;  %v5309_v47 = vld [vmem:[%s6932_s25 + $0x54] ss:$8 sps:$4 sm:$0xff] (!%p4608_p2)  }
 0x399   : > { %v5311_v49 = vld [vmem:[%s6932_s25 + $0x50] ss:$8 sps:$4 sm:$0xff] (!%p4608_p2)   ;;  %v5312_v50 = vld [vmem:[%s6932_s25 + $0x64] ss:$8 sps:$4 sm:$0xff] (!%p4608_p2)   ;;  %v5314_v53 = vld [vmem:[%s6932_s25 + $0x60] ss:$8 sps:$4 sm:$0xff] (!%p4608_p2)  }
 0x39a   : > { %v5344_v52 = vld [vmem:[%s6918_s19 + $0x4] ss:$16 sps:$4 sm:$0xff] (!%p4608_p2)   ;;  %v5317_v56 = vld [vmem:[%s6932_s25 + $0x70] ss:$8 sps:$4 sm:$0xff] (!%p4608_p2)   ;;  %v5320_v45 = vld [vmem:[%s6932_s25 + $0x80] ss:$8 sps:$4 sm:$0xff] (!%p4608_p2)  }
 0x39b   : > { %2131 = vmatpush1.bf16.msra.mxu0 (!%p4608_p2), %v5299_v16  ;;  %v5315_v55 = vld [vmem:[%s6932_s25 + $0x74] ss:$8 sps:$4 sm:$0xff] (!%p4608_p2)   ;;  %2160 = vmatprep.mubr.bf16.mxu0 (!%p4608_p2), %v5344_v52  ;;  %v5318_v42 = vld [vmem:[%s6932_s25 + $0x84] ss:$8 sps:$4 sm:$0xff] (!%p4608_p2)   ;;  %v5323_v59 = vld [vmem:[%s6932_s25 + $0x90] ss:$8 sps:$4 sm:$0xff] (!%p4608_p2)  }
 0x39c   : > { %2132 = vmatprep.subr.bf16.mxu0 (!%p4608_p2), %v5300_v17  ;;  %v5321_v58 = vld [vmem:[%s6932_s25 + $0x94] ss:$8 sps:$4 sm:$0xff] (!%p4608_p2)   ;;  %v5324_v61 = vld [vmem:[%s6932_s25 + $0xa4] ss:$8 sps:$4 sm:$0xff] (!%p4608_p2)   ;;  %v5326_v48 = vld [vmem:[%s6932_s25 + $0xa0] ss:$8 sps:$4 sm:$0xff] (!%p4608_p2)  }
 0x39d   : > { %v5327_v51 = vld [vmem:[%s6932_s25 + $0xb4] ss:$8 sps:$4 sm:$0xff]   ;;  %v5329_v62 = vld [vmem:[%s6932_s25 + $0xb0] ss:$8 sps:$4 sm:$0xff]   ;;  %v5330_v0 = vld [vmem:[%s6932_s25 + $0xc4] ss:$8 sps:$4 sm:$0xff]  }
 0x39e   : > { %v5332_v1 = vld [vmem:[%s6932_s25 + $0xc0] ss:$8 sps:$4 sm:$0xff]   ;;  %v5333_v2 = vld [vmem:[%s6932_s25 + $0xd4] ss:$8 sps:$4 sm:$0xff]   ;;  %v5335_v30 = vld [vmem:[%s6932_s25 + $0xd0] ss:$8 sps:$4 sm:$0xff]  }
 0x39f   : > { %2133 = vmatpush1.bf16.msra.mxu0 %v5302_v40  ;;  %v5336_v33 = vld [vmem:[%s6932_s25 + $0xe4] ss:$8 sps:$4 sm:$0xff]   ;;  %v5338_v3 = vld [vmem:[%s6932_s25 + $0xe0] ss:$8 sps:$4 sm:$0xff]   ;;  %v5339_v5 = vld [vmem:[%s6932_s25 + $0xf4] ss:$8 sps:$4 sm:$0xff]  }
 0x3a0   : > { %2134 = vmatprep.subr.bf16.mxu0 %v5303_v41  ;;  %v5341_v6 = vld [vmem:[%s6932_s25 + $0xf0] ss:$8 sps:$4 sm:$0xff]   ;;  %v5347_v36 = vld [vmem:[%s6932_s25 + $0x104] ss:$8 sps:$4 sm:$0xff]   ;;  %v5345_v7 = vld [vmem:[%s6932_s25 + $0x100] ss:$8 sps:$4 sm:$0xff]  }
 0x3a1   : > { %v5342_v39 = vld [vmem:[%s6918_s19] ss:$16 sps:$4 sm:$0xff]   ;;  %v5375_v18 = vld [vmem:[%s6918_s19 + $0x24] ss:$16 sps:$4 sm:$0xff]   ;;  %v5404_v28 = vld [vmem:[%s6918_s19 + $0xc] ss:$16 sps:$4 sm:$0xff]  }
 0x3a2   : > { %v5350_v21 = vld [vmem:[%s6932_s25 + $0x114] ss:$8 sps:$4 sm:$0xff]   ;;  %v5348_v8 = vld [vmem:[%s6932_s25 + $0x110] ss:$8 sps:$4 sm:$0xff]   ;;  %v5353_v9 = vld [vmem:[%s6932_s25 + $0x124] ss:$8 sps:$4 sm:$0xff]  }
 0x3a3   : > { %2135 = vmatpush1.bf16.msra.mxu0 %v5305_v43  ;;  %v5377_v10 = vld [vmem:[%s6918_s19 + $0x20] ss:$16 sps:$4 sm:$0xff]   ;;  %v5384_v27 = vld [vmem:[%s6918_s19 + $0x44] ss:$16 sps:$4 sm:$0xff]   ;;  %v5410_v52 = vld [vmem:[%s6918_s19 + $0x48] ss:$16 sps:$4 sm:$0xff]  }
 0x3a4   : > { %2136 = vmatprep.subr.bf16.mxu0 %v5306_v44  ;;  %v5351_v24 = vld [vmem:[%s6932_s25 + $0x120] ss:$8 sps:$4 sm:$0xff]   ;;  %v5356_v11 = vld [vmem:[%s6932_s25 + $0x134] ss:$8 sps:$4 sm:$0xff]   ;;  %v5354_v12 = vld [vmem:[%s6932_s25 + $0x130] ss:$8 sps:$4 sm:$0xff]  }
 0x3a5   : > { %v5359_v13 = vld [vmem:[%s6932_s25 + $0x144] ss:$8 sps:$4 sm:$0xff]   ;;  %v5386_v14 = vld [vmem:[%s6918_s19 + $0x40] ss:$16 sps:$4 sm:$0xff]   ;;  %v5362_v20 = vld [vmem:[%s6932_s25 + $0x154] ss:$8 sps:$4 sm:$0xff]  }
 0x3a6   : > { %v5357_v15 = vld [vmem:[%s6932_s25 + $0x140] ss:$8 sps:$4 sm:$0xff]   ;;  %v5393_v19 = vld [vmem:[%s6918_s19 + $0x64] ss:$16 sps:$4 sm:$0xff]   ;;  %v5360_v22 = vld [vmem:[%s6932_s25 + $0x150] ss:$8 sps:$4 sm:$0xff]  }
 0x3a7   : > { %2137 = vmatpush1.bf16.msra.mxu0 %v5308_v46  ;;  %v5365_v23 = vld [vmem:[%s6932_s25 + $0x164] ss:$8 sps:$4 sm:$0xff]   ;;  %v5395_v26 = vld [vmem:[%s6918_s19 + $0x60] ss:$16 sps:$4 sm:$0xff]   ;;  %v5368_v29 = vld [vmem:[%s6932_s25 + $0x174] ss:$8 sps:$4 sm:$0xff]  }
 0x3a8   : > { %2138 = vmatprep.subr.bf16.mxu0 %v5309_v47  ;;  %v5363_v25 = vld [vmem:[%s6932_s25 + $0x160] ss:$8 sps:$4 sm:$0xff]   ;;  %v5366_v31 = vld [vmem:[%s6932_s25 + $0x170] ss:$8 sps:$4 sm:$0xff]   ;;  %v5371_v32 = vld [vmem:[%s6932_s25 + $0x184] ss:$8 sps:$4 sm:$0xff]  }
 0x3a9   : > { %v5369_v34 = vld [vmem:[%s6932_s25 + $0x180] ss:$8 sps:$4 sm:$0xff]   ;;  %v5374_v35 = vld [vmem:[%s6932_s25 + $0x194] ss:$8 sps:$4 sm:$0xff]   ;;  %v5372_v4 = vld [vmem:[%s6932_s25 + $0x190] ss:$8 sps:$4 sm:$0xff]  }
 0x3aa   : > { %v5380_v37 = vld [vmem:[%s6932_s25 + $0x1a4] ss:$8 sps:$4 sm:$0xff]   ;;  %v5378_v38 = vld [vmem:[%s6932_s25 + $0x1a0] ss:$8 sps:$4 sm:$0xff]   ;;  %v5383_v54 = vld [vmem:[%s6932_s25 + $0x1b4] ss:$8 sps:$4 sm:$0xff]  }
 0x3ab   : > { %2139 = vmatpush1.bf16.msra.mxu0 %v5311_v49  ;;  %v5381_v57 = vld [vmem:[%s6932_s25 + $0x1b0] ss:$8 sps:$4 sm:$0xff]   ;;  %v5389_v60 = vld [vmem:[%s6932_s25 + $0x1c4] ss:$8 sps:$4 sm:$0xff]   ;;  %v5387_v63 = vld [vmem:[%s6932_s25 + $0x1c0] ss:$8 sps:$4 sm:$0xff]  }
 0x3ac   : > { %2140 = vmatprep.subr.bf16.mxu0 %v5312_v50  ;;  %v5392_v16 = vld [vmem:[%s6932_s25 + $0x1d4] ss:$8 sps:$4 sm:$0xff]   ;;  %v5390_v17 = vld [vmem:[%s6932_s25 + $0x1d0] ss:$8 sps:$4 sm:$0xff]   ;;  %v5398_v40 = vld [vmem:[%s6932_s25 + $0x1e4] ss:$8 sps:$4 sm:$0xff]  }
 0x3ad   : > { %v5396_v41 = vld [vmem:[%s6932_s25 + $0x1e0] ss:$8 sps:$4 sm:$0xff]   ;;  %v5401_v43 = vld [vmem:[%s6932_s25 + $0x1f4] ss:$8 sps:$4 sm:$0xff]   ;;  %v5399_v44 = vld [vmem:[%s6932_s25 + $0x1f0] ss:$8 sps:$4 sm:$0xff]  }
 0x3ae   : > { %v5402_v46 = vld [vmem:[%s6918_s19 + $0x8] ss:$16 sps:$4 sm:$0xff]   ;;  %v5405_v47 = vld [vmem:[%s6918_s19 + $0x2c] ss:$16 sps:$4 sm:$0xff]   ;;  %s6144_s25 = smov 127   ;;  %vm2498_vm14 = vcmask 523264  }
 0x3af   : > { %2141 = vmatpush1.bf16.msra.mxu0 %v5314_v53  ;;  %v5407_v49 = vld [vmem:[%s6918_s19 + $0x28] ss:$16 sps:$4 sm:$0xff]   ;;  %v5408_v50 = vld [vmem:[%s6918_s19 + $0x4c] ss:$16 sps:$4 sm:$0xff]   ;;  %vm2667_vm15 = vcmask 7168  }
 0x3b0   : > { %2142 = vmatprep.subr.bf16.mxu0 %v5315_v55  ;;  %v5411_v53 = vld [vmem:[%s6918_s19 + $0x6c] ss:$16 sps:$4 sm:$0xff]   ;;  %v5413_v55 = vld [vmem:[%s6918_s19 + $0x68] ss:$16 sps:$4 sm:$0xff]  }
 0x3b3   : > { %2143 = vmatpush1.bf16.msra.mxu0 %v5317_v56 }
 0x3b4   : > { %2144 = vmatprep.subr.bf16.mxu0 %v5318_v42 }
 0x3b7   : > { %2145 = vmatpush1.bf16.msra.mxu0 %v5320_v45 }
 0x3b8   : > { %2146 = vmatprep.subr.bf16.mxu0 %v5321_v58 }
 0x3bb   : > { %2147 = vmatpush1.bf16.msra.mxu0 %v5323_v59 }
 0x3bc   : > { %2148 = vmatprep.subr.bf16.mxu0 %v5324_v61 }
 0x3bf   : > { %2149 = vmatpush1.bf16.msra.mxu0 %v5326_v48 }
 0x3c0   : > { %2150 = vmatprep.subr.bf16.mxu0 %v5327_v51 }
 0x3c3   : > { %2151 = vmatpush1.bf16.msra.mxu0 %v5329_v62 }
 0x3c4   : > { %2152 = vmatprep.subr.bf16.mxu0 %v5330_v0 }
 0x3c7   : > { %2153 = vmatpush1.bf16.msra.mxu0 %v5332_v1 }
 0x3c8   : > { %2154 = vmatprep.subr.bf16.mxu0 %v5333_v2 }
 0x3cb   : > { %2155 = vmatpush1.bf16.msra.mxu0 %v5335_v30 }
 0x3cc   : > { %2156 = vmatprep.subr.bf16.mxu0 %v5336_v33 }
 0x3cf   : > { %2157 = vmatpush1.bf16.msra.mxu0 %v5338_v3 }
 0x3d0   : > { %2158 = vmatprep.subr.bf16.mxu0 %v5339_v5 }
 0x3d3   : > { %2159 = vmatpush1.bf16.msra.mxu0 %v5341_v6 }
 0x3d4   : > { %2201 = vmatprep.subr.bf16.mxu0 %v5347_v36 }
 0x3d6   : > { %2161 = vmatmul.mubr.bf16.vlgmr.msra.gmra.mrb[0].mxu0 %v5342_v39 }
 0x3d7   : > { %2202 = vmatpush1.bf16.msra.mxu0 %v5345_v7  ;;  %2170 = vmatprep.mubr.bf16.mxu0 %v5375_v18  ;;  %v2413_v7 = vld [vmem:[#allocation2] sm:$0xff] }
 0x3d8   : > { %2203 = vmatprep.subr.bf16.mxu0 %v5350_v21  ;;  %4824 = vmatprep.mubr.bf16.mxu1 %v2413_v7  ;;  %v2322_v21 = vlaneseq  ;;  %v2278_v7 = vld [vmem:[%s6952_s28 + $0x20] sm:$0xff] }
 0x3db   : > { %2204 = vmatpush1.bf16.msra.mxu0 %v5348_v8  ;;  %v7460_v8 = vshrl.u32 %v2322_v21, 7 }
 0x3dc   : > { %2205 = vmatprep.subr.bf16.mxu0 %v5353_v9  ;;  %v2403_v9 = vstv %s4526_s5 }
 0x3de   : > { %2171 = vmatmul.mubr.bf16.gmra.mrb[4].mxu0 %v5377_v10  ;;  %v2323_v10 = vand.u32 127, %v2322_v21  ;;  %v2279_v21 = vld [vmem:[%s6952_s28 + $0x28] sm:$0xff] }
 0x3df   : > { %2206 = vmatpush1.bf16.msra.mxu0 %v5351_v24  ;;  %2180 = vmatprep.mubr.bf16.mxu0 %v5384_v27  ;;  %v2388_v27 = vadd.s32 16, %v7460_v8 }
 0x3e0   : > { %2207 = vmatprep.subr.bf16.mxu0 %v5356_v11  ;;  %v7464_v24 = vadd.s32 %v2403_v9, %v2323_v10  ;;  %v7469_v11 = vstv %s4525_s20 }
 0x3e3   : > { %2208 = vmatpush1.bf16.msra.mxu0 %v5354_v12  ;;  %v7472_v12 = vadd.s32 %v7469_v11, %v2388_v27 }
 0x3e4   : > { %2209 = vmatprep.subr.bf16.mxu0 %v5359_v13  ;;  %v2328_v13 = vand.u32 1, %v2323_v10 }
 0x3e5   : > { %vm2407_vm5 = vcmp.le.s32.totalorder %v7464_v24, %v7472_v12 }
 0x3e6   : > { %2181 = vmatmul.mubr.bf16.gmra.mrb[8].mxu0 %v5386_v14  ;;  %vm7476_vm6 = vcmp.eq.s32.totalorder %v2328_v13, 0 }
 0x3e7   : > { %2210 = vmatpush1.bf16.msra.mxu0 %v5357_v15  ;;  %2190 = vmatprep.mubr.bf16.mxu0 %v5393_v19  ;;  %v2415_v15 = vld [vmem:[#allocation2 + $0x20] sm:$0xff] }
 0x3e8   : > { %2211 = vmatprep.subr.bf16.mxu0 %v5362_v20 }
 0x3eb   : > { %2212 = vmatpush1.bf16.msra.mxu0 %v5360_v22  ;;  %v2282_v22 = vld [vmem:[%s6961_s29] sm:$0xff] }
 0x3ec   : > { %2213 = vmatprep.subr.bf16.mxu0 %v5365_v23 }
 0x3ee   : > { %2191 = vmatmul.mubr.bf16.gmra.mrb[12].mxu0 %v5395_v26 }
 0x3ef   : > { %2214 = vmatpush1.bf16.msra.mxu0 %v5363_v25  ;;  %2233 = vmatprep.mubr.bf16.mxu0 %v5404_v28  ;;  %v2274_v25 = vld [vmem:[%s6952_s28] sm:$0xff]  ;;  %v2275_v28 = vld [vmem:[%s6952_s28 + $0x8] sm:$0xff] }
 0x3f0   : > { %2215 = vmatprep.subr.bf16.mxu0 %v5368_v29  ;;  %v2283_v29 = vld [vmem:[%s6961_s29 + $0x8] sm:$0xff] }
 0x3f3   : > { %2216 = vmatpush1.bf16.msra.mxu0 %v5366_v31 }
 0x3f4   : > { %2217 = vmatprep.subr.bf16.mxu0 %v5371_v32 }
 0x3f7   : > { %2218 = vmatpush1.bf16.msra.mxu0 %v5369_v34 }
 0x3f8   : > { %2219 = vmatprep.subr.bf16.mxu0 %v5374_v35 }
 0x3fb   : > { %2220 = vmatpush1.bf16.msra.mxu0 %v5372_v4 }
 0x3fc   : > { %2221 = vmatprep.subr.bf16.mxu0 %v5380_v37 }
 0x3ff   : > { %2222 = vmatpush1.bf16.msra.mxu0 %v5378_v38 }
 0x400   : > { %2223 = vmatprep.subr.bf16.mxu0 %v5383_v54 }
 0x403   : > { %2224 = vmatpush1.bf16.msra.mxu0 %v5381_v57 }
 0x404   : > { %2225 = vmatprep.subr.bf16.mxu0 %v5389_v60 }
 0x407   : > { %2226 = vmatpush1.bf16.msra.mxu0 %v5387_v63 }
 0x408   : > { %2227 = vmatprep.subr.bf16.mxu0 %v5392_v16 }
 0x40b   : > { %2228 = vmatpush1.bf16.msra.mxu0 %v5390_v17  ;;  %v2284_v17 = vld [vmem:[%s6961_s29 + $0x10] sm:$0xff] }
 0x40c   : > { %2229 = vmatprep.subr.bf16.mxu0 %v5398_v40 }
 0x40f   : > { %2230 = vmatpush1.bf16.msra.mxu0 %v5396_v41 }
 0x410   : > { %2231 = vmatprep.subr.bf16.mxu0 %v5401_v43  ;;  %v2276_v43 = vld [vmem:[%s6952_s28 + $0x10] sm:$0xff] }
 0x413   : > { %2232 = vmatpush1.bf16.msra.mxu0 %v5399_v44  ;;  %v2277_v44 = vld [vmem:[%s6952_s28 + $0x18] sm:$0xff] }
 0x416   : > { %2234 = vmatmul.mubr.bf16.vlgmr.msra.gmra.mrb[0].mxu0 %v5402_v46 }
 0x417   : > { %2243 = vmatprep.mubr.bf16.mxu0 %v5405_v47 }
 0x41e   : > { %2244 = vmatmul.mubr.bf16.gmra.mrb[4].mxu0 %v5407_v49  ;;  %v2285_v49 = vld [vmem:[%s6961_s29 + $0x18] sm:$0xff] }
 0x41f   : > { %2253 = vmatprep.mubr.bf16.mxu0 %v5408_v50 }
 0x426   : > { %2254 = vmatmul.mubr.bf16.gmra.mrb[8].mxu0 %v5410_v52 }
 0x427   : > { %2263 = vmatprep.mubr.bf16.mxu0 %v5411_v53 }
 0x42e   : > { %2264 = vmatmul.mubr.bf16.gmra.mrb[12].mxu0 %v5413_v55 }
 0x4e9   : > { %v7416_v56 = vpop.f32.mrb[0].mxu0 }
 0x4ea   : > { %2290 = vrot.lane.b32.xlu1 %v7416_v56, %s6143_s7  ;;  %2306 = vrot.lane.b32.xlu0 %v7416_v56, %s6144_s25  ;;  %v2237_v42 = vpop.f32.mrb[1].mxu0  ;;  %v2353_v4 = vmul.f32 %v2274_v25, %v7416_v56 }
 0x4eb   : > { %v2239_v45 = vpop.f32.mrb[2].mxu0 }
 0x4ec   : > { %v2241_v58 = vpop.f32.mrb[3].mxu0  ;;  %v2354_v37 = vmul.f32 %v2275_v28, %v2239_v45 }
 0x4ed   : > { %v7421_v59 = vpack.c.bf16 %v2241_v58, %v2237_v42 }
 0x4ee   : > { %2292 = vrot.lane.b32.xlu1 %v2239_v45, %s6143_s7  ;;  %2308 = vrot.lane.b32.xlu0 %v2239_v45, %s6144_s25 }
 0x4f1   : > { %v7424_v61 = vpop.f32.mrb[4].mxu0 }
 0x4f2   : > { %2310 = vrot.lane.b32.xlu0 %v7424_v61, %s6144_s25  ;;  %v2247_v48 = vpop.f32.mrb[5].mxu0  ;;  %v2355_v55 = vmul.f32 %v2276_v43, %v7424_v61  ;;  %v2414_v43 = vld [vmem:[#allocation2 + $0x10] sm:$0xff] }
 0x4f3   : > { %v7427_v51 = vpop.f32.mrb[6].mxu0 }
 0x4f4   : > { %2312 = vrot.lane.b32.xlu1 %v7427_v51, %s6144_s25  ;;  %v2251_v62 = vpop.f32.mrb[7].mxu0  ;;  %v2356_v56 = vmul.f32 %v2277_v44, %v7427_v51  ;;  %v7547_v44 = vadd.s32 %v7469_v11, %v7460_v8 }
 0x4f5   : > { %v7430_v0 = vpack.c.bf16 %v2251_v62, %v2247_v48 }
 0x4f6   : > { %2294 = vrot.lane.b32.xlu0 %v7424_v61, %s6143_s7  ;;  %v2287_v61 = vld [vmem:[%s6961_s29 + $0x28] sm:$0xff]  ;;  %vm2405_vm7 = vcmp.le.s32.totalorder %v7464_v24, %v7547_v44 }
 0x4f8   : > { %2296 = vrot.lane.b32.xlu1 %v7427_v51, %s6143_s7 }
 0x4f9   : > { %v7436_v1 = vpop.f32.mrb[8].mxu0 }
 0x4fa   : > { %2314 = vrot.lane.b32.xlu0 %v7436_v1, %s6144_s25  ;;  %v2257_v2 = vpop.f32.mrb[9].mxu0 }
 0x4fb   : > { %v7439_v30 = vpop.f32.mrb[10].mxu0 }
 0x4fc   : > { %2316 = vrot.lane.b32.xlu1 %v7439_v30, %s6144_s25  ;;  %v2261_v33 = vpop.f32.mrb[11].mxu0 }
 0x4fd   : > { %v7442_v3 = vpack.c.bf16 %v2261_v33, %v2257_v2  ;;  %v2286_v33 = vld [vmem:[%s6961_s29 + $0x20] sm:$0xff] }
 0x4fe   : > { %2298 = vrot.lane.b32.xlu0 %v7436_v1, %s6143_s7 }
 0x500   : > { %2300 = vrot.lane.b32.xlu1 %v7439_v30, %s6143_s7 }
 0x501   : > { %v7448_v5 = vpop.f32.mrb[12].mxu0 }
 0x502   : > { %2318 = vrot.lane.b32.xlu0 %v7448_v5, %s6144_s25  ;;  %v2267_v6 = vpop.f32.mrb[13].mxu0 }
 0x503   : > { %v7451_v36 = vpop.f32.mrb[14].mxu0 }
 0x504   : > { %2320 = vrot.lane.b32.xlu1 %v7451_v36, %s6144_s25  ;;  %v2271_v39 = vpop.f32.mrb[15].mxu0 }
 0x505   : > { %v7454_v18 = vpack.c.bf16 %v2271_v39, %v2267_v6 }
 0x506   : > { %2302 = vrot.lane.b32.xlu0 %v7448_v5, %s6143_s7 }
 0x508   : > { %2304 = vrot.lane.b32.xlu1 %v7451_v36, %s6143_s7 }
 0x55c   : > { %v2291_v14 = vpop.permute.xlu1 %2290  ;;  %v2307_v19 = vpop.permute.xlu0 %2306 }
 0x55d   : > { %v2337_v20 = vsub.f32 0.0, %v2307_v19  ;;  %v2358_v19 = vmul.f32 %v2279_v21, %v7439_v30 }
 0x55f   : > { %v2345_v23 = vsel %vm7476_vm6, %v2337_v20, %v2291_v14  ;;  %v2357_v14 = vmul.f32 %v2278_v7, %v7436_v1 }
 0x560   : > { %v2309_v26 = vpop.permute.xlu0 %2308  ;;  %v2361_v32 = vmul.f32 %v2345_v23, %v2282_v22  ;;  %v2293_v34 = vpop.permute.xlu1 %2292 }
 0x561   : > { %v2338_v31 = vsub.f32 0.0, %v2309_v26 }
 0x562   : > { %v2369_v57 = vadd.f32 %v2361_v32, %v2353_v4 }
 0x563   : > { %v2346_v35 = vsel %vm7476_vm6, %v2338_v31, %v2293_v34  ;;  %v2280_v34 = vld [vmem:[%s6952_s28 + $0x30] sm:$0xff] }
 0x564   : > { %v2362_v38 = vmul.f32 %v2346_v35, %v2283_v29  ;;  %v2311_v54 = vpop.permute.xlu0 %2310  ;;  %v2288_v29 = vld [vmem:[%s6961_s29 + $0x30] sm:$0xff]  ;;  %v2281_v35 = vld [vmem:[%s6952_s28 + $0x38] sm:$0xff] }
 0x565   : > { %v2339_v16 = vsub.f32 0.0, %v2311_v54 }
 0x566   : > { %v2370_v60 = vadd.f32 %v2362_v38, %v2354_v37  ;;  %v2313_v63 = vpop.permute.xlu1 %2312  ;;  %v2289_v38 = vld [vmem:[%s6961_s29 + $0x38] sm:$0xff] }
 0x567   : > { %v2340_v46 = vsub.f32 0.0, %v2313_v63 }
 0x568   : > { %v2295_v40 = vpop.permute.xlu0 %2294  ;;  %v7490_v41 = vpack.c.bf16 %v2370_v60, %v2369_v57  ;;  %v2359_v57 = vmul.f32 %v2280_v34, %v7448_v5  ;;  %v2360_v60 = vmul.f32 %v2281_v35, %v7451_v36  ;;  %v2416_v5 = vld [vmem:[#allocation2 + $0x30] sm:$0xff]  ;;  %v2389_v36 = vadd.s32 24, %v7460_v8  ;;  %v7642_v34 = vld [vmem:[#allocation4] sm:$0xff] }
 0x569   : > { %v2347_v47 = vsel %vm7476_vm6, %v2339_v16, %v2295_v40 }
 0x56a   : > { %v2363_v50 = vmul.f32 %v2347_v47, %v2284_v17  ;;  %4816 = vmatprep.subr.bf16.mxu1 %v7490_v41  ;;  %v2297_v52 = vpop.permute.xlu1 %2296  ;;  %v7551_v47 = vadd.s32 %v7469_v11, %v2389_v36 }
 0x56b   : > { %v2348_v53 = vsel %vm7476_vm6, %v2340_v46, %v2297_v52  ;;  %4817 = vmatpush3.bf16.xpose.msra.mxu1 %v7490_v41  ;;  %v2387_v46 = vadd.s32 8, %v7460_v8 }
 0x56c   : > { %v2364_v42 = vmul.f32 %v2348_v53, %v2285_v49  ;;  %v2315_v45 = vpop.permute.xlu0 %2314  ;;  %v2371_v58 = vadd.f32 %v2363_v50, %v2355_v55  ;;  %vm2408_vm8 = vcmp.le.s32.totalorder %v7464_v24, %v7551_v47  ;;  %v2390_v50 = vadd.s32 32, %v7460_v8 }
 0x56d   : > { %v2341_v2 = vsub.f32 0.0, %v2315_v45  ;;  %v7556_v49 = vadd.s32 %v7469_v11, %v2387_v46  ;;  %v2392_v53 = vadd.s32 48, %v7460_v8  ;;  %v2391_v55 = vadd.s32 40, %v7460_v8 }
 0x56e   : > { %v2372_v48 = vadd.f32 %v2364_v42, %v2356_v56  ;;  %v2317_v62 = vpop.permute.xlu1 %2316  ;;  %v7564_v52 = vadd.s32 %v7469_v11, %v2390_v50  ;;  %v2393_v42 = vadd.s32 56, %v7460_v8  ;;  %v7682_v50 = vld [vmem:[#allocation4 + $0x30] sm:$0xff] }
 0x56f   : > { %v2342_v9 = vsub.f32 0.0, %v2317_v62  ;;  %vm2406_vm9 = vcmp.le.s32.totalorder %v7464_v24, %v7556_v49  ;;  %v7571_v56 = vadd.s32 %v7469_v11, %v2392_v53  ;;  %v7575_v45 = vadd.s32 %v7469_v11, %v2391_v55  ;;  %v7684_v53 = vld [vmem:[#allocation4 + $0x28] sm:$0xff] }
 0x570   : > { %v7504_v6 = vpack.c.bf16 %v2372_v48, %v2371_v58  ;;  %v2299_v39 = vpop.permute.xlu0 %2298  ;;  %vm2409_vm10 = vcmp.le.s32.totalorder %v7464_v24, %v7564_v52  ;;  %v7580_v58 = vadd.s32 %v7469_v11, %v2393_v42 }
 0x571   : > { %v2349_v10 = vsel %vm7476_vm6, %v2341_v2, %v2299_v39  ;;  %vm2411_vm11 = vcmp.le.s32.totalorder %v7464_v24, %v7571_v56  ;;  %vm2410_vm12 = vcmp.le.s32.totalorder %v7464_v24, %v7575_v45  ;;  %v7845_v45 = vld [vmem:[#allocation4 + $0x40] sm:$0xff] }
 0x572   : > { %v2365_v27 = vmul.f32 %v2349_v10, %v2286_v33  ;;  %4818 = vmatprep.subr.bf16.mxu1 %v7504_v6  ;;  %v2301_v51 = vpop.permute.xlu1 %2300  ;;  %vm2412_vm13 = vcmp.le.s32.totalorder %v7464_v24, %v7580_v58  ;;  %v7852_v58 = vld [vmem:[#allocation4 + $0x50] sm:$0xff] }
 0x573   : > { %v2350_v13 = vsel %vm7476_vm6, %v2342_v9, %v2301_v51  ;;  %4819 = vmatpush3.bf16.xpose.msra.mxu1 %v7504_v6 }
 0x574   : > { %v2366_v20 = vmul.f32 %v2350_v13, %v2287_v61  ;;  %v2319_v22 = vpop.permute.xlu0 %2318  ;;  %v2373_v23 = vadd.f32 %v2365_v27, %v2357_v14 }
 0x575   : > { %v2343_v28 = vsub.f32 0.0, %v2319_v22 }
 0x576   : > { %v2374_v26 = vadd.f32 %v2366_v20, %v2358_v19  ;;  %v2321_v25 = vpop.permute.xlu1 %2320 }
 0x577   : > { %v2344_v4 = vsub.f32 0.0, %v2321_v25 }
 0x578   : > { %v7518_v31 = vpack.c.bf16 %v2374_v26, %v2373_v23  ;;  %v2303_v32 = vpop.permute.xlu0 %2302 }
 0x579   : > { %v2351_v37 = vsel %vm7476_vm6, %v2343_v28, %v2303_v32  ;;  %v6145_v32 = vmov 0  }
 0x57a   : > { %v2367_v1 = vmul.f32 %v2351_v37, %v2288_v29  ;;  %4820 = vmatprep.subr.bf16.mxu1 %v7518_v31  ;;  %v2305_v30 = vpop.permute.xlu1 %2304  ;;  %5292 = vset.pattern.permute.xlu1 %v6145_v32 }
 0x57b   : > { %v2352_v54 = vsel %vm7476_vm6, %v2344_v4, %v2305_v30  ;;  %4821 = vmatpush3.bf16.xpose.msra.mxu1 %v7518_v31  ;;  %5293 = vset.pattern.permute.xlu0 %v6145_v32  ;;  %v7644_v4 = vld [vmem:[#allocation4 + $0x8] sm:$0xff] }
 0x57c   : > { %v2368_v63 = vmul.f32 %v2352_v54, %v2289_v38  ;;  %v2375_v16 = vadd.f32 %v2367_v1, %v2359_v57  ;;  %v7649_v1 = vld [vmem:[#allocation4 + $0x10] sm:$0xff] }
 0x57e   : > { %v2376_v17 = vadd.f32 %v2368_v63, %v2360_v60 }
 0x580   : > { %v7531_v40 = vpack.c.bf16 %v2376_v17, %v2375_v16  ;;  %v7667_v16 = vld [vmem:[#allocation4 + $0x18] sm:$0xff]  ;;  %v7669_v17 = vld [vmem:[#allocation4 + $0x20] sm:$0xff] }
 0x582   : > { %4822 = vmatprep.subr.bf16.mxu1 %v7531_v40 }
 0x583   : > { %4823 = vmatpush3.bf16.xpose.msra.mxu1 %v7531_v40 }
 0x584   : > { %4832 = vmatprep.subr.bf16.mxu1 %v7421_v59 }
 0x58a   : > { %4825 = vmatmul.mubr.bf16.vlgmr.msra.gmra.mrb[0].mxu1 %v2414_v43 }
 0x58b   : > { %4833 = vmatpush3.bf16.msra.mxu1 %v7421_v59  ;;  %4828 = vmatprep.mubr.bf16.mxu1 %v2415_v15 }
 0x58c   : > { %4834 = vmatprep.subr.bf16.mxu1 %v7430_v0 }
 0x58f   : > { %4835 = vmatpush3.bf16.msra.mxu1 %v7430_v0 }
 0x590   : > { %4836 = vmatprep.subr.bf16.mxu1 %v7442_v3 }
 0x592   : > { %4829 = vmatmul.mubr.bf16.gmra.mrb[4].mxu1 %v2416_v5 }
 0x593   : > { %4837 = vmatpush3.bf16.msra.mxu1 %v7442_v3 }
 0x594   : > { %4838 = vmatprep.subr.bf16.mxu1 %v7454_v18 }
 0x597   : > { %4839 = vmatpush3.bf16.msra.mxu1 %v7454_v18 }
 0x598   : > { %4848 = vmatprep.subr.bf16.mxu1 %v7490_v41 }
 0x65d   : > { %v4826_v48 = vpop.f32.mrb[0].mxu1 }
 0x65e   : > { %v2451_v62 = vpop.f32.mrb[1].mxu1  ;;  %v7596_v39 = vsel %vm2407_vm5, %v4826_v48, -1e+30 }
 0x65f   : > { %v7589_v8 = vsel %vm2405_vm7, %v2451_v62, -1e+30  ;;  %v4827_v2 = vpop.f32.mrb[2].mxu1  ;;  %v2505_v9 = vsel %vm2498_vm14, %v7596_v39, -inf }
 0x660   : > { %v2454_v33 = vpop.f32.mrb[3].mxu1  ;;  %v2499_v11 = vsel %vm2498_vm14, %v7589_v8, -inf  ;;  %v7610_v10 = vsel %vm2408_vm8, %v4827_v2, -1e+30 }
 0x661   : > { %v7601_v7 = vsel %vm2406_vm9, %v2454_v33, -1e+30  ;;  %2500 = vmax.xlane.f32.xlu0 %v2499_v11  ;;  %v2508_v19 = vsel %vm2498_vm14, %v7610_v10, -inf  ;;  %v7701_v11 = vld [vmem:[#allocation4 + $0x38] sm:$0xff] }
 0x662   : > { %v2502_v21 = vsel %vm2498_vm14, %v7601_v7, -inf }
 0x663   : > { %2503 = vmax.xlane.f32.xlu1 %v2502_v21 }
 0x665   : > { %2506 = vmax.xlane.f32.xlu0 %v2505_v9  ;;  %v4830_v61 = vpop.f32.mrb[4].mxu1  ;;  %v7902_v9 = vld [vmem:[#allocation4 + $0x78] sm:$0xff] }
 0x666   : > { %v2467_v27 = vpop.f32.mrb[5].mxu1  ;;  %v7615_v51 = vsel %vm2411_vm11, %v4830_v61, -1e+30 }
 0x667   : > { %v7620_v13 = vsel %vm2409_vm10, %v2467_v27, -1e+30  ;;  %v4831_v14 = vpop.f32.mrb[6].mxu1  ;;  %v2517_v26 = vsel %vm2498_vm14, %v7615_v51, -inf }
 0x668   : > { %v2511_v20 = vsel %vm2498_vm14, %v7620_v13, -inf  ;;  %v2470_v22 = vpop.f32.mrb[7].mxu1  ;;  %v7638_v28 = vsel %vm2412_vm13, %v4831_v14, -1e+30 }
 0x669   : > { %2509 = vmax.xlane.f32.xlu0 %v2508_v19  ;;  %2512 = vmax.xlane.f32.xlu1 %v2511_v20  ;;  %v7629_v23 = vsel %vm2410_vm12, %v2470_v22, -1e+30  ;;  %v2520_v29 = vsel %vm2498_vm14, %v7638_v28, -inf }
 0x66a   : > { %v2514_v25 = vsel %vm2498_vm14, %v7629_v23, -inf }
 0x66d   : > { %2518 = vmax.xlane.f32.xlu1 %v2517_v26  ;;  %2515 = vmax.xlane.f32.xlu0 %v2514_v25 }
 0x671   : > { %2521 = vmax.xlane.f32.xlu0 %v2520_v29 }
 0x6ee   : > { %v2501_v35 = vpop.xlane.xlu0 %2500 }
 0x6ef   : > { %v7647_v37 = vmax.f32 %v7642_v34, %v2501_v35 }
 0x6f0   : > { %v2504_v38 = vpop.xlane.xlu1 %2503 }
 0x6f1   : > { %v2531_v30 = vsub.f32 %v7642_v34, %v7647_v37  ;;  %2829 = vst.msk [vmem:[#allocation4] sm:$0xff] %vm2667_vm15, %v7647_v37  ;;  %v7656_v54 = vmax.f32 %v7644_v4, %v2504_v38  ;;  %2557 = vperm.xlu1 %5292, %v7647_v37  }
 0x6f2   : > { %v2507_v57 = vpop.xlane.xlu0 %2506 }
 0x6f3   : > { %v2532_v60 = vsub.f32 %v7644_v4, %v7656_v54  ;;  %2830 = vst.msk [vmem:[#allocation4 + $0x8] sm:$0xff] %vm2667_vm15, %v7656_v54  ;;  %v7664_v63 = vmax.f32 %v7649_v1, %v2507_v57  ;;  %2562 = vperm.xlu0 %5293, %v7656_v54  }
 0x6f5   : > { %v2533_v43 = vsub.f32 %v7649_v1, %v7664_v63  ;;  %2831 = vst.msk [vmem:[#allocation4 + $0x10] sm:$0xff] %vm2667_vm15, %v7664_v63  ;;  %2567 = vperm.xlu1 %5292, %v7664_v63  }
 0x6f6   : > { %v2510_v15 = vpop.xlane.xlu0 %2509  ;;  %v2513_v5 = vpop.xlane.xlu1 %2512 }
 0x6f7   : > { %v7677_v36 = vmax.f32 %v7667_v16, %v2510_v15  ;;  %v7680_v46 = vmax.f32 %v7669_v17, %v2513_v5 }
 0x6f9   : > { %v2534_v55 = vsub.f32 %v7667_v16, %v7677_v36  ;;  %2832 = vst.msk [vmem:[#allocation4 + $0x18] sm:$0xff] %vm2667_vm15, %v7677_v36  ;;  %2833 = vst.msk [vmem:[#allocation4 + $0x20] sm:$0xff] %vm2667_vm15, %v7680_v46  ;;  %2572 = vperm.xlu1 %5292, %v7677_v36  }
 0x6fa   : > { %v2519_v48 = vpop.xlane.xlu1 %2518  ;;  %v2516_v62 = vpop.xlane.xlu0 %2515 }
 0x6fb   : > { %v7696_v2 = vmax.f32 %v7682_v50, %v2519_v48  ;;  %v7699_v33 = vmax.f32 %v7684_v53, %v2516_v62 }
 0x6fd   : > { %2835 = vst.msk [vmem:[#allocation4 + $0x30] sm:$0xff] %vm2667_vm15, %v7696_v2  ;;  %2834 = vst.msk [vmem:[#allocation4 + $0x28] sm:$0xff] %vm2667_vm15, %v7699_v33  ;;  %2587 = vperm.xlu1 %5292, %v7696_v2   ;;  %v8695_v4 = vsub.f32 %v7682_v50, %v7696_v2  ;;  %v8696_v1 = vsub.f32 %v7684_v53, %v7699_v33 }
 0x6fe   : > { %v2522_v61 = vpop.xlane.xlu0 %2521 }
 0x6ff   : > { %v7713_v27 = vmax.f32 %v7701_v11, %v2522_v61  ;;  %v2551_v37 = vmul.f32 1.442695, %v8695_v4 }
 0x701   : > { %2836 = vst.msk [vmem:[#allocation4 + $0x38] sm:$0xff] %vm2667_vm15, %v7713_v27  ;;  %2577 = vperm.xlu1 %5292, %v7680_v46  }
 0x705   : > { %2582 = vperm.xlu1 %5292, %v7699_v33  }
 0x709   : > { %2592 = vperm.xlu1 %5292, %v7713_v27  }
 0x770   : > { %v2558_v19 = vpop.permute.xlu1 %2557 }
 0x771   : > { %v2595_v20 = vsub.f32 %v7589_v8, %v2558_v19 }
 0x772   : > { %v2563_v22 = vpop.permute.xlu0 %2562 }
 0x773   : > { %v2603_v26 = vmul.f32 1.442695, %v2595_v20  ;;  %v2596_v25 = vsub.f32 %v7601_v7, %v2563_v22 }
 0x774   : > { %v2568_v29 = vpop.permute.xlu1 %2567 }
 0x775   : > { %v2605_v32 = vmul.f32 1.442695, %v2596_v25  ;;  %v2597_v35 = vsub.f32 %v7596_v39, %v2568_v29  ;;  %5414 = vpow2.f32 %v2603_v26 }
 0x777   : > { %5416 = vpow2.f32 %v2605_v32  ;;  %v2607_v38 = vmul.f32 1.442695, %v2597_v35 }
 0x778   : > { %v2573_v57 = vpop.permute.xlu1 %2572 }
 0x779   : > { %v2598_v15 = vsub.f32 %v7610_v10, %v2573_v57  ;;  %5418 = vpow2.f32 %v2607_v38 }
 0x77b   : > { %v2609_v5 = vmul.f32 1.442695, %v2598_v15 }
 0x77c   : > { %v2588_v48 = vpop.permute.xlu1 %2587 }
 0x77d   : > { %5420 = vpow2.f32 %v2609_v5  ;;  %v2601_v19 = vsub.f32 %v7615_v51, %v2588_v48  ;;  %v2837_v48 = vld [vmem:[#allocation2 + $0x8] sm:$0xff] }
 0x77f   : > { %v7726_v62 = vpop.eup %5414 }
 0x780   : > { %v2578_v8 = vpop.permute.xlu1 %2577 }
 0x781   : > { %v7728_v61 = vpop.eup %5416  ;;  %v2599_v7 = vsub.f32 %v7620_v13, %v2578_v8  ;;  %v2615_v13 = vmul.f32 1.442695, %v2601_v19  ;;  %v2839_v8 = vld [vmem:[#allocation2 + $0x28] sm:$0xff] }
 0x782   : > { %v2732_v39 = vpack.c.bf16 %v7728_v61, %v7726_v62 }
 0x783   : > { %v2611_v20 = vmul.f32 1.442695, %v2599_v7  ;;  %v7736_v26 = vpop.eup %5418  ;;  %v2840_v7 = vld [vmem:[#allocation2 + $0x38] sm:$0xff] }
 0x784   : > { %v2583_v22 = vpop.permute.xlu1 %2582  ;;  %4840 = vmatprep.mubr.msk.bf16.mxu1 %vm2498_vm14, %v2732_v39 }
 0x785   : > { %v2600_v10 = vsub.f32 %v7629_v23, %v2583_v22  ;;  %5422 = vpow2.f32 %v2611_v20 }
 0x787   : > { %v7738_v25 = vpop.eup %5420  ;;  %v2613_v29 = vmul.f32 1.442695, %v2600_v10 }
 0x788   : > { %v2733_v32 = vpack.c.bf16 %v7738_v25, %v7736_v26  ;;  %v2593_v35 = vpop.permute.xlu1 %2592 }
 0x789   : > { %5424 = vpow2.f32 %v2613_v29  ;;  %v2602_v51 = vsub.f32 %v7638_v28, %v2593_v35 }
 0x78a   : > { %4841 = vmatmul.mubr.msk.bf16.vlgmr.msra.gmra.mrb[8].mxu1 %vm2498_vm14, %v2733_v32  ;;  %5426 = vpow2.f32 %v2615_v13 }
 0x78b   : > { %v2617_v38 = vmul.f32 1.442695, %v2602_v51  ;;  %4849 = vmatpush3.bf16.xpose.msra.mxu1 %v7490_v41 }
 0x78c   : > { %4850 = vmatprep.subr.bf16.mxu1 %v7504_v6 }
 0x78d   : > { %5428 = vpow2.f32 %v2617_v38 }
 0x78f   : > { %v7746_v23 = vpop.eup %5422 }
 0x793   : > { %v7748_v57 = vpop.eup %5424  ;;  %4851 = vmatpush3.bf16.xpose.msra.mxu1 %v7504_v6  ;;  %v2838_v6 = vld [vmem:[#allocation2 + $0x18] sm:$0xff] }
 0x794   : > { %4852 = vmatprep.subr.bf16.mxu1 %v7518_v31  ;;  %v2734_v28 = vpack.c.bf16 %v7748_v57, %v7746_v23  ;;  %v7754_v15 = vpop.eup %5426  ;;  %v2650_v42 = vsel %vm2498_vm14, %v7748_v57, 0.0  ;;  %v2545_v57 = vmul.f32 1.442695, %v2534_v55 }
 0x796   : > { %4844 = vmatprep.mubr.msk.bf16.mxu1 %vm2498_vm14, %v2734_v28 }
 0x797   : > { %v7757_v41 = vpop.eup %5428 }
 0x798   : > { %v2735_v5 = vpack.c.bf16 %v7757_v41, %v7754_v15 }
 0x79a   : > { %4845 = vmatmul.mubr.msk.bf16.gmra.mrb[12].mxu1 %vm2498_vm14, %v2735_v5 }
 0x79b   : > { %4853 = vmatpush3.bf16.xpose.msra.mxu1 %v7518_v31  ;;  %4856 = vmatprep.mubr.bf16.mxu1 %v2837_v48 }
 0x79c   : > { %4854 = vmatprep.subr.bf16.mxu1 %v7531_v40 }
 0x7a3   : > { %4855 = vmatpush3.bf16.xpose.msra.mxu1 %v7531_v40 }
 0x7a4   : > { %4864 = vmatprep.subr.bf16.mxu1 %v7421_v59 }
 0x7aa   : > { %4857 = vmatmul.mubr.bf16.vlgmr.msra.gmra.mrb[16].mxu1 %v2838_v6 }
 0x7ab   : > { %4865 = vmatpush3.bf16.msra.mxu1 %v7421_v59  ;;  %4860 = vmatprep.mubr.bf16.mxu1 %v2839_v8 }
 0x7ac   : > { %4866 = vmatprep.subr.bf16.mxu1 %v7430_v0 }
 0x7af   : > { %4867 = vmatpush3.bf16.msra.mxu1 %v7430_v0 }
 0x7b0   : > { %4868 = vmatprep.subr.bf16.mxu1 %v7442_v3 }
 0x7b2   : > { %4861 = vmatmul.mubr.bf16.gmra.mrb[20].mxu1 %v2840_v7 }
 0x7b3   : > { %4869 = vmatpush3.bf16.msra.mxu1 %v7442_v3 }
 0x7b4   : > { %4870 = vmatprep.subr.bf16.mxu1 %v7454_v18 }
 0x7b7   : > { %4871 = vmatpush3.bf16.msra.mxu1 %v7454_v18 }
 0x85d   : > { %v7773_v31 = vpop.f32.mrb[8].mxu1 }
 0x85e   : > { %v7775_v40 = vpop.f32.mrb[9].mxu1 }
 0x85f   : > { %v7777_v59 = vpop.f32.mrb[10].mxu1 }
 0x860   : > { %v7779_v39 = vpop.f32.mrb[11].mxu1 }
 0x86d   : > { %v7781_v19 = vpop.f32.mrb[12].mxu1 }
 0x86e   : > { %v7783_v0 = vpop.f32.mrb[13].mxu1 }
 0x86f   : > { %v7785_v20 = vpop.f32.mrb[14].mxu1 }
 0x870   : > { %v7787_v22 = vpop.f32.mrb[15].mxu1 }
 0x87d   : > { %v4858_v3 = vpop.f32.mrb[16].mxu1 }
 0x87e   : > { %v2875_v10 = vpop.f32.mrb[17].mxu1  ;;  %v7799_v35 = vsel %vm2407_vm5, %v4858_v3, -1e+30 }
 0x87f   : > { %v7792_v18 = vsel %vm2405_vm7, %v2875_v10, -1e+30  ;;  %v4859_v29 = vpop.f32.mrb[18].mxu1  ;;  %v2929_v12 = vsel %vm2498_vm14, %v7799_v35, -inf }
 0x880   : > { %v2878_v32 = vpop.f32.mrb[19].mxu1  ;;  %v2923_v13 = vsel %vm2498_vm14, %v7792_v18, -inf  ;;  %v7811_v38 = vsel %vm2408_vm8, %v4859_v29, -1e+30 }
 0x881   : > { %v7804_v51 = vsel %vm2406_vm9, %v2878_v32, -1e+30  ;;  %2924 = vmax.xlane.f32.xlu1 %v2923_v13  ;;  %v2932_v49 = vsel %vm2498_vm14, %v7811_v38, -inf  ;;  %v7847_v13 = vld [vmem:[#allocation4 + $0x48] sm:$0xff] }
 0x882   : > { %v2926_v44 = vsel %vm2498_vm14, %v7804_v51, -inf }
 0x883   : > { %2927 = vmax.xlane.f32.xlu0 %v2926_v44 }
 0x885   : > { %2930 = vmax.xlane.f32.xlu1 %v2929_v12  ;;  %v4862_v28 = vpop.f32.mrb[20].mxu1 }
 0x886   : > { %v2891_v5 = vpop.f32.mrb[21].mxu1  ;;  %v7827_v7 = vsel %vm2411_vm11, %v4862_v28, -1e+30 }
 0x887   : > { %v7820_v48 = vsel %vm2409_vm10, %v2891_v5, -1e+30  ;;  %2933 = vmax.xlane.f32.xlu0 %v2932_v49  ;;  %v4863_v6 = vpop.f32.mrb[22].mxu1  ;;  %v2941_v56 = vsel %vm2498_vm14, %v7827_v7, -inf  ;;  %v7862_v49 = vld [vmem:[#allocation4 + $0x58] sm:$0xff] }
 0x888   : > { %v2894_v47 = vpop.f32.mrb[23].mxu1  ;;  %v2935_v8 = vsel %vm2498_vm14, %v7820_v48, -inf  ;;  %v7839_v10 = vsel %vm2412_vm13, %v4863_v6, -1e+30  ;;  %v7891_v6 = vld [vmem:[#allocation4 + $0x70] sm:$0xff] }
 0x889   : > { %v7832_v3 = vsel %vm2410_vm12, %v2894_v47, -1e+30  ;;  %2936 = vmax.xlane.f32.xlu1 %v2935_v8  ;;  %v2944_v29 = vsel %vm2498_vm14, %v7839_v10, -inf }
 0x88a   : > { %v2938_v52 = vsel %vm2498_vm14, %v7832_v3, -inf }
 0x88b   : > { %2939 = vmax.xlane.f32.xlu0 %v2938_v52  ;;  %v7872_v52 = vld [vmem:[#allocation4 + $0x60] sm:$0xff] }
 0x88d   : > { %2942 = vmax.xlane.f32.xlu1 %v2941_v56 }
 0x88f   : > { %2945 = vmax.xlane.f32.xlu0 %v2944_v29 }
 0x90e   : > { %v2925_v32 = vpop.xlane.xlu1 %2924 }
 0x90f   : > { %v7850_v44 = vmax.f32 %v7845_v45, %v2925_v32 }
 0x910   : > { %v2928_v24 = vpop.xlane.xlu0 %2927 }
 0x911   : > { %3253 = vst.msk [vmem:[#allocation4 + $0x40] sm:$0xff] %vm2667_vm15, %v7850_v44  ;;  %v7859_v28 = vmax.f32 %v7847_v13, %v2928_v24  ;;  %2981 = vperm.xlu1 %5292, %v7850_v44   ;;  %v7882_v24 = vld [vmem:[#allocation4 + $0x68] sm:$0xff]  ;;  %v8700_v33 = vsub.f32 %v7845_v45, %v7850_v44 }
 0x912   : > { %v2931_v5 = vpop.xlane.xlu1 %2930 }
 0x913   : > { %3254 = vst.msk [vmem:[#allocation4 + $0x48] sm:$0xff] %vm2667_vm15, %v7859_v28  ;;  %v7869_v47 = vmax.f32 %v7852_v58, %v2931_v5  ;;  %2986 = vperm.xlu0 %5293, %v7859_v28   ;;  %v8698_v16 = vsub.f32 %v7847_v13, %v7859_v28 }
 0x914   : > { %v2934_v8 = vpop.xlane.xlu0 %2933 }
 0x915   : > { %3255 = vst.msk [vmem:[#allocation4 + $0x50] sm:$0xff] %vm2667_vm15, %v7869_v47  ;;  %v7879_v29 = vmax.f32 %v7862_v49, %v2934_v8  ;;  %2991 = vperm.xlu1 %5292, %v7869_v47  }
 0x916   : > { %v2937_v32 = vpop.xlane.xlu1 %2936 }
 0x917   : > { %3256 = vst.msk [vmem:[#allocation4 + $0x58] sm:$0xff] %vm2667_vm15, %v7879_v29  ;;  %v7889_v12 = vmax.f32 %v7872_v52, %v2937_v32  ;;  %v2638_v32 = vsel %vm2498_vm14, %v7728_v61, 0.0  ;;  %v2539_v61 = vmul.f32 1.442695, %v2531_v30  ;;  %v2549_v30 = vmul.f32 1.442695, %v8696_v1 }
 0x918   : > { %v2940_v56 = vpop.xlane.xlu0 %2939  ;;  %v8701_v13 = vsub.f32 %v7862_v49, %v7879_v29 }
 0x919   : > { %v2959_v8 = vsub.f32 %v7872_v52, %v7889_v12  ;;  %3257 = vst.msk [vmem:[#allocation4 + $0x60] sm:$0xff] %vm2667_vm15, %v7889_v12  ;;  %v7898_v14 = vmax.f32 %v7882_v24, %v2940_v56  ;;  %2996 = vperm.xlu1 %5292, %v7879_v29   ;;  %3001 = vperm.xlu0 %5293, %v7889_v12   ;;  %v2644_v56 = vsel %vm2498_vm14, %v7738_v25, 0.0  ;;  %v2653_v25 = vsel %vm2498_vm14, %v7754_v15, 0.0 }
 0x91a   : > { %v2943_v5 = vpop.xlane.xlu1 %2942  ;;  %5430 = vpow2.f32 %v2539_v61  ;;  %v8694_v15 = vsub.f32 %v7669_v17, %v7680_v46  ;;  %v2965_v17 = vmul.f32 1.442695, %v8698_v16  ;;  %v8699_v46 = vsub.f32 %v7852_v58, %v7869_v47 }
 0x91b   : > { %3258 = vst.msk [vmem:[#allocation4 + $0x68] sm:$0xff] %vm2667_vm15, %v7898_v14  ;;  %v7909_v52 = vmax.f32 %v7891_v6, %v2943_v5  ;;  %v2635_v5 = vsel %vm2498_vm14, %v7726_v62, 0.0  ;;  %v2647_v62 = vsel %vm2498_vm14, %v7746_v23, 0.0  ;;  %v2543_v23 = vmul.f32 1.442695, %v2533_v43 }
 0x91c   : > { %v2946_v21 = vpop.xlane.xlu0 %2945  ;;  %v2547_v34 = vmul.f32 1.442695, %v8694_v15  ;;  %v2967_v50 = vmul.f32 1.442695, %v8699_v46  ;;  %v2971_v53 = vmul.f32 1.442695, %v2959_v8  ;;  %v8702_v45 = vsub.f32 %v7882_v24, %v7898_v14 }
 0x91d   : > { %3259 = vst.msk [vmem:[#allocation4 + $0x70] sm:$0xff] %vm2667_vm15, %v7909_v52  ;;  %v7916_v12 = vmax.f32 %v7902_v9, %v2946_v21  ;;  %3011 = vperm.xlu0 %5293, %v7909_v52   ;;  %3006 = vperm.xlu1 %5292, %v7898_v14   ;;  %v2641_v21 = vsel %vm2498_vm14, %v7736_v26, 0.0  ;;  %v2656_v26 = vsel %vm2498_vm14, %v7757_v41, 0.0  ;;  %v2969_v58 = vmul.f32 1.442695, %v8701_v13 }
 0x91e   : > { %v2973_v44 = vmul.f32 1.442695, %v8702_v45 }
 0x91f   : > { %3260 = vst.msk [vmem:[#allocation4 + $0x78] sm:$0xff] %vm2667_vm15, %v7916_v12 }
 0x921   : > { %3016 = vperm.xlu1 %5292, %v7916_v12  }
 0x924   : > { %v7962_v54 = vpop.eup %5430 }
 0x93c   : > { %2636 = vadd.xlane.f32.xlu0 %v2635_v5 }
 0x940   : > { %2642 = vadd.xlane.f32.xlu0 %v2641_v21 }
 0x944   : > { %2645 = vadd.xlane.f32.xlu0 %v2644_v56 }
 0x945   : > { %2639 = vadd.xlane.f32.xlu1 %v2638_v32 }
 0x948   : > { %2651 = vadd.xlane.f32.xlu0 %v2650_v42  ;;  %v2541_v42 = vmul.f32 1.442695, %v2532_v60  ;;  %v8697_v60 = vsub.f32 %v7701_v11, %v7713_v27  ;;  %v2963_v11 = vmul.f32 1.442695, %v8700_v33 }
 0x949   : > { %2648 = vadd.xlane.f32.xlu1 %v2647_v62 }
 0x94a   : > { %5432 = vpow2.f32 %v2541_v42  ;;  %v2553_v63 = vmul.f32 1.442695, %v8697_v60 }
 0x94b   : > { %5434 = vpow2.f32 %v2543_v23 }
 0x94c   : > { %2657 = vadd.xlane.f32.xlu0 %v2656_v26  ;;  %5436 = vpow2.f32 %v2545_v57 }
 0x94d   : > { %2654 = vadd.xlane.f32.xlu1 %v2653_v25  ;;  %5438 = vpow2.f32 %v2547_v34 }
 0x94e   : > { %5440 = vpow2.f32 %v2551_v37 }
 0x94f   : > { %5442 = vpow2.f32 %v2549_v30 }
 0x950   : > { %5444 = vpow2.f32 %v2553_v63 }
 0x951   : > { %5446 = vpow2.f32 %v2965_v17 }
 0x952   : > { %5448 = vpow2.f32 %v2967_v50 }
 0x953   : > { %5450 = vpow2.f32 %v2971_v53 }
 0x954   : > { %v7971_v43 = vpop.eup %5432  ;;  %5452 = vpow2.f32 %v2963_v11 }
 0x955   : > { %v7973_v36 = vpop.eup %5434  ;;  %5454 = vpow2.f32 %v2969_v58 }
 0x956   : > { %v7980_v55 = vpop.eup %5436  ;;  %5456 = vpow2.f32 %v2973_v44 }
 0x957   : > { %v7982_v2 = vpop.eup %5438 }
 0x958   : > { %v7989_v27 = vpop.eup %5440 }
 0x959   : > { %v7991_v41 = vpop.eup %5442 }
 0x95a   : > { %v7998_v28 = vpop.eup %5444 }
 0x95b   : > { %v8000_v47 = vpop.eup %5446 }
 0x95c   : > { %v8007_v8 = vpop.eup %5448 }
 0x95d   : > { %v8009_v32 = vpop.eup %5450 }
 0x95e   : > { %2686 = vperm.xlu1 %5292, %v7962_v54   ;;  %v8013_v49 = vpop.eup %5452 }
 0x95f   : > { %v8016_v29 = vpop.eup %5454 }
 0x960   : > { %v8019_v56 = vpop.eup %5456 }
 0x962   : > { %2691 = vperm.xlu0 %5293, %v7971_v43   ;;  %2696 = vperm.xlu1 %5292, %v7973_v36  }
 0x966   : > { %2706 = vperm.xlu0 %5293, %v7982_v2   ;;  %2701 = vperm.xlu1 %5292, %v7980_v55  }
 0x96a   : > { %2716 = vperm.xlu0 %5293, %v7989_v27   ;;  %2711 = vperm.xlu1 %5292, %v7991_v41  }
 0x96e   : > { %3115 = vperm.xlu0 %5293, %v8000_v47   ;;  %2721 = vperm.xlu1 %5292, %v7998_v28  }
 0x972   : > { %3130 = vperm.xlu0 %5293, %v8009_v32   ;;  %3120 = vperm.xlu1 %5292, %v8007_v8  }
 0x976   : > { %3110 = vperm.xlu1 %5292, %v8013_v49  }
 0x97a   : > { %3125 = vperm.xlu1 %5292, %v8016_v29  }
 0x97e   : > { %3135 = vperm.xlu1 %5292, %v8019_v56  }
 0x990   : > { %v2982_v14 = vpop.permute.xlu1 %2981 }
 0x991   : > { %v3019_v24 = vsub.f32 %v7792_v18, %v2982_v14 }
 0x992   : > { %v2987_v5 = vpop.permute.xlu0 %2986 }
 0x993   : > { %v3027_v21 = vmul.f32 1.442695, %v3019_v24  ;;  %v3020_v62 = vsub.f32 %v7804_v51, %v2987_v5 }
 0x994   : > { %v2992_v26 = vpop.permute.xlu1 %2991 }
 0x995   : > { %v3029_v25 = vmul.f32 1.442695, %v3020_v62  ;;  %v3021_v61 = vsub.f32 %v7799_v35, %v2992_v26  ;;  %5458 = vpow2.f32 %v3027_v21  ;;  %v8703_v26 = vsub.f32 %v7902_v9, %v7916_v12 }
 0x997   : > { %5460 = vpow2.f32 %v3029_v25  ;;  %v3031_v42 = vmul.f32 1.442695, %v3021_v61  ;;  %v2977_v25 = vmul.f32 1.442695, %v8703_v26 }
 0x998   : > { %v2997_v23 = vpop.permute.xlu1 %2996  ;;  %v3002_v57 = vpop.permute.xlu0 %3001 }
 0x999   : > { %5462 = vpow2.f32 %v3031_v42  ;;  %v3022_v15 = vsub.f32 %v7811_v38, %v2997_v23  ;;  %v3023_v34 = vsub.f32 %v7820_v48, %v3002_v57  ;;  %v8704_v42 = vsub.f32 %v7891_v6, %v7909_v52 }
 0x99b   : > { %v3033_v4 = vmul.f32 1.442695, %v3022_v15  ;;  %v3035_v18 = vmul.f32 1.442695, %v3023_v34  ;;  %v2975_v23 = vmul.f32 1.442695, %v8704_v42 }
 0x99c   : > { %v3007_v37 = vpop.permute.xlu1 %3006  ;;  %v3012_v1 = vpop.permute.xlu0 %3011  ;;  %v2619_v15 = vld [vmem:[#allocation5] sm:$0xff] }
 0x99d   : > { %5464 = vpow2.f32 %v3033_v4  ;;  %v3024_v51 = vsub.f32 %v7832_v3, %v3007_v37  ;;  %v3025_v30 = vsub.f32 %v7827_v7, %v3012_v1  ;;  %v2627_v34 = vmul.f32 %v7962_v54, %v2619_v15  ;;  %v2622_v37 = vld [vmem:[#allocation5 + $0x18] sm:$0xff] }
 0x99e   : > { %5466 = vpow2.f32 %v3035_v18  ;;  %v2621_v18 = vld [vmem:[#allocation5 + $0x10] sm:$0xff] }
 0x99f   : > { %v3037_v35 = vmul.f32 1.442695, %v3024_v51  ;;  %v3039_v60 = vmul.f32 1.442695, %v3025_v30  ;;  %v5459_v63 = vpop.eup %5458  ;;  %v2629_v6 = vmul.f32 %v7973_v36, %v2621_v18  ;;  %v2620_v51 = vld [vmem:[#allocation5 + $0x8] sm:$0xff]  ;;  %v2630_v30 = vmul.f32 %v7980_v55, %v2622_v37  ;;  %v2681_v18 = vld [vmem:[#allocation3 + $0x50] sm:$0xff] }
 0x9a0   : > { %v3017_v16 = vpop.permute.xlu1 %3016  ;;  %v3060_v11 = vsel %vm2498_vm14, %v5459_v63, 0.0 }
 0x9a1   : > { %v5461_v17 = vpop.eup %5460  ;;  %5468 = vpow2.f32 %v3037_v35  ;;  %v3026_v38 = vsub.f32 %v7839_v10, %v3017_v16  ;;  %v2628_v35 = vmul.f32 %v7971_v43, %v2620_v51 }
 0x9a2   : > { %5470 = vpow2.f32 %v3039_v60  ;;  %v3063_v48 = vsel %vm2498_vm14, %v5461_v17, 0.0  ;;  %v3156_v46 = vpack.c.bf16 %v5461_v17, %v5459_v63  ;;  %v2624_v60 = vld [vmem:[#allocation5 + $0x28] sm:$0xff]  ;;  %v2623_v17 = vld [vmem:[#allocation5 + $0x20] sm:$0xff] }
 0x9a3   : > { %v5463_v50 = vpop.eup %5462  ;;  %v3041_v53 = vmul.f32 1.442695, %v3026_v38  ;;  %3064 = vadd.xlane.f32.xlu1 %v3063_v48  ;;  %v2632_v36 = vmul.f32 %v7991_v41, %v2624_v60 }
 0x9a4   : > { %4872 = vmatprep.mubr.msk.bf16.mxu1 %vm2498_vm14, %v3156_v46  ;;  %v3066_v7 = vsel %vm2498_vm14, %v5463_v50, 0.0  ;;  %v2631_v46 = vmul.f32 %v7982_v2, %v2623_v17  ;;  %v2676_v2 = vld [vmem:[#allocation3] sm:$0xff]  ;;  %v3045_v17 = vld [vmem:[#allocation5 + $0x48] sm:$0xff] }
 0x9a5   : > { %5472 = vpow2.f32 %v3041_v53  ;;  %3067 = vadd.xlane.f32.xlu0 %v3066_v7  ;;  %v2625_v7 = vld [vmem:[#allocation5 + $0x30] sm:$0xff] }
 0x9a6   : > { %5474 = vpow2.f32 %v2977_v25  ;;  %v2679_v25 = vld [vmem:[#allocation3 + $0x30] sm:$0xff] }
 0x9a7   : > { %v5465_v3 = vpop.eup %5464  ;;  %5476 = vpow2.f32 %v2975_v23 }
 0x9a8   : > { %v3157_v33 = vpack.c.bf16 %v5465_v3, %v5463_v50  ;;  %v5467_v13 = vpop.eup %5466  ;;  %v3069_v45 = vsel %vm2498_vm14, %v5465_v3, 0.0  ;;  %v2626_v50 = vld [vmem:[#allocation5 + $0x38] sm:$0xff] }
 0x9a9   : > { %3061 = vadd.xlane.f32.xlu0 %v3060_v11  ;;  %v3072_v62 = vsel %vm2498_vm14, %v5467_v13, 0.0  ;;  %v2634_v43 = vmul.f32 %v7998_v28, %v2626_v50  ;;  %v2633_v11 = vmul.f32 %v7989_v27, %v2625_v7  ;;  %v2680_v27 = vld [vmem:[#allocation3 + $0x40] sm:$0xff] }
 0x9aa   : > { %4873 = vmatmul.mubr.msk.bf16.vlgmr.msra.gmra.mrb[24].mxu1 %vm2498_vm14, %v3157_v33 }
 0x9ab   : > { %v5469_v10 = vpop.eup %5468 }
 0x9ac   : > { %v5471_v58 = vpop.eup %5470  ;;  %v3158_v44 = vpack.c.bf16 %v5469_v10, %v5467_v13  ;;  %v3075_v61 = vsel %vm2498_vm14, %v5469_v10, 0.0 }
 0x9ad   : > { %3070 = vadd.xlane.f32.xlu0 %v3069_v45  ;;  %v3078_v14 = vsel %vm2498_vm14, %v5471_v58, 0.0 }
 0x9ae   : > { %3079 = vadd.xlane.f32.xlu1 %v3078_v14  ;;  %4876 = vmatprep.mubr.msk.bf16.mxu1 %vm2498_vm14, %v3158_v44  ;;  %v2677_v44 = vld [vmem:[#allocation3 + $0x10] sm:$0xff]  ;;  %v2678_v14 = vld [vmem:[#allocation3 + $0x20] sm:$0xff] }
 0x9af   : > { %v5473_v24 = vpop.eup %5472 }
 0x9b0   : > { %v3081_v5 = vsel %vm2498_vm14, %v5473_v24, 0.0  ;;  %v3159_v21 = vpack.c.bf16 %v5473_v24, %v5471_v58  ;;  %v8048_v57 = vpop.eup %5474 }
 0x9b1   : > { %3082 = vadd.xlane.f32.xlu0 %v3081_v5  ;;  %v8052_v9 = vpop.eup %5476 }
 0x9b2   : > { %3073 = vadd.xlane.f32.xlu1 %v3072_v62  ;;  %4877 = vmatmul.mubr.msk.bf16.gmra.mrb[28].mxu1 %vm2498_vm14, %v3159_v21 }
 0x9b5   : > { %3076 = vadd.xlane.f32.xlu0 %v3075_v61 }
 0x9c3   : > { %3145 = vperm.xlu1 %5292, %v8048_v57  }
 0x9c9   : > { %v2637_v4 = vpop.xlane.xlu0 %2636 }
 0x9ca   : > { %v2659_v12 = vadd.f32 %v2637_v4, %v2627_v34  ;;  %v2682_v4 = vld [vmem:[#allocation3 + $0x60] sm:$0xff] }
 0x9cb   : > { %3140 = vperm.xlu0 %5293, %v8052_v9  }
 0x9cc   : > { %2668 = vst.msk [vmem:[#allocation5] sm:$0xff] %vm2667_vm15, %v2659_v12 }
 0x9cd   : > { %v2643_v52 = vpop.xlane.xlu0 %2642 }
 0x9ce   : > { %v2661_v1 = vadd.f32 %v2643_v52, %v2629_v6 }
 0x9d0   : > { %2670 = vst.msk [vmem:[#allocation5 + $0x10] sm:$0xff] %vm2667_vm15, %v2661_v1  ;;  %v2683_v1 = vld [vmem:[#allocation3 + $0x70] sm:$0xff] }
 0x9d1   : > { %v2646_v54 = vpop.xlane.xlu0 %2645 }
 0x9d2   : > { %v2662_v63 = vadd.f32 %v2646_v54, %v2630_v30  ;;  %v2640_v16 = vpop.xlane.xlu1 %2639 }
 0x9d3   : > { %v2660_v38 = vadd.f32 %v2640_v16, %v2628_v35 }
 0x9d4   : > { %2671 = vst.msk [vmem:[#allocation5 + $0x18] sm:$0xff] %vm2667_vm15, %v2662_v63 }
 0x9d5   : > { %2669 = vst.msk [vmem:[#allocation5 + $0x8] sm:$0xff] %vm2667_vm15, %v2660_v38  ;;  %v2652_v48 = vpop.xlane.xlu0 %2651 }
 0x9d6   : > { %v2664_v53 = vadd.f32 %v2652_v48, %v2632_v36  ;;  %v2649_v55 = vpop.xlane.xlu1 %2648  ;;  %v3053_v36 = vmul.f32 %v8000_v47, %v3045_v17 }
 0x9d7   : > { %v2663_v3 = vadd.f32 %v2649_v55, %v2631_v46 }
 0x9d8   : > { %2673 = vst.msk [vmem:[#allocation5 + $0x28] sm:$0xff] %vm2667_vm15, %v2664_v53  ;;  %v3044_v53 = vld [vmem:[#allocation5 + $0x40] sm:$0xff] }
 0x9d9   : > { %2672 = vst.msk [vmem:[#allocation5 + $0x20] sm:$0xff] %vm2667_vm15, %v2663_v3  ;;  %v2658_v33 = vpop.xlane.xlu0 %2657  ;;  %v3052_v55 = vmul.f32 %v8013_v49, %v3044_v53  ;;  %v3047_v3 = vld [vmem:[#allocation5 + $0x58] sm:$0xff] }
 0x9da   : > { %v2666_v41 = vadd.f32 %v2658_v33, %v2634_v43  ;;  %v2655_v13 = vpop.xlane.xlu1 %2654  ;;  %v3050_v33 = vld [vmem:[#allocation5 + $0x70] sm:$0xff]  ;;  %v3055_v47 = vmul.f32 %v8016_v29, %v3047_v3 }
 0x9db   : > { %v2665_v10 = vadd.f32 %v2655_v13, %v2633_v11  ;;  %v3058_v11 = vmul.f32 %v8052_v9, %v3050_v33 }
 0x9dc   : > { %2675 = vst.msk [vmem:[#allocation5 + $0x38] sm:$0xff] %vm2667_vm15, %v2666_v41  ;;  %v3051_v41 = vld [vmem:[#allocation5 + $0x78] sm:$0xff] }
 0x9dd   : > { %2674 = vst.msk [vmem:[#allocation5 + $0x30] sm:$0xff] %vm2667_vm15, %v2665_v10  ;;  %v3059_v49 = vmul.f32 %v8048_v57, %v3051_v41  ;;  %v3102_v57 = vld [vmem:[#allocation3 + $0x28] sm:$0xff] }
 0x9de   : > { %v2687_v58 = vpop.permute.xlu1 %2686 }
 0x9df   : > { %v2724_v45 = vmul.f32 %v2687_v58, %v2676_v2  ;;  %v3048_v2 = vld [vmem:[#allocation5 + $0x60] sm:$0xff] }
 0x9e1   : > { %v2813_v24 = vadd.f32 %v7775_v40, %v2724_v45  ;;  %v2692_v28 = vpop.permute.xlu0 %2691  ;;  %v3056_v45 = vmul.f32 %v8009_v32, %v3048_v2 }
 0x9e2   : > { %v2725_v5 = vmul.f32 %v2692_v28, %v2677_v44  ;;  %v2697_v21 = vpop.permute.xlu1 %2696 }
 0x9e3   : > { %2821 = vst [vmem:[#allocation3] sm:$0xff] %v2813_v24  ;;  %v2726_v62 = vmul.f32 %v2697_v21, %v2678_v14  ;;  %v3049_v14 = vld [vmem:[#allocation5 + $0x68] sm:$0xff] }
 0x9e4   : > { %v2814_v26 = vadd.f32 %v7779_v39, %v2725_v5  ;;  %v3057_v9 = vmul.f32 %v8019_v56, %v3049_v14 }
 0x9e5   : > { %v2815_v61 = vadd.f32 %v7773_v31, %v2726_v62  ;;  %v2707_v42 = vpop.permute.xlu0 %2706  ;;  %v3100_v62 = vld [vmem:[#allocation3 + $0x8] sm:$0xff] }
 0x9e6   : > { %2822 = vst [vmem:[#allocation3 + $0x10] sm:$0xff] %v2814_v26  ;;  %v2728_v23 = vmul.f32 %v2707_v42, %v2680_v27  ;;  %v2702_v15 = vpop.permute.xlu1 %2701  ;;  %v3103_v27 = vld [vmem:[#allocation3 + $0x38] sm:$0xff] }
 0x9e7   : > { %2823 = vst [vmem:[#allocation3 + $0x20] sm:$0xff] %v2815_v61  ;;  %v2727_v34 = vmul.f32 %v2702_v15, %v2679_v25  ;;  %v3101_v26 = vld [vmem:[#allocation3 + $0x18] sm:$0xff] }
 0x9e8   : > { %v2817_v40 = vadd.f32 %v7783_v0, %v2728_v23 }
 0x9e9   : > { %v2816_v12 = vadd.f32 %v7777_v59, %v2727_v34  ;;  %v2717_v6 = vpop.permute.xlu0 %2716 }
 0x9ea   : > { %2825 = vst [vmem:[#allocation3 + $0x40] sm:$0xff] %v2817_v40  ;;  %v2730_v52 = vmul.f32 %v2717_v6, %v2682_v4  ;;  %v2712_v37 = vpop.permute.xlu1 %2711 }
 0x9eb   : > { %2824 = vst [vmem:[#allocation3 + $0x30] sm:$0xff] %v2816_v12  ;;  %v2729_v39 = vmul.f32 %v2712_v37, %v2681_v18  ;;  %v3106_v12 = vld [vmem:[#allocation3 + $0x68] sm:$0xff] }
 0x9ec   : > { %v2819_v31 = vadd.f32 %v7781_v19, %v2730_v52  ;;  %v3046_v19 = vld [vmem:[#allocation5 + $0x50] sm:$0xff]  ;;  %v3104_v37 = vld [vmem:[#allocation3 + $0x48] sm:$0xff] }
 0x9ed   : > { %v2818_v51 = vadd.f32 %v7787_v22, %v2729_v39  ;;  %v3116_v63 = vpop.permute.xlu0 %3115  ;;  %v3054_v46 = vmul.f32 %v8007_v8, %v3046_v19  ;;  %v3107_v39 = vld [vmem:[#allocation3 + $0x78] sm:$0xff] }
 0x9ee   : > { %2827 = vst [vmem:[#allocation3 + $0x60] sm:$0xff] %v2819_v31  ;;  %v2722_v30 = vpop.permute.xlu1 %2721  ;;  %v3149_v34 = vmul.f32 %v3116_v63, %v3101_v26 }
 0x9ef   : > { %2826 = vst [vmem:[#allocation3 + $0x50] sm:$0xff] %v2818_v51  ;;  %v2731_v54 = vmul.f32 %v2722_v30, %v2683_v1  ;;  %v3105_v1 = vld [vmem:[#allocation3 + $0x58] sm:$0xff] }
 0x9f1   : > { %v2820_v0 = vadd.f32 %v7785_v20, %v2731_v54  ;;  %v8080_v38 = vpop.permute.xlu0 %3130 }
 0x9f2   : > { %v3121_v35 = vpop.permute.xlu1 %3120  ;;  %v3152_v30 = vmul.f32 %v8080_v38, %v3104_v37 }
 0x9f3   : > { %2828 = vst [vmem:[#allocation3 + $0x70] sm:$0xff] %v2820_v0  ;;  %v3150_v32 = vmul.f32 %v3121_v35, %v3102_v57 }
 0x9f6   : > { %v3111_v59 = vpop.permute.xlu1 %3110 }
 0x9f7   : > { %v3148_v25 = vmul.f32 %v3111_v59, %v3100_v62 }
 0x9fa   : > { %v3126_v60 = vpop.permute.xlu1 %3125 }
 0x9fb   : > { %v3151_v42 = vmul.f32 %v3126_v60, %v3103_v27 }
 0x9fe   : > { %v8078_v16 = vpop.permute.xlu1 %3135 }
 0x9ff   : > { %v3153_v60 = vmul.f32 %v8078_v16, %v3105_v1 }
 0xa30   : > { %v3065_v22 = vpop.xlane.xlu1 %3064 }
 0xa31   : > { %v3085_v48 = vadd.f32 %v3065_v22, %v3053_v36 }
 0xa32   : > { %v3068_v50 = vpop.xlane.xlu0 %3067 }
 0xa33   : > { %3093 = vst.msk [vmem:[#allocation5 + $0x48] sm:$0xff] %vm2667_vm15, %v3085_v48  ;;  %v3086_v20 = vadd.f32 %v3068_v50, %v3054_v46 }
 0xa35   : > { %3094 = vst.msk [vmem:[#allocation5 + $0x50] sm:$0xff] %vm2667_vm15, %v3086_v20 }
 0xa36   : > { %v3062_v7 = vpop.xlane.xlu0 %3061 }
 0xa37   : > { %v3084_v43 = vadd.f32 %v3062_v7, %v3052_v55 }
 0xa39   : > { %3092 = vst.msk [vmem:[#allocation5 + $0x40] sm:$0xff] %vm2667_vm15, %v3084_v43 }
 0xa3a   : > { %v3071_v8 = vpop.xlane.xlu0 %3070 }
 0xa3b   : > { %v3080_v13 = vpop.xlane.xlu1 %3079  ;;  %v3087_v10 = vadd.f32 %v3071_v8, %v3055_v47 }
 0xa3c   : > { %v3090_v58 = vadd.f32 %v3080_v13, %v3058_v11 }
 0xa3d   : > { %3095 = vst.msk [vmem:[#allocation5 + $0x58] sm:$0xff] %vm2667_vm15, %v3087_v10 }
 0xa3e   : > { %3098 = vst.msk [vmem:[#allocation5 + $0x70] sm:$0xff] %vm2667_vm15, %v3090_v58  ;;  %v3083_v44 = vpop.xlane.xlu0 %3082 }
 0xa3f   : > { %v3074_v24 = vpop.xlane.xlu1 %3073  ;;  %v3091_v29 = vadd.f32 %v3083_v44, %v3059_v49 }
 0xa40   : > { %v3088_v28 = vadd.f32 %v3074_v24, %v3056_v45 }
 0xa41   : > { %3099 = vst.msk [vmem:[#allocation5 + $0x78] sm:$0xff] %vm2667_vm15, %v3091_v29 }
 0xa42   : > { %3096 = vst.msk [vmem:[#allocation5 + $0x60] sm:$0xff] %vm2667_vm15, %v3088_v28  ;;  %v3077_v5 = vpop.xlane.xlu0 %3076 }
 0xa43   : > { %v3089_v21 = vadd.f32 %v3077_v5, %v3057_v9  ;;  %v3146_v31 = vpop.permute.xlu1 %3145 }
 0xa44   : > { %v3155_v0 = vmul.f32 %v3146_v31, %v3107_v39 }
 0xa45   : > { %3097 = vst.msk [vmem:[#allocation5 + $0x68] sm:$0xff] %vm2667_vm15, %v3089_v21 }
 0xa4a   : > { %v3141_v6 = vpop.permute.xlu0 %3140 }
 0xa4b   : > { %v3154_v51 = vmul.f32 %v3141_v6, %v3106_v12 }
 0xa7d   : > { %v4874_v61 = vpop.f32.mrb[24].mxu1 }
 0xa7e   : > { %v3239_v23 = vadd.f32 %v4874_v61, %v3150_v32  ;;  %v3206_v15 = vpop.f32.mrb[25].mxu1 }
 0xa7f   : > { %v3237_v4 = vadd.f32 %v3206_v15, %v3148_v25  ;;  %v4875_v40 = vpop.f32.mrb[26].mxu1 }
 0xa80   : > { %3247 = vst [vmem:[#allocation3 + $0x28] sm:$0xff] %v3239_v23  ;;  %v3240_v56 = vadd.f32 %v4875_v40, %v3151_v42  ;;  %v3209_v18 = vpop.f32.mrb[27].mxu1 }
 0xa81   : > { %3245 = vst [vmem:[#allocation3 + $0x8] sm:$0xff] %v3237_v4  ;;  %v3238_v52 = vadd.f32 %v3209_v18, %v3149_v34 }
 0xa82   : > { %3248 = vst [vmem:[#allocation3 + $0x38] sm:$0xff] %v3240_v56 }
 0xa83   : > { %3246 = vst [vmem:[#allocation3 + $0x18] sm:$0xff] %v3238_v52 }
 0xa85   : > { %v4878_v54 = vpop.f32.mrb[28].mxu1 }
 0xa86   : > { %v3243_v35 = vadd.f32 %v4878_v54, %v3154_v51  ;;  %v3222_v59 = vpop.f32.mrb[29].mxu1 }
 0xa87   : > { %v3241_v63 = vadd.f32 %v3222_v59, %v3152_v30  ;;  %v4879_v17 = vpop.f32.mrb[30].mxu1 }
 0xa88   : > { %3251 = vst [vmem:[#allocation3 + $0x68] sm:$0xff] %v3243_v35  ;;  %v3244_v19 = vadd.f32 %v4879_v17, %v3155_v0  ;;  %v3225_v36 = vpop.f32.mrb[31].mxu1 }
 0xa89   : > { %3249 = vst [vmem:[#allocation3 + $0x48] sm:$0xff] %v3241_v63  ;;  %v3242_v22 = vadd.f32 %v3225_v36, %v3153_v60 }
 0xa8a   : > { %3252 = vst [vmem:[#allocation3 + $0x78] sm:$0xff] %v3244_v19 }
 0xa8b   : > { %3250 = vst [vmem:[#allocation3 + $0x58] sm:$0xff] %v3242_v22 }
 0xa8c PF: > { %s8705_s18 = sld [smem:[#allocation42_spill]] }
 0xa92   : > { %p4697_p11 = scmp.ne.s32.totalorder %s8705_s18, 1 }
 0xa93   : > { %v3273_v38 = vld [vmem:[#allocation5 + $0x40] sm:$0xff] (!%p4697_p11)  ;;  %v3274_v46 = vld [vmem:[#allocation5 + $0x48] sm:$0xff] (!%p4697_p11)  ;;  %v6146_v16 = vmov (!%p4697_p11), 0   ;;  %v3275_v53 = vld [vmem:[#allocation5 + $0x50] sm:$0xff] (!%p4697_p11) }
 0xa94   : > { %3264 = sbr.rel (%p4697_p11) target bundleno = 3146 (0xc4a), region = 104  ;;  %v3265_v48 = vld [vmem:[#allocation5] sm:$0xff] (!%p4697_p11)  ;;  %5479 = vset.pattern.permute.xlu1 (!%p4697_p11), %v6146_v16  ;;  %5478 = vset.pattern.permute.xlu0 (!%p4697_p11), %v6146_v16  ;;  %5576 = vrcp.f32 (!%p4697_p11), %v3273_v38  ;;  %v3266_v50 = vld [vmem:[#allocation5 + $0x8] sm:$0xff] (!%p4697_p11)  ;;  %v3276_v20 = vld [vmem:[#allocation5 + $0x58] sm:$0xff] (!%p4697_p11) }
 0xa95   : > { %5578 = vrcp.f32 (!%p4697_p11), %v3265_v48  ;;  %v3267_v55 = vld [vmem:[#allocation5 + $0x10] sm:$0xff] (!%p4697_p11)  ;;  %v3268_v3 = vld [vmem:[#allocation5 + $0x18] sm:$0xff] (!%p4697_p11)  ;;  %v3277_v41 = vld [vmem:[#allocation5 + $0x60] sm:$0xff] (!%p4697_p11) }
 0xa96   : > { %5580 = vrcp.f32 (!%p4697_p11), %v3274_v46  ;;  %v5480_v7 = vld [vmem:[%s6939_s4 + $0x4] ss:$16 sps:$4 sm:$0xff] (!%p4697_p11)   ;;  %v5482_v43 = vld [vmem:[%s6939_s4 + $0xc] ss:$16 sps:$4 sm:$0xff] (!%p4697_p11)   ;;  %v5484_v33 = vld [vmem:[%s6939_s4] ss:$16 sps:$4 sm:$0xff] (!%p4697_p11)  }
 0xa97   : > { %5582 = vrcp.f32 (!%p4697_p11), %v3266_v50  ;;  %v5485_v47 = vld [vmem:[%s6939_s4 + $0x8] ss:$16 sps:$4 sm:$0xff] (!%p4697_p11)   ;;  %3833 = vmatprep.subr.bf16.mxu0 (!%p4697_p11), %v5480_v7  ;;  %v5486_v11 = vld [vmem:[%s6939_s4 + $0x24] ss:$16 sps:$4 sm:$0xff] (!%p4697_p11)   ;;  %3906 = vmatprep.subr.bf16.mxu1 (!%p4697_p11), %v5482_v43  ;;  %v5488_v8 = vld [vmem:[%s6939_s4 + $0x2c] ss:$16 sps:$4 sm:$0xff] (!%p4697_p11)  }
 0xa98   : > { %5584 = vrcp.f32 (!%p4697_p11), %v3275_v53  ;;  %3834 = vmatpush1.bf16.msra.mxu0 (!%p4697_p11), %v5484_v33  ;;  %3907 = vmatpush1.bf16.msra.mxu1 (!%p4697_p11), %v5485_v47  ;;  %v5490_v13 = vld [vmem:[%s6939_s4 + $0x20] ss:$16 sps:$4 sm:$0xff] (!%p4697_p11)   ;;  %v5491_v10 = vld [vmem:[%s6939_s4 + $0x28] ss:$16 sps:$4 sm:$0xff] (!%p4697_p11)   ;;  %v5492_v49 = vld [vmem:[%s6939_s4 + $0x44] ss:$16 sps:$4 sm:$0xff] (!%p4697_p11)  }
 0xa99   : > { %5586 = vrcp.f32 (!%p4697_p11), %v3276_v20  ;;  %3835 = vmatprep.subr.bf16.mxu0 (!%p4697_p11), %v5486_v11  ;;  %v3278_v58 = vld [vmem:[#allocation5 + $0x68] sm:$0xff] (!%p4697_p11)  ;;  %3908 = vmatprep.subr.bf16.mxu1 (!%p4697_p11), %v5488_v8  ;;  %v5496_v14 = vld [vmem:[%s6939_s4 + $0x40] ss:$16 sps:$4 sm:$0xff] (!%p4697_p11)   ;;  %v5498_v9 = vld [vmem:[%s6939_s4 + $0x64] ss:$16 sps:$4 sm:$0xff] (!%p4697_p11)  }
 0xa9a   : > { %5588 = vrcp.f32 (!%p4697_p11), %v3267_v55  ;;  %v5494_v44 = vld [vmem:[%s6939_s4 + $0x4c] ss:$16 sps:$4 sm:$0xff] (!%p4697_p11)   ;;  %v5497_v29 = vld [vmem:[%s6939_s4 + $0x48] ss:$16 sps:$4 sm:$0xff] (!%p4697_p11)   ;;  %v3269_v5 = vld [vmem:[#allocation5 + $0x20] sm:$0xff] (!%p4697_p11) }
 0xa9b   : > { %5590 = vrcp.f32 %v3268_v3  ;;  %v5500_v21 = vld [vmem:[%s6939_s4 + $0x6c] ss:$16 sps:$4 sm:$0xff]   ;;  %v5502_v27 = vld [vmem:[%s6939_s4 + $0x60] ss:$16 sps:$4 sm:$0xff]   ;;  %v5503_v25 = vld [vmem:[%s6939_s4 + $0x68] ss:$16 sps:$4 sm:$0xff]  }
 0xa9c   : > { %3836 = vmatpush1.bf16.msra.mxu0 %v5490_v13  ;;  %3909 = vmatpush1.bf16.msra.mxu1 %v5491_v10  ;;  %5592 = vrcp.f32 %v3277_v41  ;;  %v3270_v57 = vld [vmem:[#allocation5 + $0x28] sm:$0xff]  ;;  %v3279_v32 = vld [vmem:[#allocation5 + $0x70] sm:$0xff]  ;;  %v3280_v23 = vld [vmem:[#allocation5 + $0x78] sm:$0xff] }
 0xa9d   : > { %3837 = vmatprep.subr.bf16.mxu0 %v5492_v49  ;;  %3910 = vmatprep.subr.bf16.mxu1 %v5494_v44  ;;  %5594 = vrcp.f32 %v3278_v58  ;;  %v5504_v61 = vld [vmem:[%s6939_s4 + $0x84] ss:$16 sps:$4 sm:$0xff]   ;;  %v5506_v42 = vld [vmem:[%s6939_s4 + $0x8c] ss:$16 sps:$4 sm:$0xff]   ;;  %v5508_v15 = vld [vmem:[%s6939_s4 + $0x80] ss:$16 sps:$4 sm:$0xff]  }
 0xa9e   : > { %v5577_v2 = vpop.eup %5576  ;;  %5596 = vrcp.f32 %v3269_v5  ;;  %v5509_v4 = vld [vmem:[%s6939_s4 + $0x88] ss:$16 sps:$4 sm:$0xff]   ;;  %v5510_v56 = vld [vmem:[%s6939_s4 + $0xa4] ss:$16 sps:$4 sm:$0xff]   ;;  %v5512_v12 = vld [vmem:[%s6939_s4 + $0xac] ss:$16 sps:$4 sm:$0xff]  }
 0xa9f   : > { %v5579_v45 = vpop.eup %5578  ;;  %3371 = vperm.xlu0 %5478, %v5577_v2   ;;  %5598 = vrcp.f32 %v3270_v57  ;;  %v3271_v18 = vld [vmem:[#allocation5 + $0x30] sm:$0xff]  ;;  %v3272_v6 = vld [vmem:[#allocation5 + $0x38] sm:$0xff] }
 0xaa0   : > { %v5581_v24 = vpop.eup %5580  ;;  %3307 = vperm.xlu1 %5479, %v5579_v45   ;;  %3838 = vmatpush1.bf16.msra.mxu0 %v5496_v14  ;;  %5600 = vrcp.f32 %v3279_v32  ;;  %v5514_v37 = vld [vmem:[%s6939_s4 + $0xa0] ss:$16 sps:$4 sm:$0xff]   ;;  %v5515_v31 = vld [vmem:[%s6939_s4 + $0xa8] ss:$16 sps:$4 sm:$0xff]   ;;  %v5516_v1 = vld [vmem:[%s6939_s4 + $0xc4] ss:$16 sps:$4 sm:$0xff]  }
 0xaa1   : > { %v5583_v28 = vpop.eup %5582  ;;  %3911 = vmatpush1.bf16.msra.mxu1 %v5497_v29  ;;  %3839 = vmatprep.subr.bf16.mxu0 %v5498_v9  ;;  %5602 = vrcp.f32 %v3280_v23  ;;  %v5518_v51 = vld [vmem:[%s6939_s4 + $0xcc] ss:$16 sps:$4 sm:$0xff]   ;;  %v5520_v30 = vld [vmem:[%s6939_s4 + $0xc0] ss:$16 sps:$4 sm:$0xff]   ;;  %v5521_v0 = vld [vmem:[%s6939_s4 + $0xc8] ss:$16 sps:$4 sm:$0xff]  }
 0xaa2   : > { %v5585_v62 = vpop.eup %5584  ;;  %3912 = vmatprep.subr.bf16.mxu1 %v5500_v21  ;;  %5604 = vrcp.f32 %v3271_v18  ;;  %v5522_v59 = vld [vmem:[%s6939_s4 + $0xe4] ss:$16 sps:$4 sm:$0xff]   ;;  %v5524_v60 = vld [vmem:[%s6939_s4 + $0xec] ss:$16 sps:$4 sm:$0xff]   ;;  %v5526_v17 = vld [vmem:[%s6939_s4 + $0xe0] ss:$16 sps:$4 sm:$0xff]  }
 0xaa3   : > { %3376 = vperm.xlu0 %5478, %v5581_v24   ;;  %v5587_v26 = vpop.eup %5586  ;;  %5606 = vrcp.f32 %v3272_v6  ;;  %v5527_v36 = vld [vmem:[%s6939_s4 + $0xe8] ss:$16 sps:$4 sm:$0xff]   ;;  %v5528_v22 = vld [vmem:[%s6939_s4 + $0x104] ss:$16 sps:$4 sm:$0xff]   ;;  %v5530_v38 = vld [vmem:[%s6939_s4 + $0x10c] ss:$16 sps:$4 sm:$0xff]  }
 0xaa4   : > { %3312 = vperm.xlu1 %5479, %v5583_v28   ;;  %v5589_v34 = vpop.eup %5588  ;;  %3840 = vmatpush1.bf16.msra.mxu0 %v5502_v27  ;;  %v5532_v46 = vld [vmem:[%s6939_s4 + $0x100] ss:$16 sps:$4 sm:$0xff]   ;;  %v5533_v16 = vld [vmem:[%s6939_s4 + $0x108] ss:$16 sps:$4 sm:$0xff]   ;;  %v5534_v53 = vld [vmem:[%s6939_s4 + $0x124] ss:$16 sps:$4 sm:$0xff]  }
 0xaa5   : > { %v5591_v40 = vpop.eup %5590  ;;  %3913 = vmatpush1.bf16.msra.mxu1 %v5503_v25  ;;  %3841 = vmatprep.subr.bf16.mxu0 %v5504_v61  ;;  %v5536_v20 = vld [vmem:[%s6939_s4 + $0x12c] ss:$16 sps:$4 sm:$0xff]   ;;  %v5538_v55 = vld [vmem:[%s6939_s4 + $0x120] ss:$16 sps:$4 sm:$0xff]   ;;  %v5539_v7 = vld [vmem:[%s6939_s4 + $0x128] ss:$16 sps:$4 sm:$0xff]  }
 0xaa6   : > { %3914 = vmatprep.subr.bf16.mxu1 %v5506_v42  ;;  %v5593_v52 = vpop.eup %5592  ;;  %v5540_v3 = vld [vmem:[%s6939_s4 + $0x144] ss:$16 sps:$4 sm:$0xff]   ;;  %v5542_v43 = vld [vmem:[%s6939_s4 + $0x14c] ss:$16 sps:$4 sm:$0xff]   ;;  %v5544_v33 = vld [vmem:[%s6939_s4 + $0x140] ss:$16 sps:$4 sm:$0xff]  }
 0xaa7   : > { %3381 = vperm.xlu0 %5478, %v5585_v62   ;;  %v5595_v39 = vpop.eup %5594  ;;  %v5545_v47 = vld [vmem:[%s6939_s4 + $0x148] ss:$16 sps:$4 sm:$0xff]   ;;  %v5546_v11 = vld [vmem:[%s6939_s4 + $0x164] ss:$16 sps:$4 sm:$0xff]   ;;  %v5548_v8 = vld [vmem:[%s6939_s4 + $0x16c] ss:$16 sps:$4 sm:$0xff]  }
 0xaa8   : > { %3386 = vperm.xlu1 %5479, %v5587_v26   ;;  %3842 = vmatpush1.bf16.msra.mxu0 %v5508_v15  ;;  %v5597_v54 = vpop.eup %5596  ;;  %v5550_v41 = vld [vmem:[%s6939_s4 + $0x160] ss:$16 sps:$4 sm:$0xff]   ;;  %v5551_v13 = vld [vmem:[%s6939_s4 + $0x168] ss:$16 sps:$4 sm:$0xff]   ;;  %v5552_v10 = vld [vmem:[%s6939_s4 + $0x184] ss:$16 sps:$4 sm:$0xff]  }
 0xaa9   : > { %3915 = vmatpush1.bf16.msra.mxu1 %v5509_v4  ;;  %3843 = vmatprep.subr.bf16.mxu0 %v5510_v56  ;;  %v5599_v35 = vpop.eup %5598  ;;  %v5554_v2 = vld [vmem:[%s6939_s4 + $0x18c] ss:$16 sps:$4 sm:$0xff]   ;;  %v5556_v58 = vld [vmem:[%s6939_s4 + $0x180] ss:$16 sps:$4 sm:$0xff]   ;;  %v5557_v49 = vld [vmem:[%s6939_s4 + $0x188] ss:$16 sps:$4 sm:$0xff]  }
 0xaaa   : > { %3916 = vmatprep.subr.bf16.mxu1 %v5512_v12  ;;  %v5601_v63 = vpop.eup %5600  ;;  %v5558_v45 = vld [vmem:[%s6939_s4 + $0x1a4] ss:$16 sps:$4 sm:$0xff]   ;;  %v5560_v44 = vld [vmem:[%s6939_s4 + $0x1ac] ss:$16 sps:$4 sm:$0xff]   ;;  %v5562_v14 = vld [vmem:[%s6939_s4 + $0x1a0] ss:$16 sps:$4 sm:$0xff]  }
 0xaab   : > { %3317 = vperm.xlu0 %5478, %v5589_v34   ;;  %v5603_v19 = vpop.eup %5602  ;;  %v5563_v24 = vld [vmem:[%s6939_s4 + $0x1a8] ss:$16 sps:$4 sm:$0xff]   ;;  %v5564_v29 = vld [vmem:[%s6939_s4 + $0x1c4] ss:$16 sps:$4 sm:$0xff]   ;;  %v5566_v28 = vld [vmem:[%s6939_s4 + $0x1cc] ss:$16 sps:$4 sm:$0xff]  }
 0xaac   : > { %3322 = vperm.xlu1 %5479, %v5591_v40   ;;  %3844 = vmatpush1.bf16.msra.mxu0 %v5514_v37  ;;  %v5605_v48 = vpop.eup %5604  ;;  %v5568_v9 = vld [vmem:[%s6939_s4 + $0x1c0] ss:$16 sps:$4 sm:$0xff]   ;;  %v5569_v5 = vld [vmem:[%s6939_s4 + $0x1c8] ss:$16 sps:$4 sm:$0xff]   ;;  %v5570_v21 = vld [vmem:[%s6939_s4 + $0x1e4] ss:$16 sps:$4 sm:$0xff]  }
 0xaad   : > { %3917 = vmatpush1.bf16.msra.mxu1 %v5515_v31  ;;  %3845 = vmatprep.subr.bf16.mxu0 %v5516_v1  ;;  %v5607_v50 = vpop.eup %5606  ;;  %v5572_v57 = vld [vmem:[%s6939_s4 + $0x1ec] ss:$16 sps:$4 sm:$0xff]   ;;  %v5574_v62 = vld [vmem:[%s6939_s4 + $0x1e0] ss:$16 sps:$4 sm:$0xff]   ;;  %v5575_v27 = vld [vmem:[%s6939_s4 + $0x1e8] ss:$16 sps:$4 sm:$0xff]  }
 0xaae   : > { %3918 = vmatprep.subr.bf16.mxu1 %v5518_v51  ;;  %v3361_v26 = vld [vmem:[#allocation3 + $0x8] sm:$0xff]  ;;  %v3297_v32 = vld [vmem:[#allocation3] sm:$0xff]  ;;  %v3362_v15 = vld [vmem:[#allocation3 + $0x18] sm:$0xff]  ;;  %s8706_s4 = sld [smem:[#allocation43_spill]] }
 0xaaf   : > { %3391 = vperm.xlu0 %5478, %v5593_v52   ;;  %v3298_v34 = vld [vmem:[#allocation3 + $0x10] sm:$0xff]  ;;  %v3363_v12 = vld [vmem:[#allocation3 + $0x28] sm:$0xff]  ;;  %v3364_v6 = vld [vmem:[#allocation3 + $0x38] sm:$0xff] }
 0xab0   : > { %3396 = vperm.xlu1 %5479, %v5595_v39   ;;  %3846 = vmatpush1.bf16.msra.mxu0 %v5520_v30  ;;  %v3299_v30 = vld [vmem:[#allocation3 + $0x20] sm:$0xff] }
 0xab1   : > { %3919 = vmatpush1.bf16.msra.mxu1 %v5521_v0  ;;  %3847 = vmatprep.subr.bf16.mxu0 %v5522_v59 }
 0xab2   : > { %3920 = vmatprep.subr.bf16.mxu1 %v5524_v60 }
 0xab3   : > { %3327 = vperm.xlu0 %5478, %v5597_v54   ;;  %v3300_v54 = vld [vmem:[#allocation3 + $0x30] sm:$0xff] }
 0xab4   : > { %3332 = vperm.xlu1 %5479, %v5599_v35   ;;  %3848 = vmatpush1.bf16.msra.mxu0 %v5526_v17  ;;  %v3365_v17 = vld [vmem:[#allocation3 + $0x48] sm:$0xff]  ;;  %p4762_p6 = scmp.ne.s32.totalorder %s8706_s4, 0 }
 0xab5   : > { %3921 = vmatpush1.bf16.msra.mxu1 %v5527_v36  ;;  %3849 = vmatprep.subr.bf16.mxu0 %v5528_v22 }
 0xab6   : > { %3922 = vmatprep.subr.bf16.mxu1 %v5530_v38 }
 0xab7   : > { %3401 = vperm.xlu0 %5478, %v5601_v63  }
 0xab8   : > { %3406 = vperm.xlu1 %5479, %v5603_v19   ;;  %3850 = vmatpush1.bf16.msra.mxu0 %v5532_v46  ;;  %v3366_v19 = vld [vmem:[#allocation3 + $0x58] sm:$0xff] }
 0xab9   : > { %3923 = vmatpush1.bf16.msra.mxu1 %v5533_v16  ;;  %3851 = vmatprep.subr.bf16.mxu0 %v5534_v53  ;;  %v3301_v16 = vld [vmem:[#allocation3 + $0x40] sm:$0xff] }
 0xaba   : > { %3924 = vmatprep.subr.bf16.mxu1 %v5536_v20 }
 0xabb   : > { %3337 = vperm.xlu0 %5478, %v5605_v48  }
 0xabc   : > { %3342 = vperm.xlu1 %5479, %v5607_v50   ;;  %3852 = vmatpush1.bf16.msra.mxu0 %v5538_v55  ;;  %v3302_v50 = vld [vmem:[#allocation3 + $0x50] sm:$0xff] }
 0xabd   : > { %3925 = vmatpush1.bf16.msra.mxu1 %v5539_v7  ;;  %3853 = vmatprep.subr.bf16.mxu0 %v5540_v3 }
 0xabe   : > { %3926 = vmatprep.subr.bf16.mxu1 %v5542_v43  ;;  %v3367_v43 = vld [vmem:[#allocation3 + $0x68] sm:$0xff] }
 0xac0   : > { %3854 = vmatpush1.bf16.msra.mxu0 %v5544_v33  ;;  %v3368_v33 = vld [vmem:[#allocation3 + $0x78] sm:$0xff] }
 0xac1   : > { %3927 = vmatpush1.bf16.msra.mxu1 %v5545_v47  ;;  %3855 = vmatprep.subr.bf16.mxu0 %v5546_v11 }
 0xac2   : > { %3928 = vmatprep.subr.bf16.mxu1 %v5548_v8 }
 0xac4   : > { %3856 = vmatpush1.bf16.msra.mxu0 %v5550_v41 }
 0xac5   : > { %3929 = vmatpush1.bf16.msra.mxu1 %v5551_v13  ;;  %3857 = vmatprep.subr.bf16.mxu0 %v5552_v10  ;;  %v3303_v10 = vld [vmem:[#allocation3 + $0x60] sm:$0xff] }
 0xac6   : > { %3930 = vmatprep.subr.bf16.mxu1 %v5554_v2  ;;  %v3304_v2 = vld [vmem:[#allocation3 + $0x70] sm:$0xff] }
 0xac8   : > { %3858 = vmatpush1.bf16.msra.mxu0 %v5556_v58 }
 0xac9   : > { %3931 = vmatpush1.bf16.msra.mxu1 %v5557_v49  ;;  %3859 = vmatprep.subr.bf16.mxu0 %v5558_v45 }
 0xaca   : > { %3932 = vmatprep.subr.bf16.mxu1 %v5560_v44 }
 0xacc   : > { %3860 = vmatpush1.bf16.msra.mxu0 %v5562_v14 }
 0xacd   : > { %3933 = vmatpush1.bf16.msra.mxu1 %v5563_v24  ;;  %3861 = vmatprep.subr.bf16.mxu0 %v5564_v29 }
 0xace   : > { %3934 = vmatprep.subr.bf16.mxu1 %v5566_v28 }
 0xad0   : > { %3862 = vmatpush1.bf16.msra.mxu0 %v5568_v9 }
 0xad1   : > { %3935 = vmatpush1.bf16.msra.mxu1 %v5569_v5  ;;  %3863 = vmatprep.subr.bf16.mxu0 %v5570_v21 }
 0xad2   : > { %3936 = vmatprep.subr.bf16.mxu1 %v5572_v57 }
 0xad4   : > { %3864 = vmatpush1.bf16.msra.mxu0 %v5574_v62 }
 0xad5   : > { %3937 = vmatpush1.bf16.msra.mxu1 %v5575_v27 }
 0xb1e   : > { %v3372_v25 = vpop.permute.xlu0 %3371 }
 0xb1f   : > { %v3409_v61 = vmul.f32 %v3372_v25, %v3361_v26  ;;  %v3308_v42 = vpop.permute.xlu1 %3307 }
 0xb20   : > { %v3345_v23 = vmul.f32 %v3308_v42, %v3297_v32 }
 0xb21   : > { %3417 = vst [vmem:[#allocation3 + $0x8] sm:$0xff] %v3409_v61 }
 0xb22   : > { %3353 = vst [vmem:[#allocation3] sm:$0xff] %v3345_v23  ;;  %v3377_v4 = vpop.permute.xlu0 %3376 }
 0xb23   : > { %v3410_v40 = vmul.f32 %v3377_v4, %v3362_v15  ;;  %v3313_v56 = vpop.permute.xlu1 %3312 }
 0xb24   : > { %v3346_v18 = vmul.f32 %v3313_v56, %v3298_v34 }
 0xb25   : > { %3418 = vst [vmem:[#allocation3 + $0x18] sm:$0xff] %v3410_v40  ;;  %v3442_v52 = vpack.c.bf16 %v3410_v40, %v3409_v61 }
 0xb26   : > { %3354 = vst [vmem:[#allocation3 + $0x10] sm:$0xff] %v3346_v18  ;;  %v3382_v37 = vpop.permute.xlu0 %3381  ;;  %v3441_v39 = vpack.c.bf16 %v3346_v18, %v3345_v23 }
 0xb27   : > { %v3411_v31 = vmul.f32 %v3382_v37, %v3363_v12  ;;  %v3387_v1 = vpop.permute.xlu1 %3386  ;;  %3865 = vmatprep.mubr.bf16.mxu0 %v3442_v52  ;;  %3938 = vmatprep.mubr.bf16.mxu1 %v3442_v52 }
 0xb28   : > { %v3412_v51 = vmul.f32 %v3387_v1, %v3364_v6  ;;  %3866 = vmatmul.mubr.bf16.vlgmr.msra.gmra.mrb[0].mxu0 %v3441_v39  ;;  %3939 = vmatmul.mubr.bf16.vlgmr.msra.gmra.mrb[0].mxu1 %v3441_v39 }
 0xb29   : > { %3419 = vst [vmem:[#allocation3 + $0x28] sm:$0xff] %v3411_v31 }
 0xb2a   : > { %3420 = vst [vmem:[#allocation3 + $0x38] sm:$0xff] %v3412_v51  ;;  %v3318_v0 = vpop.permute.xlu0 %3317  ;;  %v3444_v35 = vpack.c.bf16 %v3412_v51, %v3411_v31 }
 0xb2b   : > { %v3347_v59 = vmul.f32 %v3318_v0, %v3299_v30  ;;  %v3323_v60 = vpop.permute.xlu1 %3322 }
 0xb2c   : > { %v3348_v63 = vmul.f32 %v3323_v60, %v3300_v54  ;;  %3875 = vmatprep.mubr.bf16.mxu0 %v3444_v35  ;;  %3948 = vmatprep.mubr.bf16.mxu1 %v3444_v35 }
 0xb2d   : > { %3355 = vst [vmem:[#allocation3 + $0x20] sm:$0xff] %v3347_v59 }
 0xb2e   : > { %3356 = vst [vmem:[#allocation3 + $0x30] sm:$0xff] %v3348_v63  ;;  %v3392_v36 = vpop.permute.xlu0 %3391  ;;  %v3443_v22 = vpack.c.bf16 %v3348_v63, %v3347_v59 }
 0xb2f   : > { %v3413_v38 = vmul.f32 %v3392_v36, %v3365_v17  ;;  %v3397_v48 = vpop.permute.xlu1 %3396 }
 0xb30   : > { %v3414_v46 = vmul.f32 %v3397_v48, %v3366_v19  ;;  %3876 = vmatmul.mubr.bf16.gmra.mrb[4].mxu0 %v3443_v22  ;;  %3949 = vmatmul.mubr.bf16.gmra.mrb[4].mxu1 %v3443_v22 }
 0xb31   : > { %3421 = vst [vmem:[#allocation3 + $0x48] sm:$0xff] %v3413_v38 }
 0xb32   : > { %3422 = vst [vmem:[#allocation3 + $0x58] sm:$0xff] %v3414_v46  ;;  %v3328_v53 = vpop.permute.xlu0 %3327  ;;  %v3446_v20 = vpack.c.bf16 %v3414_v46, %v3413_v38 }
 0xb33   : > { %v3349_v55 = vmul.f32 %v3328_v53, %v3301_v16  ;;  %v3333_v7 = vpop.permute.xlu1 %3332 }
 0xb34   : > { %v3350_v3 = vmul.f32 %v3333_v7, %v3302_v50  ;;  %3885 = vmatprep.mubr.bf16.mxu0 %v3446_v20  ;;  %3958 = vmatprep.mubr.bf16.mxu1 %v3446_v20 }
 0xb35   : > { %3357 = vst [vmem:[#allocation3 + $0x40] sm:$0xff] %v3349_v55 }
 0xb36   : > { %3358 = vst [vmem:[#allocation3 + $0x50] sm:$0xff] %v3350_v3  ;;  %v3402_v47 = vpop.permute.xlu0 %3401  ;;  %v3445_v11 = vpack.c.bf16 %v3350_v3, %v3349_v55 }
 0xb37   : > { %v3415_v8 = vmul.f32 %v3402_v47, %v3367_v43  ;;  %v3407_v41 = vpop.permute.xlu1 %3406 }
 0xb38   : > { %v3416_v13 = vmul.f32 %v3407_v41, %v3368_v33  ;;  %3886 = vmatmul.mubr.bf16.gmra.mrb[8].mxu0 %v3445_v11  ;;  %3959 = vmatmul.mubr.bf16.gmra.mrb[8].mxu1 %v3445_v11 }
 0xb39   : > { %3423 = vst [vmem:[#allocation3 + $0x68] sm:$0xff] %v3415_v8 }
 0xb3a   : > { %3424 = vst [vmem:[#allocation3 + $0x78] sm:$0xff] %v3416_v13  ;;  %v3338_v58 = vpop.permute.xlu0 %3337  ;;  %v3448_v49 = vpack.c.bf16 %v3416_v13, %v3415_v8 }
 0xb3b   : > { %v3351_v45 = vmul.f32 %v3338_v58, %v3303_v10  ;;  %v3343_v44 = vpop.permute.xlu1 %3342 }
 0xb3c   : > { %v3352_v14 = vmul.f32 %v3343_v44, %v3304_v2  ;;  %3895 = vmatprep.mubr.bf16.mxu0 %v3448_v49  ;;  %3968 = vmatprep.mubr.bf16.mxu1 %v3448_v49 }
 0xb3d   : > { %3359 = vst [vmem:[#allocation3 + $0x60] sm:$0xff] %v3351_v45 }
 0xb3e   : > { %3360 = vst [vmem:[#allocation3 + $0x70] sm:$0xff] %v3352_v14  ;;  %v3447_v24 = vpack.c.bf16 %v3352_v14, %v3351_v45 }
 0xb40   : > { %3896 = vmatmul.mubr.bf16.gmra.mrb[12].mxu0 %v3447_v24  ;;  %3969 = vmatmul.mubr.bf16.gmra.mrb[12].mxu1 %v3447_v24 }
 0xbfb   : > { %v8165_v29 = vpop.f32.mrb[0].mxu0  ;;  %v8167_v28 = vpop.f32.mrb[0].mxu1 }
 0xbfc   : > { %v8169_v9 = vpop.f32.mrb[1].mxu0  ;;  %v8171_v5 = vpop.f32.mrb[1].mxu1  ;;  %3983 = vst [vmem:[#allocation6] sm:$0xff] (!%p4762_p6), %v8165_v29  ;;  %3985 = vst [vmem:[#allocation6 + $0x10] sm:$0xff] (!%p4762_p6), %v8167_v28 }
 0xbfd   : > { %v8173_v21 = vpop.f32.mrb[2].mxu0  ;;  %v8175_v57 = vpop.f32.mrb[2].mxu1  ;;  %3984 = vst [vmem:[#allocation6 + $0x8] sm:$0xff] (!%p4762_p6), %v8169_v9  ;;  %3986 = vst [vmem:[#allocation6 + $0x18] sm:$0xff] (!%p4762_p6), %v8171_v5 }
 0xbfe   : > { %v8177_v62 = vpop.f32.mrb[3].mxu0  ;;  %v8179_v27 = vpop.f32.mrb[3].mxu1  ;;  %3987 = vst [vmem:[#allocation6 + $0x20] sm:$0xff] (!%p4762_p6), %v8173_v21  ;;  %3989 = vst [vmem:[#allocation6 + $0x30] sm:$0xff] (!%p4762_p6), %v8175_v57 }
 0xbff   : > { %3988 = vst [vmem:[#allocation6 + $0x28] sm:$0xff] (!%p4762_p6), %v8177_v62  ;;  %3990 = vst [vmem:[#allocation6 + $0x38] sm:$0xff] (!%p4762_p6), %v8179_v27 }
 0xc03   : > { %v8181_v26 = vpop.f32.mrb[4].mxu0  ;;  %v8183_v32 = vpop.f32.mrb[4].mxu1 }
 0xc04   : > { %v8185_v25 = vpop.f32.mrb[5].mxu0  ;;  %v8187_v61 = vpop.f32.mrb[5].mxu1  ;;  %3991 = vst [vmem:[#allocation6 + $0x40] sm:$0xff] (!%p4762_p6), %v8181_v26  ;;  %3993 = vst [vmem:[#allocation6 + $0x50] sm:$0xff] (!%p4762_p6), %v8183_v32 }
 0xc05   : > { %v8189_v42 = vpop.f32.mrb[6].mxu0  ;;  %v8191_v23 = vpop.f32.mrb[6].mxu1  ;;  %3992 = vst [vmem:[#allocation6 + $0x48] sm:$0xff] (!%p4762_p6), %v8185_v25  ;;  %3994 = vst [vmem:[#allocation6 + $0x58] sm:$0xff] (!%p4762_p6), %v8187_v61 }
 0xc06   : > { %v8193_v15 = vpop.f32.mrb[7].mxu0  ;;  %v8195_v34 = vpop.f32.mrb[7].mxu1  ;;  %3995 = vst [vmem:[#allocation6 + $0x60] sm:$0xff] (!%p4762_p6), %v8189_v42  ;;  %3997 = vst [vmem:[#allocation6 + $0x70] sm:$0xff] (!%p4762_p6), %v8191_v23 }
 0xc07   : > { %3996 = vst [vmem:[#allocation6 + $0x68] sm:$0xff] (!%p4762_p6), %v8193_v15  ;;  %3998 = vst [vmem:[#allocation6 + $0x78] sm:$0xff] (!%p4762_p6), %v8195_v34 }
 0xc0b   : > { %v8197_v4 = vpop.f32.mrb[8].mxu0  ;;  %v8199_v40 = vpop.f32.mrb[8].mxu1 }
 0xc0c   : > { %v8201_v56 = vpop.f32.mrb[9].mxu0  ;;  %v8203_v18 = vpop.f32.mrb[9].mxu1  ;;  %3999 = vst [vmem:[#allocation6 + $0x80] sm:$0xff] (!%p4762_p6), %v8197_v4  ;;  %4001 = vst [vmem:[#allocation6 + $0x90] sm:$0xff] (!%p4762_p6), %v8199_v40 }
 0xc0d   : > { %v8205_v12 = vpop.f32.mrb[10].mxu0  ;;  %v8207_v6 = vpop.f32.mrb[10].mxu1  ;;  %4000 = vst [vmem:[#allocation6 + $0x88] sm:$0xff] (!%p4762_p6), %v8201_v56  ;;  %4002 = vst [vmem:[#allocation6 + $0x98] sm:$0xff] (!%p4762_p6), %v8203_v18 }
 0xc0e   : > { %v8209_v52 = vpop.f32.mrb[11].mxu0  ;;  %v8211_v37 = vpop.f32.mrb[11].mxu1  ;;  %4003 = vst [vmem:[#allocation6 + $0xa0] sm:$0xff] (!%p4762_p6), %v8205_v12  ;;  %4005 = vst [vmem:[#allocation6 + $0xb0] sm:$0xff] (!%p4762_p6), %v8207_v6 }
 0xc0f   : > { %4004 = vst [vmem:[#allocation6 + $0xa8] sm:$0xff] (!%p4762_p6), %v8209_v52  ;;  %4006 = vst [vmem:[#allocation6 + $0xb8] sm:$0xff] (!%p4762_p6), %v8211_v37 }
 0xc10   : > { %3982 = sbr.rel (%p4762_p6) target bundleno = 3096 (0xc18), region = 108 }
 0xc13   : > { %v8213_v39 = vpop.f32.mrb[12].mxu0  ;;  %v8215_v31 = vpop.f32.mrb[12].mxu1 }
 0xc14   : > { %v8217_v1 = vpop.f32.mrb[13].mxu0  ;;  %v8219_v51 = vpop.f32.mrb[13].mxu1  ;;  %4007 = vst [vmem:[#allocation6 + $0xc0] sm:$0xff] (!%p4762_p6), %v8213_v39  ;;  %4009 = vst [vmem:[#allocation6 + $0xd0] sm:$0xff] (!%p4762_p6), %v8215_v31 }
 0xc15   : > { %v8221_v30 = vpop.f32.mrb[14].mxu0  ;;  %v8223_v54 = vpop.f32.mrb[14].mxu1  ;;  %4008 = vst [vmem:[#allocation6 + $0xc8] sm:$0xff] (!%p4762_p6), %v8217_v1  ;;  %4010 = vst [vmem:[#allocation6 + $0xd8] sm:$0xff] (!%p4762_p6), %v8219_v51 }
 0xc16   : > { %v8225_v0 = vpop.f32.mrb[15].mxu0  ;;  %v8227_v35 = vpop.f32.mrb[15].mxu1  ;;  %4011 = vst [vmem:[#allocation6 + $0xe0] sm:$0xff] (!%p4762_p6), %v8221_v30  ;;  %4013 = vst [vmem:[#allocation6 + $0xf0] sm:$0xff] (!%p4762_p6), %v8223_v54 }
 0xc17   : > { %4012 = vst [vmem:[#allocation6 + $0xe8] sm:$0xff] %v8225_v0  ;;  %4014 = vst [vmem:[#allocation6 + $0xf8] sm:$0xff] %v8227_v35 }
 0xc18 PF: > { %s8707_s11 = sld [smem:[#allocation43_spill]] }
 0xc1e   : > { %p4763_p10 = scmp.le.s32.totalorder %s8707_s11, 0 }
 0xc1f   : > { %v4019_v59 = vld [vmem:[#allocation6] sm:$0xff] (!%p4763_p10)  ;;  %v4020_v60 = vld [vmem:[#allocation6 + $0x8] sm:$0xff] (!%p4763_p10)  ;;  %v4021_v63 = vld [vmem:[#allocation6 + $0x10] sm:$0xff] (!%p4763_p10) }
 0xc20   : > { %4018 = sbr.rel (%p4763_p10) target bundleno = 3122 (0xc32), region = 112  ;;  %v4051_v17 = vadd.f32 (!%p4763_p10), %v4019_v59, %v8165_v29  ;;  %v4052_v19 = vadd.f32 (!%p4763_p10), %v4020_v60, %v8169_v9  ;;  %v4053_v36 = vadd.f32 (!%p4763_p10), %v4021_v63, %v8167_v28  ;;  %v4022_v22 = vld [vmem:[#allocation6 + $0x18] sm:$0xff] (!%p4763_p10)  ;;  %v4023_v38 = vld [vmem:[#allocation6 + $0x20] sm:$0xff] (!%p4763_p10)  ;;  %v4024_v48 = vld [vmem:[#allocation6 + $0x28] sm:$0xff] (!%p4763_p10) }
 0xc21   : > { %v4054_v46 = vadd.f32 (!%p4763_p10), %v4022_v22, %v8171_v5  ;;  %v4055_v16 = vadd.f32 (!%p4763_p10), %v4023_v38, %v8173_v21  ;;  %v4056_v50 = vadd.f32 (!%p4763_p10), %v4024_v48, %v8177_v62  ;;  %v4025_v53 = vld [vmem:[#allocation6 + $0x30] sm:$0xff] (!%p4763_p10)  ;;  %v4026_v20 = vld [vmem:[#allocation6 + $0x38] sm:$0xff] (!%p4763_p10)  ;;  %v4027_v55 = vld [vmem:[#allocation6 + $0x40] sm:$0xff] (!%p4763_p10) }
 0xc22   : > { %4083 = vst [vmem:[#allocation6] sm:$0xff] (!%p4763_p10), %v4051_v17  ;;  %4084 = vst [vmem:[#allocation6 + $0x8] sm:$0xff] (!%p4763_p10), %v4052_v19  ;;  %v4057_v7 = vadd.f32 (!%p4763_p10), %v4025_v53, %v8175_v57  ;;  %v4058_v3 = vadd.f32 (!%p4763_p10), %v4026_v20, %v8179_v27  ;;  %v4059_v43 = vadd.f32 (!%p4763_p10), %v4027_v55, %v8181_v26  ;;  %v4028_v33 = vld [vmem:[#allocation6 + $0x48] sm:$0xff] (!%p4763_p10)  ;;  %v4029_v47 = vld [vmem:[#allocation6 + $0x50] sm:$0xff] (!%p4763_p10) }
 0xc23   : > { %4085 = vst [vmem:[#allocation6 + $0x10] sm:$0xff] (!%p4763_p10), %v4053_v36  ;;  %v4030_v11 = vld [vmem:[#allocation6 + $0x58] sm:$0xff] (!%p4763_p10)  ;;  %4086 = vst [vmem:[#allocation6 + $0x18] sm:$0xff] (!%p4763_p10), %v4054_v46  ;;  %v4060_v8 = vadd.f32 (!%p4763_p10), %v4028_v33, %v8185_v25  ;;  %v4061_v41 = vadd.f32 (!%p4763_p10), %v4029_v47, %v8183_v32  ;;  %v4031_v10 = vld [vmem:[#allocation6 + $0x60] sm:$0xff] (!%p4763_p10) }
 0xc24   : > { %4087 = vst [vmem:[#allocation6 + $0x20] sm:$0xff] (!%p4763_p10), %v4055_v16  ;;  %4088 = vst [vmem:[#allocation6 + $0x28] sm:$0xff] (!%p4763_p10), %v4056_v50  ;;  %v4062_v13 = vadd.f32 (!%p4763_p10), %v4030_v11, %v8187_v61  ;;  %v4032_v2 = vld [vmem:[#allocation6 + $0x68] sm:$0xff] (!%p4763_p10)  ;;  %v4033_v58 = vld [vmem:[#allocation6 + $0x70] sm:$0xff] (!%p4763_p10)  ;;  %v4063_v49 = vadd.f32 (!%p4763_p10), %v4031_v10, %v8189_v42 }
 0xc25   : > { %4089 = vst [vmem:[#allocation6 + $0x30] sm:$0xff] (!%p4763_p10), %v4057_v7  ;;  %4090 = vst [vmem:[#allocation6 + $0x38] sm:$0xff] (!%p4763_p10), %v4058_v3  ;;  %v4064_v45 = vadd.f32 (!%p4763_p10), %v4032_v2, %v8193_v15  ;;  %v4065_v44 = vadd.f32 (!%p4763_p10), %v4033_v58, %v8191_v23  ;;  %v4034_v14 = vld [vmem:[#allocation6 + $0x78] sm:$0xff] (!%p4763_p10)  ;;  %v4035_v24 = vld [vmem:[#allocation6 + $0x80] sm:$0xff] (!%p4763_p10) }
 0xc26   : > { %4091 = vst [vmem:[#allocation6 + $0x40] sm:$0xff] (!%p4763_p10), %v4059_v43  ;;  %v4036_v29 = vld [vmem:[#allocation6 + $0x88] sm:$0xff] (!%p4763_p10)  ;;  %4092 = vst [vmem:[#allocation6 + $0x48] sm:$0xff] (!%p4763_p10), %v4060_v8  ;;  %v4066_v28 = vadd.f32 (!%p4763_p10), %v4034_v14, %v8195_v34  ;;  %v4067_v9 = vadd.f32 (!%p4763_p10), %v4035_v24, %v8197_v4  ;;  %v4037_v21 = vld [vmem:[#allocation6 + $0x90] sm:$0xff] (!%p4763_p10) }
 0xc27   : > { %4093 = vst [vmem:[#allocation6 + $0x50] sm:$0xff] %v4061_v41  ;;  %4094 = vst [vmem:[#allocation6 + $0x58] sm:$0xff] %v4062_v13  ;;  %v4068_v5 = vadd.f32 %v4036_v29, %v8201_v56  ;;  %v4038_v57 = vld [vmem:[#allocation6 + $0x98] sm:$0xff]  ;;  %v4039_v62 = vld [vmem:[#allocation6 + $0xa0] sm:$0xff]  ;;  %v4069_v27 = vadd.f32 %v4037_v21, %v8199_v40 }
 0xc28   : > { %4095 = vst [vmem:[#allocation6 + $0x60] sm:$0xff] %v4063_v49  ;;  %4096 = vst [vmem:[#allocation6 + $0x68] sm:$0xff] %v4064_v45  ;;  %v4070_v26 = vadd.f32 %v4038_v57, %v8203_v18  ;;  %v4071_v32 = vadd.f32 %v4039_v62, %v8205_v12  ;;  %v4040_v25 = vld [vmem:[#allocation6 + $0xa8] sm:$0xff]  ;;  %v4041_v61 = vld [vmem:[#allocation6 + $0xb0] sm:$0xff] }
 0xc29   : > { %4097 = vst [vmem:[#allocation6 + $0x70] sm:$0xff] %v4065_v44  ;;  %v4042_v42 = vld [vmem:[#allocation6 + $0xb8] sm:$0xff]  ;;  %4098 = vst [vmem:[#allocation6 + $0x78] sm:$0xff] %v4066_v28  ;;  %v4072_v23 = vadd.f32 %v4040_v25, %v8209_v52  ;;  %v4073_v15 = vadd.f32 %v4041_v61, %v8207_v6  ;;  %v4043_v4 = vld [vmem:[#allocation6 + $0xc0] sm:$0xff] }
 0xc2a   : > { %4099 = vst [vmem:[#allocation6 + $0x80] sm:$0xff] %v4067_v9  ;;  %4100 = vst [vmem:[#allocation6 + $0x88] sm:$0xff] %v4068_v5  ;;  %v4074_v34 = vadd.f32 %v4042_v42, %v8211_v37  ;;  %v4044_v56 = vld [vmem:[#allocation6 + $0xc8] sm:$0xff]  ;;  %v4045_v59 = vld [vmem:[#allocation6 + $0xd0] sm:$0xff]  ;;  %v4075_v40 = vadd.f32 %v4043_v4, %v8213_v39 }
 0xc2b   : > { %4101 = vst [vmem:[#allocation6 + $0x90] sm:$0xff] %v4069_v27  ;;  %4102 = vst [vmem:[#allocation6 + $0x98] sm:$0xff] %v4070_v26  ;;  %v4076_v18 = vadd.f32 %v4044_v56, %v8217_v1  ;;  %v4077_v12 = vadd.f32 %v4045_v59, %v8215_v31  ;;  %v4046_v60 = vld [vmem:[#allocation6 + $0xd8] sm:$0xff]  ;;  %v4047_v63 = vld [vmem:[#allocation6 + $0xe0] sm:$0xff] }
 0xc2c   : > { %4103 = vst [vmem:[#allocation6 + $0xa0] sm:$0xff] %v4071_v32  ;;  %v4048_v17 = vld [vmem:[#allocation6 + $0xe8] sm:$0xff]  ;;  %4104 = vst [vmem:[#allocation6 + $0xa8] sm:$0xff] %v4072_v23  ;;  %v4078_v6 = vadd.f32 %v4046_v60, %v8219_v51  ;;  %v4079_v52 = vadd.f32 %v4047_v63, %v8221_v30  ;;  %v4049_v19 = vld [vmem:[#allocation6 + $0xf0] sm:$0xff] }
 0xc2d   : > { %4105 = vst [vmem:[#allocation6 + $0xb0] sm:$0xff] %v4073_v15  ;;  %4106 = vst [vmem:[#allocation6 + $0xb8] sm:$0xff] %v4074_v34  ;;  %v4080_v37 = vadd.f32 %v4048_v17, %v8225_v0  ;;  %v4050_v36 = vld [vmem:[#allocation6 + $0xf8] sm:$0xff]  ;;  %v4081_v39 = vadd.f32 %v4049_v19, %v8223_v54 }
 0xc2e   : > { %4107 = vst [vmem:[#allocation6 + $0xc0] sm:$0xff] %v4075_v40  ;;  %4108 = vst [vmem:[#allocation6 + $0xc8] sm:$0xff] %v4076_v18  ;;  %v4082_v31 = vadd.f32 %v4050_v36, %v8227_v35 }
 0xc2f   : > { %4109 = vst [vmem:[#allocation6 + $0xd0] sm:$0xff] %v4077_v12  ;;  %4110 = vst [vmem:[#allocation6 + $0xd8] sm:$0xff] %v4078_v6 }
 0xc30   : > { %4111 = vst [vmem:[#allocation6 + $0xe0] sm:$0xff] %v4079_v52  ;;  %4112 = vst [vmem:[#allocation6 + $0xe8] sm:$0xff] %v4080_v37 }
 0xc31   : > { %4113 = vst [vmem:[#allocation6 + $0xf0] sm:$0xff] %v4081_v39  ;;  %4114 = vst [vmem:[#allocation6 + $0xf8] sm:$0xff] %v4082_v31 }
 0xc32 PF: > { %s8708_s6 = sld [smem:[#allocation43_spill]] }
 0xc38   : > { %p4764_p5 = scmp.ne.s32.totalorder %s8708_s6, 1 }
 0xc39   : > { %v4119_v1 = vld [vmem:[#allocation6] sm:$0xff] (!%p4764_p5)  ;;  %v4120_v51 = vld [vmem:[#allocation6 + $0x8] sm:$0xff] (!%p4764_p5)  ;;  %v4121_v30 = vld [vmem:[#allocation6 + $0x10] sm:$0xff] (!%p4764_p5) }
 0xc3a   : > { %4118 = sbr.rel (%p4764_p5) target bundleno = 3146 (0xc4a), region = 116  ;;  %4151 = vst [vmem:[%s6963_s15] sm:$0xff] (!%p4764_p5), %v4119_v1  ;;  %4152 = vst [vmem:[%s6963_s15 + $0x8] sm:$0xff] (!%p4764_p5), %v4120_v51  ;;  %v4122_v54 = vld [vmem:[#allocation6 + $0x18] sm:$0xff] (!%p4764_p5)  ;;  %v4123_v0 = vld [vmem:[#allocation6 + $0x20] sm:$0xff] (!%p4764_p5) }
 0xc3b   : > { %4153 = vst [vmem:[%s6963_s15 + $0x10] sm:$0xff] (!%p4764_p5), %v4121_v30  ;;  %v4124_v35 = vld [vmem:[#allocation6 + $0x28] sm:$0xff] (!%p4764_p5)  ;;  %4154 = vst [vmem:[%s6963_s15 + $0x18] sm:$0xff] (!%p4764_p5), %v4122_v54  ;;  %v4125_v22 = vld [vmem:[#allocation6 + $0x30] sm:$0xff] (!%p4764_p5) }
 0xc3c   : > { %4155 = vst [vmem:[%s6963_s15 + $0x20] sm:$0xff] (!%p4764_p5), %v4123_v0  ;;  %4156 = vst [vmem:[%s6963_s15 + $0x28] sm:$0xff] (!%p4764_p5), %v4124_v35  ;;  %v4126_v38 = vld [vmem:[#allocation6 + $0x38] sm:$0xff] (!%p4764_p5)  ;;  %v4127_v48 = vld [vmem:[#allocation6 + $0x40] sm:$0xff] (!%p4764_p5) }
 0xc3d   : > { %4157 = vst [vmem:[%s6963_s15 + $0x30] sm:$0xff] (!%p4764_p5), %v4125_v22  ;;  %4158 = vst [vmem:[%s6963_s15 + $0x38] sm:$0xff] (!%p4764_p5), %v4126_v38  ;;  %v4128_v46 = vld [vmem:[#allocation6 + $0x48] sm:$0xff] (!%p4764_p5)  ;;  %v4129_v16 = vld [vmem:[#allocation6 + $0x50] sm:$0xff] (!%p4764_p5) }
 0xc3e   : > { %4159 = vst [vmem:[%s6963_s15 + $0x40] sm:$0xff] (!%p4764_p5), %v4127_v48  ;;  %v4130_v50 = vld [vmem:[#allocation6 + $0x58] sm:$0xff] (!%p4764_p5)  ;;  %4160 = vst [vmem:[%s6963_s15 + $0x48] sm:$0xff] (!%p4764_p5), %v4128_v46  ;;  %v4131_v53 = vld [vmem:[#allocation6 + $0x60] sm:$0xff] (!%p4764_p5) }
 0xc3f   : > { %4161 = vst [vmem:[%s6963_s15 + $0x50] sm:$0xff] (!%p4764_p5), %v4129_v16  ;;  %4162 = vst [vmem:[%s6963_s15 + $0x58] sm:$0xff] (!%p4764_p5), %v4130_v50  ;;  %v4132_v20 = vld [vmem:[#allocation6 + $0x68] sm:$0xff] (!%p4764_p5)  ;;  %v4133_v55 = vld [vmem:[#allocation6 + $0x70] sm:$0xff] (!%p4764_p5) }
 0xc40   : > { %4163 = vst [vmem:[%s6963_s15 + $0x60] sm:$0xff] (!%p4764_p5), %v4131_v53  ;;  %4164 = vst [vmem:[%s6963_s15 + $0x68] sm:$0xff] (!%p4764_p5), %v4132_v20  ;;  %v4134_v7 = vld [vmem:[#allocation6 + $0x78] sm:$0xff] (!%p4764_p5)  ;;  %v4135_v3 = vld [vmem:[#allocation6 + $0x80] sm:$0xff] (!%p4764_p5) }
 0xc41   : > { %4165 = vst [vmem:[%s6963_s15 + $0x70] sm:$0xff] %v4133_v55  ;;  %v4136_v43 = vld [vmem:[#allocation6 + $0x88] sm:$0xff]  ;;  %4166 = vst [vmem:[%s6963_s15 + $0x78] sm:$0xff] %v4134_v7  ;;  %v4137_v33 = vld [vmem:[#allocation6 + $0x90] sm:$0xff] }
 0xc42   : > { %4167 = vst [vmem:[%s6963_s15 + $0x80] sm:$0xff] %v4135_v3  ;;  %4168 = vst [vmem:[%s6963_s15 + $0x88] sm:$0xff] %v4136_v43  ;;  %v4138_v47 = vld [vmem:[#allocation6 + $0x98] sm:$0xff]  ;;  %v4139_v11 = vld [vmem:[#allocation6 + $0xa0] sm:$0xff] }
 0xc43   : > { %4169 = vst [vmem:[%s6963_s15 + $0x90] sm:$0xff] %v4137_v33  ;;  %4170 = vst [vmem:[%s6963_s15 + $0x98] sm:$0xff] %v4138_v47  ;;  %v4140_v8 = vld [vmem:[#allocation6 + $0xa8] sm:$0xff]  ;;  %v4141_v41 = vld [vmem:[#allocation6 + $0xb0] sm:$0xff] }
 0xc44   : > { %4171 = vst [vmem:[%s6963_s15 + $0xa0] sm:$0xff] %v4139_v11  ;;  %v4142_v13 = vld [vmem:[#allocation6 + $0xb8] sm:$0xff]  ;;  %4172 = vst [vmem:[%s6963_s15 + $0xa8] sm:$0xff] %v4140_v8  ;;  %v4143_v10 = vld [vmem:[#allocation6 + $0xc0] sm:$0xff] }
 0xc45   : > { %4173 = vst [vmem:[%s6963_s15 + $0xb0] sm:$0xff] %v4141_v41  ;;  %4174 = vst [vmem:[%s6963_s15 + $0xb8] sm:$0xff] %v4142_v13  ;;  %v4144_v2 = vld [vmem:[#allocation6 + $0xc8] sm:$0xff]  ;;  %v4145_v58 = vld [vmem:[#allocation6 + $0xd0] sm:$0xff] }
 0xc46   : > { %4175 = vst [vmem:[%s6963_s15 + $0xc0] sm:$0xff] %v4143_v10  ;;  %4176 = vst [vmem:[%s6963_s15 + $0xc8] sm:$0xff] %v4144_v2  ;;  %v4146_v49 = vld [vmem:[#allocation6 + $0xd8] sm:$0xff]  ;;  %v4147_v45 = vld [vmem:[#allocation6 + $0xe0] sm:$0xff] }
 0xc47   : > { %4177 = vst [vmem:[%s6963_s15 + $0xd0] sm:$0xff] %v4145_v58  ;;  %v4148_v44 = vld [vmem:[#allocation6 + $0xe8] sm:$0xff]  ;;  %4178 = vst [vmem:[%s6963_s15 + $0xd8] sm:$0xff] %v4146_v49  ;;  %v4149_v14 = vld [vmem:[#allocation6 + $0xf0] sm:$0xff] }
 0xc48   : > { %4179 = vst [vmem:[%s6963_s15 + $0xe0] sm:$0xff] %v4147_v45  ;;  %4180 = vst [vmem:[%s6963_s15 + $0xe8] sm:$0xff] %v4148_v44  ;;  %v4150_v24 = vld [vmem:[#allocation6 + $0xf8] sm:$0xff] }
 0xc49   : > { %4181 = vst [vmem:[%s6963_s15 + $0xf0] sm:$0xff] %v4149_v14  ;;  %4182 = vst [vmem:[%s6963_s15 + $0xf8] sm:$0xff] %v4150_v24 }
 0xc4a PF: > { %s8709_s22 = sld [smem:[#allocation44_spill]]  ;;  %s8710_s30 = sld [smem:[#allocation45_spill]] }
 0xc4b   : > { %s8711_s28 = sld [smem:[#allocation67_spill]]  ;;  %s4200_s23 = sshll.u32 %s6963_s15, 4  ;;  %s8331_s23 = int_to_ptr.vmem [resolvable:$true] %s4200_s23 }
 0xc4c   : > { %s8712_s12 = sld [smem:[#allocation77_spill]]  ;;  %s4184_s27 = scalar_lea.sflag [#allocation9], %s6903_s24 }
 0xc4d   : > { %s5878_s14 = scalar_lea.vmem %s8331_s23, 4096  ;;  %s6147_s25 = smov [#allocation22]  }
 0xc4e   : > { %p5879_p3 = scmp.ne.s32.totalorder %s8331_s23, %s5878_s14  ;;  %s5882_s15 = sshll.u32 %s6147_s25, 4  ;;  %s5883_s15 = int_to_ptr.vmem [resolvable:$false] %s5882_s15 }
 0xc4f   : > { %s5884_s19 = scalar_lea.vmem %s5883_s15, 8192  ;;  %p5885_p4 = scmp.lt.s32.totalorder %s8331_s23, %s5883_s15 }
 0xc50   : > { %s4783_s16 = sshll.u32 %s8709_s22, 5  ;;  %s4768_s21 = sshll.u32 %s8710_s30, 6 }
 0xc51   : > { %s4197_s20 = sadd.s32 %s4783_s16, %s4768_s21  ;;  %p8714_p12 = scmp.ne.s32.totalorder %s8711_s28, 0 }
 0xc52   : > { %s4769_s5 = sshll.u32 %s4197_s20, 7  ;;  %s8713_s7 = smov %s8712_s12 }
 0xc53   : > { %s8336_s10 = scalar_lea.hbm %s8712_s12, %s4769_s5  ;;  %p5880_p9 = pnand %p5879_p3, %p8714_p12 }
 0xc54   : > { %p5886_p1 = scmp.lt.s32.totalorder %s5884_s19, %s5878_s14 }
 0xc55   : > { %p5881_p13 = pneg %p5880_p9 }
 0xc56   : > { %p5887_p8 = por %p5886_p1, %p5885_p4 }
 0xc58   : > { %p5888_p0 = pnand %p5887_p8, %p5881_p13 }
 0xc5a   : > { %5891 = shalt.err (!%p5888_p0)
}
 0xc5b   : > { %s5892_s0 = scalar_lea.hbm %s8336_s10, 4096  ;;  %s5896_s11 = scalar_lea.hbm %s8713_s7, 16384 }
 0xc5c   : > { %p5893_p7 = scmp.ne.s32.totalorder %s8336_s10, %s5892_s0  ;;  %p5897_p6 = scmp.lt.u32.totalorder %s8336_s10, %s8713_s7 }
 0xc5d   : > { %p5898_p10 = scmp.lt.u32.totalorder %s5896_s11, %s5892_s0  ;;  %p5900_p3 = scmp.lt.u32.totalorder %s5892_s0, %s8336_s10 }
 0xc5e   : > { %p5894_p2 = pnand %p5893_p7, %p8714_p12 }
 0xc5f   : > { %p5899_p5 = por %p5898_p10, %p5897_p6 }
 0xc60   : > { %p5895_p11 = pneg %p5894_p2 }
 0xc61   : > { %p5901_p9 = por %p5900_p3, %p5899_p5 }
 0xc63   : > { %p5902_p13 = pnand %p5901_p9, %p5895_p11 }
 0xc65   : > { %5905 = shalt.err (!%p5902_p13)
}
 0xc66   : > { %s6148_s30 = smov 512   ;;  %s6149_s16 = smov 32  }
 0xc67   : > { %4930 = dma.vmem_to_hbm [thread:$0]  (%p8714_p12), %s8331_s23, 4096, %s8336_s10, %s4184_s27, %s6148_s30, %s6148_s30, %s6149_s16  }
 0xc68 PF: > { %s8715_s21 = sld [smem:[#allocation39_spill]]  ;;  %p4965_p4 = scmp.ge.s32.totalorder %s6124_s2, 2 }
 0xc69   : > { %p8716_p1 = scmp.ne.s32.totalorder %s8637_s26, 0 }
 0xc6b   : > { %p4961_p8 = pnand %p4965_p4, %p8716_p1 }
 0xc6e   : > { %s4215_s20 = sand.u32 1, %s8715_s21  }
 0xc6f   : > { %s4216_s5 = scalar_lea.sflag [#allocation9], %s4215_s20 }
 0xc70   : > { %6027 = dma.done.wait (!%p4961_p8), %s4216_s5, 4096  }
 0xc71   : > { %6029 = vsyncadd (!%p4961_p8), %s4216_s5, 4294963200  ;;  %s37_s2 = sadd.s32 1, %s6124_s2   ;;  %s8718_s30 = sld [smem:[#allocation31_spill]] }
 0xc72   : > { %p8367_p0 = scmp.ge.s32.totalorder %s37_s2, 18   ;;  %s8719_s10 = sld [smem:[#allocation32_spill]] }
 0xc73   : > { %s8720_s11 = sld [smem:[#allocation30_spill]]  ;;  %s8721_s12 = sld [smem:[#allocation33_spill]] }
 0xc74   : > { %s8722_s13 = sld [smem:[#allocation34_spill]]  ;;  %s8723_s14 = sld [smem:[#allocation60_spill]] }
 0xc75   : > { %s8724_s15 = sld [smem:[#allocation35_spill]]  ;;  %s8725_s16 = sld [smem:[#allocation36_spill]] }
 0xc76   : > { %s8726_s24 = sld [smem:[#allocation56_spill]]  ;;  %s8727_s18 = sld [smem:[#allocation37_spill]] }
 0xc77   : > { %s8728_s19 = sld [smem:[#allocation38_spill]]  ;;  %s8729_s20 = sld [smem:[#allocation62_spill]] }
 0xc78   : > { %s8730_s21 = sld [smem:[#allocation40_spill]]  ;;  %s8731_s22 = sld [smem:[#allocation41_spill]] }
 0xc79   : > { %s8732_s23 = sld [smem:[#allocation66_spill]]  ;;  %s8733_s26 = sld [smem:[#allocation46_spill]] }
 0xc7a   : > { %s8734_s25 = sld [smem:[#allocation47_spill]]  ;;  %s8735_s27 = sld [smem:[#allocation48_spill]] }
 0xc7b   : > { %s8736_s28 = sld [smem:[#allocation50_spill]]  ;;  %s8737_s0 = sld [smem:[#allocation54_spill]] }
 0xc7c   : > { %s8738_s4 = sld [smem:[#allocation57_spill]]  ;;  %s8739_s6 = sld [smem:[#allocation59_spill]] }
 0xc7d   : > { %8740 = sst [smem:[#allocation30_spill]] %s8726_s24  ;;  %36 = sbr.rel (!%p8367_p0) target bundleno = 35 (0x23), region = 223 }
 0xc7f   : > { %s8742_s24 = smov %s8733_s26  ;;  %s8743_s26 = smov %s6116_s9 }
 0xc81   : > { %s8744_s29 = smov %s8737_s0 }
 0xc82   : > { %s8745_s9 = smov %s8738_s4  ;;  %s8746_s4 = smov %s8739_s6 }
 0xc84   :  { %4221 = vsyncpa [#allocation8], 1 }
 0xc85   :  { %4223 = vsyncpa [#allocation8 + $0x1], 1 }
 0xc86   :  { %4224 = vsyncpa [#allocation11], 1 }
 0xc87   :  { %4226 = vsyncpa [#allocation11 + $0x1], 1 }
 0xc88   :  { %4227 = vsyncpa [#allocation14], 1 }
 0xc89   :  { %4229 = vsyncpa [#allocation14 + $0x1], 1 }
 0xc8a   :  { %4230 = vsyncpa [#allocation17], 1 }
 0xc8b   :  { %4232 = vsyncpa [#allocation17 + $0x1], 1 }
 0xc8c   :  { %4233 = vsyncpa [#allocation20], 1 }
 0xc8d   :  { %4235 = vsyncpa [#allocation20 + $0x1], 1 }
 0xc8e   :  { %4236 = vsyncpa [#allocation9], 1 }
 0xc8f   :  { %4238 = vsyncpa [#allocation9 + $0x1], 1 }

</bundles_post_ra>
